<compile_context>
chip_gen: v5e
topology: v5e:2x2
jax: 0.10.0
libtpu: 0.0.40
codegen_flags: <defaults>
</compile_context>

<pallas_src>
import jax
import jax.numpy as jnp
from jax import lax
from jax.experimental import pallas as pl
from jax.experimental.pallas import tpu as pltpu

# ---- model constants (fixed by the PyTorch module) ----
CIN = 144          # Conv1d in_channels
N_CONV = 256       # Conv1d out_channels / fc1 in_features
HID = 512          # fc1 out_features
OUT = 3            # fc2 out_features
K = 5              # conv kernel size
PAD = 2            # conv padding


# ------------------------- Pallas kernel -------------------------
def cnn_nn_kernel(x_ref, w_ref, bc_ref, w1_ref, b1_ref, w2_ref, b2_ref, out_ref):
    """One batch tile.

    x_ref : (TB, L + 2*PAD, CIN)   time-padded input tile (streamed)
    w_ref : (K, CIN, N_CONV)       conv weight, resident
    bc_ref: (1, N_CONV)            conv bias
    w1_ref: (N_CONV, HID)  b1_ref: (1, HID)
    w2_ref: (HID, OUT)     b2_ref: (1, OUT)
    out_ref: (TB, OUT)
    """
    tb, lp, cin = x_ref.shape
    k = w_ref.shape[0]
    nc = w_ref.shape[2]
    length = lp - 2 * PAD
    rows = tb * length

    # Conv1d(pad=2) as K accumulated matmuls over time-shifted slices.
    acc = jnp.zeros((rows, nc), jnp.float32)
    for j in range(k):                                   # static unroll (K=5 taps)
        xs = x_ref[:, j:j + length, :].reshape(rows, cin)
        acc = acc + jnp.dot(xs, w_ref[j], preferred_element_type=jnp.float32)

    y = jnp.tanh(acc + bc_ref[...])                      # (rows, N_CONV)

    # avg_pool1d over the full time axis + squeeze -> per-batch mean over L.
    pooled = jnp.mean(y.reshape(tb, length, nc), axis=1)  # (TB, N_CONV)

    h = jnp.maximum(
        jnp.dot(pooled, w1_ref[...], preferred_element_type=jnp.float32) + b1_ref[...],
        0.0)
    # TODO(synk): F.dropout(p=0.5, training=True) is stochastic; implemented as
    #             identity (eval/inference semantics). Could use pltpu.prng_* if needed.
    out_ref[...] = (
        jnp.dot(h, w2_ref[...], preferred_element_type=jnp.float32) + b2_ref[...])


# ------------------------- host-side wrapper -------------------------
def cnn_nn_forward(x, params, *, tb=8):
    """x: (B, L, CIN) float32 -> (B, OUT) float32."""
    w_conv, b_conv, w1, b1, w2, b2 = params
    batch, length, cin = x.shape
    assert cin == CIN
    assert batch % tb == 0, "batch must be a multiple of the batch tile"

    # Only host-side layout plumbing: zero-pad the time axis for the conv and
    # put the conv weight into (K, CIN, N_CONV) matmul order.
    x_pad = jnp.pad(x, ((0, 0), (PAD, PAD), (0, 0)))          # (B, L+2*PAD, CIN)
    lp = length + 2 * PAD
    wk = jnp.transpose(w_conv, (2, 1, 0))                     # (K, CIN, N_CONV)

    grid = (batch // tb,)

    return pl.pallas_call(
        cnn_nn_kernel,
        out_shape=jax.ShapeDtypeStruct((batch, OUT), jnp.float32),
        grid_spec=pltpu.PrefetchScalarGridSpec(
            num_scalar_prefetch=0,
            grid=grid,
            in_specs=[
                # streamed per batch tile (auto double-buffered)
                pl.BlockSpec((tb, lp, CIN), lambda i: (i, 0, 0)),
                # resident weights / biases (constant index maps)
                pl.BlockSpec((K, CIN, N_CONV), lambda i: (0, 0, 0)),
                pl.BlockSpec((1, N_CONV), lambda i: (0, 0)),
                pl.BlockSpec((N_CONV, HID), lambda i: (0, 0)),
                pl.BlockSpec((1, HID), lambda i: (0, 0)),
                pl.BlockSpec((HID, OUT), lambda i: (0, 0)),
                pl.BlockSpec((1, OUT), lambda i: (0, 0)),
            ],
            out_specs=pl.BlockSpec((tb, OUT), lambda i: (i, 0)),
        ),
        compiler_params=pltpu.CompilerParams(
            dimension_semantics=("parallel",)),   # lets v7x shard tiles over 2 TCs
    )(x_pad, wk, b_conv.reshape(1, N_CONV),
      w1, b1.reshape(1, HID), w2, b2.reshape(1, OUT))


# ------------------------- parameters -------------------------
def build_params(key):
    ks = jax.random.split(key, 6)
    w_conv = jax.random.normal(ks[0], (N_CONV, CIN, K), jnp.float32) * 0.05   # PyTorch (O, I, K)
    b_conv = jax.random.normal(ks[1], (N_CONV,), jnp.float32) * 0.05
    w1 = jax.random.normal(ks[2], (N_CONV, HID), jnp.float32) * 0.05          # stored (in, out)
    b1 = jax.random.normal(ks[3], (HID,), jnp.float32) * 0.05
    w2 = jax.random.normal(ks[4], (HID, OUT), jnp.float32) * 0.05
    b2 = jax.random.normal(ks[5], (OUT,), jnp.float32) * 0.05
    return w_conv, b_conv, w1, b1, w2, b2


# ------------------------- pure-JAX reference -------------------------
def reference_forward(x, params):
    w_conv, b_conv, w1, b1, w2, b2 = params
    xt = jnp.transpose(x, (0, 2, 1))                          # (B, CIN, L) — x.transpose(1, 2)
    y = lax.conv_general_dilated(xt, w_conv, window_strides=(1,),
                                 padding=[(PAD, PAD)],
                                 dimension_numbers=('NCH', 'OIH', 'NCH'))
    y = jnp.tanh(y + b_conv[None, :, None])
    pooled = y.mean(axis=2)                                   # avg_pool1d(full) + squeeze
    h = jnp.maximum(pooled @ w1 + b1, 0.0)
    return h @ w2 + b2                                        # dropout = identity (eval)


# ------------------------- main -------------------------
if __name__ == "__main__":
    key = jax.random.PRNGKey(0)
    k_x, k_p = jax.random.split(key)
    B, L = 16, 16                                             # small, alignment-friendly shapes
    x = jax.random.normal(k_x, (B, L, CIN), jnp.float32)      # module input: (batch, time, 144)
    params = build_params(k_p)

    out = jax.block_until_ready(cnn_nn_forward(x, params, tb=8))
    ref = jax.block_until_ready(reference_forward(x, params))

    assert out.shape == (B, OUT)
    assert jnp.allclose(out, ref, rtol=1e-4, atol=1e-4), (out, ref)
    print("KERNEL_OK")
</pallas_src>

<mosaic_0001>
module attributes {stable_mosaic.version = 11 : i64} {
  func.func @cnn_nn_kernel(%arg0: i32, %arg1: memref<8x20x144xf32, #tpu.memory_space<vmem>>, %arg2: memref<5x144x256xf32, #tpu.memory_space<vmem>>, %arg3: memref<1x256xf32, #tpu.memory_space<vmem>>, %arg4: memref<256x512xf32, #tpu.memory_space<vmem>>, %arg5: memref<1x512xf32, #tpu.memory_space<vmem>>, %arg6: memref<512x3xf32, #tpu.memory_space<vmem>>, %arg7: memref<1x3xf32, #tpu.memory_space<vmem>>, %arg8: memref<8x3xf32, #tpu.memory_space<vmem>>) attributes {dimension_semantics = [#tpu.dimension_semantics<parallel>], iteration_bounds = array<i64: 2>, scalar_prefetch = 0 : i64, scratch_operands = 0 : i64, tpu.core_type = #tpu.core_type<tc>, window_params = [{transform_indices = @transform_0, window_bounds = array<i64: 8, 20, 144>}, {pipeline_mode = #tpu.pipeline_mode<synchronous>, transform_indices = @transform_1, window_bounds = array<i64: 5, 144, 256>}, {pipeline_mode = #tpu.pipeline_mode<synchronous>, transform_indices = @transform_2, window_bounds = array<i64: 1, 256>}, {pipeline_mode = #tpu.pipeline_mode<synchronous>, transform_indices = @transform_3, window_bounds = array<i64: 256, 512>}, {pipeline_mode = #tpu.pipeline_mode<synchronous>, transform_indices = @transform_4, window_bounds = array<i64: 1, 512>}, {pipeline_mode = #tpu.pipeline_mode<synchronous>, transform_indices = @transform_5, window_bounds = array<i64: 512, 3>}, {pipeline_mode = #tpu.pipeline_mode<synchronous>, transform_indices = @transform_6, window_bounds = array<i64: 1, 3>}, {transform_indices = @transform_7, window_bounds = array<i64: 8, 3>}]} {
    %cst = arith.constant 0.000000e+00 : f32
    %0 = vector.broadcast %cst : f32 to vector<128x256xf32>
    %c0 = arith.constant 0 : index
    %c0_0 = arith.constant 0 : index
    %c0_1 = arith.constant 0 : index
    %1 = vector.load %arg1[%c0, %c0_0, %c0_1] : memref<8x20x144xf32, #tpu.memory_space<vmem>>, vector<8x16x144xf32>
    %2 = vector.shape_cast %1 : vector<8x16x144xf32> to vector<128x144xf32>
    %c0_2 = arith.constant 0 : index
    %c0_3 = arith.constant 0 : index
    %c0_4 = arith.constant 0 : index
    %3 = vector.load %arg2[%c0_2, %c0_3, %c0_4] : memref<5x144x256xf32, #tpu.memory_space<vmem>>, vector<1x144x256xf32>
    %4 = vector.shape_cast %3 : vector<1x144x256xf32> to vector<144x256xf32>
    %cst_5 = arith.constant dense<0.000000e+00> : vector<128x256xf32>
    %5 = tpu.matmul %2, %4, %cst_5 {dimension_numbers = #tpu.dot_dimension_numbers<[1], [0], [0], [1], [0, 0, 1, 1], [], []>} : vector<128x144xf32>, vector<144x256xf32>, vector<128x256xf32> -> vector<128x256xf32>
    %6 = arith.addf %0, %5 : vector<128x256xf32>
    %c0_6 = arith.constant 0 : index
    %c1 = arith.constant 1 : index
    %c0_7 = arith.constant 0 : index
    %7 = vector.load %arg1[%c0_6, %c1, %c0_7] : memref<8x20x144xf32, #tpu.memory_space<vmem>>, vector<8x16x144xf32>
    %8 = vector.shape_cast %7 : vector<8x16x144xf32> to vector<128x144xf32>
    %c1_8 = arith.constant 1 : index
    %c0_9 = arith.constant 0 : index
    %c0_10 = arith.constant 0 : index
    %9 = vector.load %arg2[%c1_8, %c0_9, %c0_10] : memref<5x144x256xf32, #tpu.memory_space<vmem>>, vector<1x144x256xf32>
    %10 = vector.shape_cast %9 : vector<1x144x256xf32> to vector<144x256xf32>
    %cst_11 = arith.constant dense<0.000000e+00> : vector<128x256xf32>
    %11 = tpu.matmul %8, %10, %cst_11 {dimension_numbers = #tpu.dot_dimension_numbers<[1], [0], [0], [1], [0, 0, 1, 1], [], []>} : vector<128x144xf32>, vector<144x256xf32>, vector<128x256xf32> -> vector<128x256xf32>
    %12 = arith.addf %6, %11 : vector<128x256xf32>
    %c0_12 = arith.constant 0 : index
    %c2 = arith.constant 2 : index
    %c0_13 = arith.constant 0 : index
    %13 = vector.load %arg1[%c0_12, %c2, %c0_13] : memref<8x20x144xf32, #tpu.memory_space<vmem>>, vector<8x16x144xf32>
    %14 = vector.shape_cast %13 : vector<8x16x144xf32> to vector<128x144xf32>
    %c2_14 = arith.constant 2 : index
    %c0_15 = arith.constant 0 : index
    %c0_16 = arith.constant 0 : index
    %15 = vector.load %arg2[%c2_14, %c0_15, %c0_16] : memref<5x144x256xf32, #tpu.memory_space<vmem>>, vector<1x144x256xf32>
    %16 = vector.shape_cast %15 : vector<1x144x256xf32> to vector<144x256xf32>
    %cst_17 = arith.constant dense<0.000000e+00> : vector<128x256xf32>
    %17 = tpu.matmul %14, %16, %cst_17 {dimension_numbers = #tpu.dot_dimension_numbers<[1], [0], [0], [1], [0, 0, 1, 1], [], []>} : vector<128x144xf32>, vector<144x256xf32>, vector<128x256xf32> -> vector<128x256xf32>
    %18 = arith.addf %12, %17 : vector<128x256xf32>
    %c0_18 = arith.constant 0 : index
    %c3 = arith.constant 3 : index
    %c0_19 = arith.constant 0 : index
    %19 = vector.load %arg1[%c0_18, %c3, %c0_19] : memref<8x20x144xf32, #tpu.memory_space<vmem>>, vector<8x16x144xf32>
    %20 = vector.shape_cast %19 : vector<8x16x144xf32> to vector<128x144xf32>
    %c3_20 = arith.constant 3 : index
    %c0_21 = arith.constant 0 : index
    %c0_22 = arith.constant 0 : index
    %21 = vector.load %arg2[%c3_20, %c0_21, %c0_22] : memref<5x144x256xf32, #tpu.memory_space<vmem>>, vector<1x144x256xf32>
    %22 = vector.shape_cast %21 : vector<1x144x256xf32> to vector<144x256xf32>
    %cst_23 = arith.constant dense<0.000000e+00> : vector<128x256xf32>
    %23 = tpu.matmul %20, %22, %cst_23 {dimension_numbers = #tpu.dot_dimension_numbers<[1], [0], [0], [1], [0, 0, 1, 1], [], []>} : vector<128x144xf32>, vector<144x256xf32>, vector<128x256xf32> -> vector<128x256xf32>
    %24 = arith.addf %18, %23 : vector<128x256xf32>
    %c0_24 = arith.constant 0 : index
    %c4 = arith.constant 4 : index
    %c0_25 = arith.constant 0 : index
    %25 = vector.load %arg1[%c0_24, %c4, %c0_25] : memref<8x20x144xf32, #tpu.memory_space<vmem>>, vector<8x16x144xf32>
    %26 = vector.shape_cast %25 : vector<8x16x144xf32> to vector<128x144xf32>
    %c4_26 = arith.constant 4 : index
    %c0_27 = arith.constant 0 : index
    %c0_28 = arith.constant 0 : index
    %27 = vector.load %arg2[%c4_26, %c0_27, %c0_28] : memref<5x144x256xf32, #tpu.memory_space<vmem>>, vector<1x144x256xf32>
    %28 = vector.shape_cast %27 : vector<1x144x256xf32> to vector<144x256xf32>
    %cst_29 = arith.constant dense<0.000000e+00> : vector<128x256xf32>
    %29 = tpu.matmul %26, %28, %cst_29 {dimension_numbers = #tpu.dot_dimension_numbers<[1], [0], [0], [1], [0, 0, 1, 1], [], []>} : vector<128x144xf32>, vector<144x256xf32>, vector<128x256xf32> -> vector<128x256xf32>
    %30 = arith.addf %24, %29 : vector<128x256xf32>
    %c0_30 = arith.constant 0 : index
    %c0_31 = arith.constant 0 : index
    %31 = vector.load %arg3[%c0_30, %c0_31] : memref<1x256xf32, #tpu.memory_space<vmem>>, vector<1x256xf32>
    %32 = vector.broadcast %31 : vector<1x256xf32> to vector<128x256xf32>
    %33 = arith.addf %30, %32 : vector<128x256xf32>
    %34 = math.tanh %33 : vector<128x256xf32>
    %35 = vector.shape_cast %34 : vector<128x256xf32> to vector<8x16x256xf32>
    %cst_32 = arith.constant dense<0.000000e+00> : vector<8x256xf32>
    %36 = vector.multi_reduction <add>, %35, %cst_32 [1] : vector<8x16x256xf32> to vector<8x256xf32>
    %cst_33 = arith.constant 1.600000e+01 : f32
    %37 = vector.broadcast %cst_33 : f32 to vector<8x256xf32>
    %38 = arith.divf %36, %37 : vector<8x256xf32>
    %c0_34 = arith.constant 0 : index
    %c0_35 = arith.constant 0 : index
    %39 = vector.load %arg4[%c0_34, %c0_35] : memref<256x512xf32, #tpu.memory_space<vmem>>, vector<256x512xf32>
    %cst_36 = arith.constant dense<0.000000e+00> : vector<8x512xf32>
    %40 = tpu.matmul %38, %39, %cst_36 {dimension_numbers = #tpu.dot_dimension_numbers<[1], [0], [0], [1], [0, 0, 1, 1], [], []>} : vector<8x256xf32>, vector<256x512xf32>, vector<8x512xf32> -> vector<8x512xf32>
    %c0_37 = arith.constant 0 : index
    %c0_38 = arith.constant 0 : index
    %41 = vector.load %arg5[%c0_37, %c0_38] : memref<1x512xf32, #tpu.memory_space<vmem>>, vector<1x512xf32>
    %42 = vector.broadcast %41 : vector<1x512xf32> to vector<8x512xf32>
    %43 = arith.addf %40, %42 : vector<8x512xf32>
    %cst_39 = arith.constant 0.000000e+00 : f32
    %44 = vector.broadcast %cst_39 : f32 to vector<8x512xf32>
    %45 = arith.maximumf %43, %44 : vector<8x512xf32>
    %c0_40 = arith.constant 0 : index
    %c0_41 = arith.constant 0 : index
    %46 = vector.load %arg6[%c0_40, %c0_41] : memref<512x3xf32, #tpu.memory_space<vmem>>, vector<512x3xf32>
    %cst_42 = arith.constant dense<0.000000e+00> : vector<8x3xf32>
    %47 = tpu.matmul %45, %46, %cst_42 {dimension_numbers = #tpu.dot_dimension_numbers<[1], [0], [0], [1], [0, 0, 1, 1], [], []>} : vector<8x512xf32>, vector<512x3xf32>, vector<8x3xf32> -> vector<8x3xf32>
    %c0_43 = arith.constant 0 : index
    %c0_44 = arith.constant 0 : index
    %48 = vector.load %arg7[%c0_43, %c0_44] : memref<1x3xf32, #tpu.memory_space<vmem>>, vector<1x3xf32>
    %49 = vector.broadcast %48 : vector<1x3xf32> to vector<8x3xf32>
    %50 = arith.addf %47, %49 : vector<8x3xf32>
    %c0_45 = arith.constant 0 : index
    %c0_46 = arith.constant 0 : index
    %51 = vector.load %arg8[%c0_45, %c0_46] : memref<8x3xf32, #tpu.memory_space<vmem>>, vector<8x3xf32>
    tpu.vector_store %arg8[%c0_45, %c0_46], %50 {strides = array<i32>} : memref<8x3xf32, #tpu.memory_space<vmem>>, vector<8x3xf32>,
    return
  }
  func.func @transform_0(%arg0: i32) -> (i32, i32, i32) {
    %c0_i32 = arith.constant 0 : i32
    %c0_i32_0 = arith.constant 0 : i32
    %c0_i32_1 = arith.constant 0 : i32
    return %arg0, %c0_i32, %c0_i32_0 : i32, i32, i32
  }
  func.func @transform_1(%arg0: i32) -> (i32, i32, i32) {
    %c0_i32 = arith.constant 0 : i32
    %c0_i32_0 = arith.constant 0 : i32
    %c0_i32_1 = arith.constant 0 : i32
    %c0_i32_2 = arith.constant 0 : i32
    return %c0_i32, %c0_i32_0, %c0_i32_1 : i32, i32, i32
  }
  func.func @transform_2(%arg0: i32) -> (i32, i32) {
    %c0_i32 = arith.constant 0 : i32
    %c0_i32_0 = arith.constant 0 : i32
    %c0_i32_1 = arith.constant 0 : i32
    return %c0_i32, %c0_i32_0 : i32, i32
  }
  func.func @transform_3(%arg0: i32) -> (i32, i32) {
    %c0_i32 = arith.constant 0 : i32
    %c0_i32_0 = arith.constant 0 : i32
    %c0_i32_1 = arith.constant 0 : i32
    return %c0_i32, %c0_i32_0 : i32, i32
  }
  func.func @transform_4(%arg0: i32) -> (i32, i32) {
    %c0_i32 = arith.constant 0 : i32
    %c0_i32_0 = arith.constant 0 : i32
    %c0_i32_1 = arith.constant 0 : i32
    return %c0_i32, %c0_i32_0 : i32, i32
  }
  func.func @transform_5(%arg0: i32) -> (i32, i32) {
    %c0_i32 = arith.constant 0 : i32
    %c0_i32_0 = arith.constant 0 : i32
    %c0_i32_1 = arith.constant 0 : i32
    return %c0_i32, %c0_i32_0 : i32, i32
  }
  func.func @transform_6(%arg0: i32) -> (i32, i32) {
    %c0_i32 = arith.constant 0 : i32
    %c0_i32_0 = arith.constant 0 : i32
    %c0_i32_1 = arith.constant 0 : i32
    return %c0_i32, %c0_i32_0 : i32, i32
  }
  func.func @transform_7(%arg0: i32) -> (i32, i32) {
    %c0_i32 = arith.constant 0 : i32
    %c0_i32_0 = arith.constant 0 : i32
    return %arg0, %c0_i32 : i32, i32
  }
}

</mosaic_0001>

<bundles_post_ra>
// kernel: tpu_custom_call.1
= control target key start
LH: loop header
LB: loop body
LE: loop exit
PB: predicated region body
PF: predicated region fallthrough
CT: control target
= control target key end

     0   :  { %12 = vsyncpa [#allocation3], 0  ;;  %s4020_s24 = smov 0   ;;  %s6327_s0 = inlined_call_operand.vmem [shape: f32[16,20,144], index: 0, kind: input, shape index: {}]   ;;  %s6328_s1 = inlined_call_operand.vmem [shape: f32[5,144,256], index: 1, kind: input, shape index: {}]   ;;  %s6329_s2 = inlined_call_operand.vmem [shape: f32[1,256], index: 2, kind: input, shape index: {}]   ;;  %s6330_s3 = inlined_call_operand.hbm [shape: f32[256,512], index: 3, kind: input, shape index: {}]   ;;  %s6331_s4 = inlined_call_operand.vmem [shape: f32[1,512], index: 4, kind: input, shape index: {}]   ;;  %s6332_s5 = inlined_call_operand.vmem [shape: f32[512,3], index: 5, kind: input, shape index: {}]   ;;  %s6333_s6 = inlined_call_operand.vmem [shape: f32[1,3], index: 6, kind: input, shape index: {}]   ;;  %s6334_s7 = inlined_call_operand.vmem [shape: f32[16,3], index: 7, kind: output, shape index: {}]  }
   0x1 LB: > { %s218_s27 = sshll.u32 %s6330_s3, 4  ;;  %s4029_s28 = sadd.s32 4294967295, %s3974_s24   ;;  %s3974_s24 = sphi %s4020_s24, %s18_s24   ;;  %s219_s27 = int_to_ptr.hbm [resolvable:$true] %s218_s27 }
   0x2   : > { %p3503_p0 = scmp.ge.s32.totalorder %s3974_s24, 1  ;;  %p201_p1 = scmp.lt.s32.totalorder %s3974_s24, 3 }
   0x3   : > { %p3826_p2 = scmp.eq.s32.totalorder %s4029_s28, 0  ;;  %s3976_s29 = smov [#allocation2]  }
   0x4   : > { %p202_p3 = pnand %p3503_p0, %p201_p1  ;;  %s220_s30 = sshll.u32 %s3976_s29, 4  ;;  %s221_s30 = int_to_ptr.vmem [resolvable:$true] %s220_s30 }
   0x5   : > { %s3977_s8 = smov 512   ;;  %s3978_s9 = smov 32  }
   0x6   : > { %p3822_p4 = pneg %p202_p3  ;;  %255 = sbr.rel (%p202_p3) target bundleno = 1118 (0x45e), region = 48 }
   0x8   : > { %p3823_p5 = pnand %p3826_p2, %p3822_p4 }
   0xa   : > { %3825 = dma.hbm_to_vmem [thread:$0]  (!%p3823_p5), %s219_s27, 16384, %s221_s30, [#allocation3], %s3977_s8, %s3977_s8, %s3978_s9  }
   0xb   : > { %3969 = dma.done.wait (%p3826_p2), [#allocation3], 16384  }
   0xc   : > { %3971 = vsyncadd (%p3826_p2), [#allocation3], 4294950912  ;;  %s3508_s10 = sshll.u32 %s4029_s28, 3  ;;  %v3541_v0 = vld [vmem:[%s6328_s1 + $0x210] sm:$0xff]  ;;  %v3542_v1 = vld [vmem:[%s6328_s1 + $0x218] sm:$0xff]  ;;  %vm447_vm0 = vcmask 1046528  }
   0xd   : > { %p289_p6 = scmp.lt.s32.totalorder %s3508_s10, 15  ;;  %v3545_v2 = vld [vmem:[%s6328_s1 + $0x230] sm:$0xff]  ;;  %614 = vmatpush.msra.mxu0 %v3541_v0  ;;  %744 = vmatpush.msra.mxu2 %v3542_v1  ;;  %v3546_v3 = vld [vmem:[%s6328_s1 + $0x238] sm:$0xff]  ;;  %v3539_v4 = vld [vmem:[%s6328_s1 + $0x200] sm:$0xff]  ;;  %vm581_vm1 = vcmask 130048   ;;  %vm1238_vm2 = vcmask 1045504  }
   0xe   : > { %v3540_v5 = vld [vmem:[%s6328_s1 + $0x208] sm:$0xff]  ;;  %693 = vmatpush.msra.mxu1 %v3545_v2  ;;  %823 = vmatpush.msra.mxu3 %v3546_v3  ;;  %v3543_v6 = vld [vmem:[%s6328_s1 + $0x220] sm:$0xff]  ;;  %v3537_v8 = vld [vmem:[%s6328_s1 + $0x1f0] sm:$0xff]  ;;  %vm1760_vm3 = vcmask 1044480   ;;  %vm2282_vm4 = vcmask 1043456   ;;  %vm3099_vm6 = vcmask 1041409  }
   0xf   : > { %s6372_s10 = smov (!%p289_p6, %s3508_s10), 15  ;;  %v3544_v7 = vld [vmem:[%s6328_s1 + $0x228] sm:$0xff]  ;;  %615 = vmatpush.msra.mxu0 %v3539_v4  ;;  %745 = vmatpush.msra.mxu2 %v3540_v5  ;;  %v3538_v11 = vld [vmem:[%s6328_s1 + $0x1f8] sm:$0xff]  ;;  %v3535_v14 = vld [vmem:[%s6328_s1 + $0x1e0] sm:$0xff]  ;;  %vm3101_vm7 = vcmask 1042434   ;;  %vm3103_vm8 = vcmask 1043459  }
  0x10   : > { %s3817_s11 = smul.u32 48, %s6372_s10  ;;  %694 = vmatpush.msra.mxu1 %v3543_v6  ;;  %824 = vmatpush.msra.mxu3 %v3544_v7  ;;  %v3536_v15 = vld [vmem:[%s6328_s1 + $0x1e8] sm:$0xff]  ;;  %v3533_v18 = vld [vmem:[%s6328_s1 + $0x1d0] sm:$0xff]  ;;  %v3534_v19 = vld [vmem:[%s6328_s1 + $0x1d8] sm:$0xff]  ;;  %vm3105_vm9 = vcmask 1044484   ;;  %vm3107_vm10 = vcmask 1045509  }
  0x11   : > { %616 = vmatpush.msra.mxu0 %v3537_v8  ;;  %746 = vmatpush.msra.mxu2 %v3538_v11  ;;  %v3531_v21 = vld [vmem:[%s6328_s1 + $0x1c0] sm:$0xff]  ;;  %v3532_v22 = vld [vmem:[%s6328_s1 + $0x1c8] sm:$0xff]  ;;  %v3529_v23 = vld [vmem:[%s6328_s1 + $0x1b0] sm:$0xff]  ;;  %vm3109_vm11 = vcmask 1046534   ;;  %vm3111_vm12 = vcmask 1047559   ;;  %p295_p7 = scmp.lt.s32.totalorder %s4029_s28, 1 }
  0x12   : > { %s4047_s20 = scalar_lea.vmem %s6327_s0, %s3817_s11  ;;  %v3530_v24 = vld [vmem:[%s6328_s1 + $0x1b8] sm:$0xff]  ;;  %v3527_v26 = vld [vmem:[%s6328_s1 + $0x1a0] sm:$0xff]  ;;  %v3528_v27 = vld [vmem:[%s6328_s1 + $0x1a8] sm:$0xff]  ;;  %vm3434_vm13 = vcmask 23552  }
  0x13   : > { %v4068_v9 = vld [vmem:[%s4047_s20 + $0x18] sm:$0xff]  ;;  %v368_v10 = vld [vmem:[%s4047_s20 + $0x8] sm:$0xfe]  ;;  %v370_v17 = vld [vmem:[%s4047_s20 + $0x28] sm:$0x1]  ;;  %617 = vmatpush.msra.mxu0 %v3535_v14  ;;  %747 = vmatpush.msra.mxu2 %v3536_v15  ;;  %s6374_s28 = smov (!%p295_p7, %s4029_s28), 1 }
  0x14   : > { %v451_v12 = vrot.slane %v368_v10, 1  ;;  %v452_v13 = vrot.slane %v4068_v9, 1  ;;  %v456_v20 = vrot.slane %v370_v17, 1  ;;  %v4111_v28 = vld [vmem:[%s4047_s20 + $0x48] sm:$0xff]  ;;  %v372_v29 = vld [vmem:[%s4047_s20 + $0x38] sm:$0xfe] }
  0x15   : > { %618 = vmatpush.msra.mxu0 %v3533_v18  ;;  %748 = vmatpush.msra.mxu2 %v3534_v19  ;;  %v3525_v30 = vld [vmem:[%s6328_s1 + $0x190] sm:$0xff]  ;;  %v3526_v31 = vld [vmem:[%s6328_s1 + $0x198] sm:$0xff]  ;;  %v461_v33 = vrot.slane %v372_v29, 1  ;;  %v462_v34 = vrot.slane %v4111_v28, 1  ;;  %v3523_v36 = vld [vmem:[%s6328_s1 + $0x180] sm:$0xff]  ;;  %s3510_s22 = sshll.u32 %s6374_s28, 3 }
  0x16   : > { %v453_v16 = vsel %vm447_vm0, %v451_v12, %v452_v13  ;;  %v457_v25 = vsel %vm447_vm0, %v452_v13, %v456_v20  ;;  %v365_v32 = vld [vmem:[%s6328_s1 + $0x110] sm:$0xff]  ;;  %v3524_v37 = vld [vmem:[%s6328_s1 + $0x188] sm:$0xff]  ;;  %v359_v38 = vld [vmem:[%s6328_s1 + $0xe0] sm:$0xff]  ;;  %s298_s26 = scalar_lea.vmem %s6334_s7, %s3510_s22 }
  0x17   : > { %3547 = vmatmul.msk.f32.vlgmr.msra.gmra.mxu1 %vm581_vm1, %v453_v16  ;;  %3563 = vmatmul.msk.f32.vlgmr.msra.gmra.mxu3 %vm581_vm1, %v453_v16  ;;  %v361_v35 = vld [vmem:[%s6328_s1 + $0xf0] sm:$0xff]  ;;  %v3522_v40 = vld [vmem:[%s6328_s1 + $0x178] sm:$0xff]  ;;  %v463_v41 = vsel %vm447_vm0, %v461_v33, %v462_v34  ;;  %v3519_v42 = vld [vmem:[%s6328_s1 + $0x160] sm:$0xff] }
  0x18   : > { %619 = vmatpush.msra.mxu0 %v3531_v21  ;;  %749 = vmatpush.msra.mxu2 %v3532_v22  ;;  %v3521_v39 = vld [vmem:[%s6328_s1 + $0x170] sm:$0xff]  ;;  %v3520_v43 = vld [vmem:[%s6328_s1 + $0x168] sm:$0xff]  ;;  %v374_v44 = vld [vmem:[%s4047_s20 + $0x58] sm:$0x1] }
  0x19   : > { %993 = vmatpush.msrb.mxu3 %v365_v32  ;;  %914 = vmatpush.msrb.mxu1 %v361_v35  ;;  %v3517_v45 = vld [vmem:[%s6328_s1 + $0x150] sm:$0xff]  ;;  %v3518_v46 = vld [vmem:[%s6328_s1 + $0x158] sm:$0xff]  ;;  %v367_v48 = vld [vmem:[%s4047_s20] sm:$0xfe]  ;;  %v466_v49 = vrot.slane %v374_v44, 1 }
  0x1a   : > { %620 = vmatpush.msra.mxu0 %v3529_v23  ;;  %750 = vmatpush.msra.mxu2 %v3530_v24  ;;  %v4161_v47 = vld [vmem:[%s4047_s20 + $0x10] sm:$0xff]  ;;  %v3515_v50 = vld [vmem:[%s6328_s1 + $0x140] sm:$0xff]  ;;  %v3516_v51 = vld [vmem:[%s6328_s1 + $0x148] sm:$0xff]  ;;  %v448_v53 = vrot.slane %v367_v48, 1 }
  0x1b   : > { %915 = vmatpush.msrb.mxu1 %v359_v38  ;;  %v357_v52 = vld [vmem:[%s6328_s1 + $0xd0] sm:$0xff]  ;;  %v449_v54 = vrot.slane %v4161_v47, 1  ;;  %v3514_v56 = vld [vmem:[%s6328_s1 + $0x138] sm:$0xff]  ;;  %v467_v57 = vsel %vm447_vm0, %v462_v34, %v466_v49  ;;  %v3511_v58 = vld [vmem:[%s6328_s1 + $0x120] sm:$0xff] }
  0x1c   : > { %621 = vmatpush.msra.mxu0 %v3527_v26  ;;  %751 = vmatpush.msra.mxu2 %v3528_v27  ;;  %v3513_v55 = vld [vmem:[%s6328_s1 + $0x130] sm:$0xff]  ;;  %v3512_v59 = vld [vmem:[%s6328_s1 + $0x128] sm:$0xff]  ;;  %v4188_v60 = vld [vmem:[%s4047_s20 + $0x78] sm:$0xff] }
  0x1d   : > { %916 = vmatpush.msrb.mxu1 %v357_v52  ;;  %v376_v61 = vld [vmem:[%s4047_s20 + $0x68] sm:$0xfe]  ;;  %v450_v62 = vsel %vm447_vm0, %v448_v53, %v449_v54  ;;  %v366_v63 = vld [vmem:[%s6328_s1 + $0x118] sm:$0xff]  ;;  %v369_v1 = vld [vmem:[%s4047_s20 + $0x20] sm:$0x1]  ;;  %v472_v3 = vrot.slane %v4188_v60, 1 }
  0x1e   : > { %622 = vmatpush.msra.mxu0 %v3525_v30  ;;  %752 = vmatpush.msra.mxu2 %v3526_v31  ;;  %v362_v0 = vld [vmem:[%s6328_s1 + $0xf8] sm:$0xff]  ;;  %v471_v2 = vrot.slane %v376_v61, 1  ;;  %v360_v4 = vld [vmem:[%s6328_s1 + $0xe8] sm:$0xff]  ;;  %v355_v5 = vld [vmem:[%s6328_s1 + $0xc0] sm:$0xff]  ;;  %v454_v6 = vrot.slane %v369_v1, 1 }
  0x1f   : > { %3548 = vmatmul.msk.f32.gmra.mxu1 %vm581_vm1, %v457_v25  ;;  %3564 = vmatmul.msk.f32.gmra.mxu3 %vm581_vm1, %v457_v25  ;;  %v358_v7 = vld [vmem:[%s6328_s1 + $0xd8] sm:$0xff]  ;;  %v378_v10 = vld [vmem:[%s4047_s20 + $0x88] sm:$0x1]  ;;  %v4220_v13 = vld [vmem:[%s4047_s20 + $0x40] sm:$0xff] }
  0x20   : > { %623 = vmatpush.msra.mxu0 %v3523_v36  ;;  %753 = vmatpush.msra.mxu2 %v3524_v37  ;;  %v473_v8 = vsel %vm447_vm0, %v471_v2, %v472_v3  ;;  %v356_v11 = vld [vmem:[%s6328_s1 + $0xc8] sm:$0xff]  ;;  %v455_v12 = vsel %vm447_vm0, %v449_v54, %v454_v6  ;;  %v371_v14 = vld [vmem:[%s4047_s20 + $0x30] sm:$0xfe]  ;;  %v354_v15 = vld [vmem:[%s6328_s1 + $0xb8] sm:$0xff]  ;;  %v476_v16 = vrot.slane %v378_v10, 1  ;;  %v459_v19 = vrot.slane %v4220_v13, 1 }
  0x21   : > { %917 = vmatpush.msrb.mxu1 %v355_v5  ;;  %v353_v17 = vld [vmem:[%s6328_s1 + $0xb0] sm:$0xff]  ;;  %v458_v18 = vrot.slane %v371_v14, 1  ;;  %v4232_v21 = vld [vmem:[%s4047_s20 + $0xa8] sm:$0xff]  ;;  %v380_v22 = vld [vmem:[%s4047_s20 + $0x98] sm:$0xfe] }
  0x22   : > { %624 = vmatpush.msra.mxu0 %v3521_v39  ;;  %754 = vmatpush.msra.mxu2 %v3522_v40  ;;  %v477_v20 = vsel %vm447_vm0, %v472_v3, %v476_v16  ;;  %v373_v24 = vld [vmem:[%s4047_s20 + $0x50] sm:$0x1]  ;;  %v352_v25 = vld [vmem:[%s6328_s1 + $0xa8] sm:$0xff]  ;;  %v481_v26 = vrot.slane %v380_v22, 1  ;;  %v482_v27 = vrot.slane %v4232_v21, 1  ;;  %v351_v29 = vld [vmem:[%s6328_s1 + $0xa0] sm:$0xff] }
  0x23   : > { %918 = vmatpush.msrb.mxu1 %v353_v17  ;;  %v460_v23 = vsel %vm447_vm0, %v458_v18, %v459_v19  ;;  %v464_v30 = vrot.slane %v373_v24, 1  ;;  %v382_v32 = vld [vmem:[%s4047_s20 + $0xb8] sm:$0x1]  ;;  %v4252_v34 = vld [vmem:[%s4047_s20 + $0x70] sm:$0xff]  ;;  %v375_v35 = vld [vmem:[%s4047_s20 + $0x60] sm:$0xfe] }
  0x24   : > { %625 = vmatpush.msra.mxu0 %v3519_v42  ;;  %755 = vmatpush.msra.mxu2 %v3520_v43  ;;  %v483_v31 = vsel %vm447_vm0, %v481_v26, %v482_v27  ;;  %v350_v36 = vld [vmem:[%s6328_s1 + $0x98] sm:$0xff]  ;;  %v486_v37 = vrot.slane %v382_v32, 1  ;;  %v349_v38 = vld [vmem:[%s6328_s1 + $0x90] sm:$0xff]  ;;  %v468_v39 = vrot.slane %v375_v35, 1  ;;  %v469_v40 = vrot.slane %v4252_v34, 1  ;;  %v363_v52 = vld [vmem:[%s6328_s1 + $0x100] sm:$0xff] }
  0x25   : > { %919 = vmatpush.msrb.mxu1 %v351_v29  ;;  %v465_v33 = vsel %vm447_vm0, %v459_v19, %v464_v30  ;;  %v4264_v42 = vld [vmem:[%s4047_s20 + $0xd8] sm:$0xff]  ;;  %v384_v43 = vld [vmem:[%s4047_s20 + $0xc8] sm:$0xfe]  ;;  %994 = vmatpush.msrb.mxu3 %v363_v52  ;;  %v381_v5 = vld [vmem:[%s4047_s20 + $0xb0] sm:$0x1] }
  0x26   : > { %626 = vmatpush.msra.mxu0 %v3517_v45  ;;  %756 = vmatpush.msra.mxu2 %v3518_v46  ;;  %v470_v44 = vsel %vm447_vm0, %v468_v39, %v469_v40  ;;  %v377_v45 = vld [vmem:[%s4047_s20 + $0x80] sm:$0x1]  ;;  %v348_v46 = vld [vmem:[%s6328_s1 + $0x88] sm:$0xff]  ;;  %v491_v48 = vrot.slane %v384_v43, 1  ;;  %v492_v49 = vrot.slane %v4264_v42, 1  ;;  %v4322_v16 = vld [vmem:[%s4047_s20 + $0xd0] sm:$0xff] }
  0x27   : > { %3549 = vmatmul.msk.f32.gmra.mxu1 %vm581_vm1, %v463_v41  ;;  %3565 = vmatmul.msk.f32.gmra.mxu3 %vm581_vm1, %v463_v41  ;;  %v487_v41 = vsel %vm447_vm0, %v482_v27, %v486_v37  ;;  %v474_v53 = vrot.slane %v377_v45, 1  ;;  %v4302_v2 = vld [vmem:[%s4047_s20 + $0x108] sm:$0xff]  ;;  %v388_v3 = vld [vmem:[%s4047_s20 + $0xf8] sm:$0xfe]  ;;  %v343_v10 = vld [vmem:[%s6328_s1 + $0x60] sm:$0xff]  ;;  %v489_v24 = vrot.slane %v4322_v16, 1 }
  0x28   : > { %627 = vmatpush.msra.mxu0 %v3515_v50  ;;  %757 = vmatpush.msra.mxu2 %v3516_v51  ;;  %v364_v50 = vld [vmem:[%s6328_s1 + $0x108] sm:$0xff]  ;;  %v347_v51 = vld [vmem:[%s6328_s1 + $0x80] sm:$0xff]  ;;  %v493_v54 = vsel %vm447_vm0, %v491_v48, %v492_v49  ;;  %v390_v14 = vld [vmem:[%s4047_s20 + $0x118] sm:$0x1] }
  0x29   : > { %920 = vmatpush.msrb.mxu1 %v349_v38  ;;  %v344_v6 = vld [vmem:[%s6328_s1 + $0x68] sm:$0xff]  ;;  %v383_v17 = vld [vmem:[%s4047_s20 + $0xc0] sm:$0xfe]  ;;  %v342_v18 = vld [vmem:[%s6328_s1 + $0x58] sm:$0xff]  ;;  %v506_v19 = vrot.slane %v390_v14, 1 }
  0x2a   : > { %628 = vmatpush.msra.mxu0 %v3513_v55  ;;  %758 = vmatpush.msra.mxu2 %v3514_v56  ;;  %v386_v55 = vld [vmem:[%s4047_s20 + $0xe8] sm:$0x1]  ;;  %v475_v56 = vsel %vm447_vm0, %v469_v40, %v474_v53  ;;  %v339_v22 = vld [vmem:[%s6328_s1 + $0x40] sm:$0xff]  ;;  %v4337_v26 = vld [vmem:[%s4047_s20 + $0x138] sm:$0xff] }
  0x2b   : > { %921 = vmatpush.msrb.mxu1 %v347_v51  ;;  %v496_v61 = vrot.slane %v386_v55, 1  ;;  %v392_v27 = vld [vmem:[%s4047_s20 + $0x128] sm:$0xfe]  ;;  %v385_v30 = vld [vmem:[%s4047_s20 + $0xe0] sm:$0x1]  ;;  %v512_v35 = vrot.slane %v4337_v26, 1 }
  0x2c   : > { %629 = vmatpush.msra.mxu0 %v3511_v58  ;;  %759 = vmatpush.msra.mxu2 %v3512_v59  ;;  %v379_v58 = vld [vmem:[%s4047_s20 + $0x90] sm:$0xfe]  ;;  %v346_v59 = vld [vmem:[%s6328_s1 + $0x78] sm:$0xff]  ;;  %v340_v32 = vld [vmem:[%s6328_s1 + $0x48] sm:$0xff]  ;;  %v494_v37 = vrot.slane %v385_v30, 1 }
  0x2d   : > { %630 = vmatmul.f32.vlgmr.msra.gmra.mxu0 %v450_v62  ;;  %760 = vmatmul.f32.vlgmr.msra.gmra.mxu2 %v450_v62  ;;  %v345_v62 = vld [vmem:[%s6328_s1 + $0x70] sm:$0xff]  ;;  %v497_v1 = vsel %vm447_vm0, %v492_v49, %v496_v61  ;;  %v331_v40 = vld [vmem:[%s6328_s1] sm:$0xff]  ;;  %v4375_v52 = vld [vmem:[%s4047_s20 + $0x168] sm:$0xff] }
  0x2e   : > { %1123 = vmatpush.msrb.mxu2 %v366_v63  ;;  %1044 = vmatpush.msrb.mxu0 %v362_v0  ;;  %v478_v63 = vrot.slane %v379_v58, 1  ;;  %v333_v38 = vld [vmem:[%s6328_s1 + $0x10] sm:$0xff]  ;;  %v495_v43 = vsel %vm447_vm0, %v489_v24, %v494_v37  ;;  %v396_v53 = vld [vmem:[%s4047_s20 + $0x158] sm:$0xfe] }
  0x2f   : > { %3550 = vmatmul.msk.f32.gmra.mxu1 %vm581_vm1, %v467_v57  ;;  %3566 = vmatmul.msk.f32.gmra.mxu3 %vm581_vm1, %v467_v57  ;;  %v4290_v57 = vld [vmem:[%s4047_s20 + $0xa0] sm:$0xff]  ;;  %v387_v45 = vld [vmem:[%s4047_s20 + $0xf0] sm:$0xfe]  ;;  %v389_v55 = vld [vmem:[%s4047_s20 + $0x110] sm:$0x1]  ;;  %v521_v58 = vrot.slane %v396_v53, 1 }
  0x30   : > { %1045 = vmatpush.msrb.mxu0 %v360_v4  ;;  %1124 = vmatpush.msrb.mxu2 %v364_v50  ;;  %v479_v0 = vrot.slane %v4290_v57, 1  ;;  %v498_v49 = vrot.slane %v387_v45, 1  ;;  %v504_v61 = vrot.slane %v389_v55, 1  ;;  %v3636_v53 = vld [vmem:[%s6328_s1 + $0x308] sm:$0xff] }
  0x31   : > { %922 = vmatpush.msrb.mxu1 %v345_v62 }
  0x32   : > { %1046 = vmatpush.msrb.mxu0 %v358_v7  ;;  %v480_v4 = vsel %vm447_vm0, %v478_v63, %v479_v0  ;;  %v501_v7 = vrot.slane %v388_v3, 1  ;;  %v398_v63 = vld [vmem:[%s4047_s20 + $0x178] sm:$0x1]  ;;  %v391_v3 = vld [vmem:[%s4047_s20 + $0x120] sm:$0xfe] }
  0x33   : > { %923 = vmatpush.msrb.mxu1 %v343_v10 }
  0x34   : > { %1047 = vmatpush.msrb.mxu0 %v356_v11  ;;  %v484_v11 = vrot.slane %v381_v5, 1  ;;  %v526_v5 = vrot.slane %v398_v63, 1 }
  0x35   : > { %633 = vmatmul.f32.gmra.mxu0 %v455_v12  ;;  %763 = vmatmul.f32.gmra.mxu2 %v455_v12 }
  0x36   : > { %1048 = vmatpush.msrb.mxu0 %v354_v15  ;;  %v485_v15 = vsel %vm447_vm0, %v479_v0, %v484_v11  ;;  %v393_v11 = vld [vmem:[%s4047_s20 + $0x140] sm:$0x1] }
  0x37   : > { %3551 = vmatmul.msk.f32.gmra.mxu1 %vm581_vm1, %v473_v8  ;;  %3567 = vmatmul.msk.f32.gmra.mxu3 %vm581_vm1, %v473_v8  ;;  %v502_v8 = vrot.slane %v4302_v2, 1  ;;  %v514_v14 = vrot.slane %v393_v11, 1 }
  0x38   : > { %1049 = vmatpush.msrb.mxu0 %v352_v25 }
  0x39   : > { %v503_v12 = vsel %vm447_vm0, %v501_v7, %v502_v8  ;;  %v507_v25 = vsel %vm447_vm0, %v502_v8, %v506_v19  ;;  %v300_v19 = vld [vmem:[%s4047_s20 + $0x8] sm:$0xff] }
  0x3a   : > { %1050 = vmatpush.msrb.mxu0 %v350_v36  ;;  %v335_v36 = vld [vmem:[%s6328_s1 + $0x20] sm:$0xff] }
  0x3c   : > { %1051 = vmatpush.msrb.mxu0 %v348_v46  ;;  %v338_v46 = vld [vmem:[%s6328_s1 + $0x38] sm:$0xff] }
  0x3d   : > { %636 = vmatmul.f32.gmra.mxu0 %v460_v23  ;;  %766 = vmatmul.f32.gmra.mxu2 %v460_v23  ;;  %v488_v23 = vrot.slane %v383_v17, 1 }
  0x3e   : > { %1052 = vmatpush.msrb.mxu0 %v346_v59  ;;  %v522_v59 = vrot.slane %v4375_v52, 1 }
  0x3f   : > { %3552 = vmatmul.msk.f32.gmra.mxu1 %vm581_vm1, %v477_v20  ;;  %3568 = vmatmul.msk.f32.gmra.mxu3 %vm581_vm1, %v477_v20  ;;  %v341_v20 = vld [vmem:[%s6328_s1 + $0x50] sm:$0xff]  ;;  %v490_v29 = vsel %vm447_vm0, %v488_v23, %v489_v24  ;;  %v4420_v23 = vld [vmem:[%s4047_s20 + $0x160] sm:$0xff] }
  0x40   : > { %1053 = vmatpush.msrb.mxu0 %v344_v6  ;;  %924 = vmatpush.msrb.mxu1 %v341_v20  ;;  %v523_v62 = vsel %vm447_vm0, %v521_v58, %v522_v59  ;;  %v508_v6 = vrot.slane %v391_v3, 1  ;;  %v527_v8 = vsel %vm447_vm0, %v522_v59, %v526_v5  ;;  %v3645_v20 = vld [vmem:[%s6328_s1 + $0x350] sm:$0xff]  ;;  %v519_v30 = vrot.slane %v4420_v23, 1  ;;  %v307_v58 = vld [vmem:[%s4047_s20 + $0x60] sm:$0xff]  ;;  %v308_v59 = vld [vmem:[%s4047_s20 + $0x68] sm:$0xff] }
  0x41   : > { %1483 = vmatpush.msra.mxu3 %v3645_v20  ;;  %v395_v24 = vld [vmem:[%s4047_s20 + $0x150] sm:$0xfe] }
  0x42   : > { %1054 = vmatpush.msrb.mxu0 %v342_v18  ;;  %925 = vmatpush.msrb.mxu1 %v339_v22  ;;  %v299_v18 = vld [vmem:[%s4047_s20] sm:$0xff] }
  0x44   : > { %1055 = vmatpush.msrb.mxu0 %v340_v32  ;;  %v3641_v32 = vld [vmem:[%s6328_s1 + $0x330] sm:$0xff] }
  0x45   : > { %639 = vmatmul.f32.gmra.mxu0 %v465_v33  ;;  %769 = vmatmul.f32.gmra.mxu2 %v465_v33  ;;  %v511_v33 = vrot.slane %v392_v27, 1 }
  0x46   : > { %1056 = vmatpush.msrb.mxu0 %v338_v46  ;;  %v3638_v46 = vld [vmem:[%s6328_s1 + $0x318] sm:$0xff] }
  0x47   : > { %3553 = vmatmul.msk.f32.gmra.mxu1 %vm581_vm1, %v483_v31  ;;  %3569 = vmatmul.msk.f32.gmra.mxu3 %vm581_vm1, %v483_v31  ;;  %v337_v31 = vld [vmem:[%s6328_s1 + $0x30] sm:$0xff]  ;;  %v513_v39 = vsel %vm447_vm0, %v511_v33, %v512_v35 }
  0x48   : > { %926 = vmatpush.msrb.mxu1 %v337_v31 }
  0x4a   : > { %927 = vmatpush.msrb.mxu1 %v335_v36  ;;  %v3640_v36 = vld [vmem:[%s6328_s1 + $0x328] sm:$0xff] }
  0x4c   : > { %928 = vmatpush.msrb.mxu1 %v333_v38 }
  0x4d   : > { %642 = vmatmul.f32.gmra.mxu0 %v470_v44  ;;  %772 = vmatmul.f32.gmra.mxu2 %v470_v44  ;;  %v4366_v44 = vld [vmem:[%s4047_s20 + $0x100] sm:$0xff] }
  0x4e   : > { %929 = vmatpush.msrb.mxu1 %v331_v40  ;;  %v499_v50 = vrot.slane %v4366_v44, 1  ;;  %v303_v40 = vld [vmem:[%s4047_s20 + $0x30] sm:$0xff] }
  0x4f   : > { %3554 = vmatmul.msk.f32.gmra.mxu1 %vm581_vm1, %v487_v41  ;;  %3570 = vmatmul.msk.f32.gmra.mxu3 %vm581_vm1, %v487_v41  ;;  %v394_v41 = vld [vmem:[%s4047_s20 + $0x148] sm:$0x1] }
  0x50   : > { %v516_v48 = vrot.slane %v394_v41, 1  ;;  %v505_v0 = vsel %vm447_vm0, %v499_v50, %v504_v61  ;;  %1404 = vmatpush.msra.mxu1 %v3641_v32  ;;  %v304_v41 = vld [vmem:[%s4047_s20 + $0x38] sm:$0xff]  ;;  %v3635_v61 = vld [vmem:[%s6328_s1 + $0x300] sm:$0xff] }
  0x52   : > { %v517_v51 = vsel %vm447_vm0, %v512_v35, %v516_v48  ;;  %v397_v35 = vld [vmem:[%s4047_s20 + $0x170] sm:$0x1] }
  0x53   : > { %v524_v38 = vrot.slane %v397_v35, 1  ;;  %v3644_v35 = vld [vmem:[%s6328_s1 + $0x348] sm:$0xff] }
  0x55   : > { %645 = vmatmul.f32.gmra.mxu0 %v475_v56  ;;  %775 = vmatmul.f32.gmra.mxu2 %v475_v56  ;;  %v336_v56 = vld [vmem:[%s6328_s1 + $0x28] sm:$0xff]  ;;  %v525_v45 = vsel %vm447_vm0, %v519_v30, %v524_v38  ;;  %v315_v38 = vld [vmem:[%s4047_s20 + $0xc0] sm:$0xff] }
  0x56   : > { %1057 = vmatpush.msrb.mxu0 %v336_v56 }
  0x57   : > { %3555 = vmatmul.msk.f32.gmra.mxu1 %vm581_vm1, %v493_v54  ;;  %3571 = vmatmul.msk.f32.gmra.mxu3 %vm581_vm1, %v493_v54  ;;  %v500_v54 = vsel %vm447_vm0, %v498_v49, %v499_v50  ;;  %v3637_v50 = vld [vmem:[%s6328_s1 + $0x310] sm:$0xff] }
  0x5d   : > { %648 = vmatmul.f32.gmra.mxu0 %v480_v4  ;;  %778 = vmatmul.f32.gmra.mxu2 %v480_v4  ;;  %v334_v4 = vld [vmem:[%s6328_s1 + $0x18] sm:$0xff] }
  0x5e   : > { %1058 = vmatpush.msrb.mxu0 %v334_v4 }
  0x5f   : > { %3556 = vmatmul.msk.f32.gmra.mxu1 %vm581_vm1, %v497_v1  ;;  %3572 = vmatmul.msk.f32.gmra.mxu3 %vm581_vm1, %v497_v1  ;;  %v4392_v1 = vld [vmem:[%s4047_s20 + $0x130] sm:$0xff] }
  0x60   : > { %v509_v7 = vrot.slane %v4392_v1, 1 }
  0x62   : > { %v510_v10 = vsel %vm447_vm0, %v508_v6, %v509_v7  ;;  %v515_v22 = vsel %vm447_vm0, %v509_v7, %v514_v14  ;;  %v3633_v6 = vld [vmem:[%s6328_s1 + $0x2f0] sm:$0xff] }
  0x63   : > { %v311_v14 = vld [vmem:[%s4047_s20 + $0x90] sm:$0xff] }
  0x65   : > { %651 = vmatmul.f32.gmra.mxu0 %v485_v15  ;;  %781 = vmatmul.f32.gmra.mxu2 %v485_v15  ;;  %v3646_v15 = vld [vmem:[%s6328_s1 + $0x358] sm:$0xff] }
  0x66   : > { %1613 = vmatpush.msra.mxu2 %v3646_v15  ;;  %v312_v15 = vld [vmem:[%s4047_s20 + $0x98] sm:$0xff] }
  0x67   : > { %3557 = vmatmul.msk.f32.gmra.mxu1 %vm581_vm1, %v503_v12  ;;  %3573 = vmatmul.msk.f32.gmra.mxu3 %vm581_vm1, %v503_v12  ;;  %v332_v12 = vld [vmem:[%s6328_s1 + $0x8] sm:$0xff] }
  0x68   : > { %1059 = vmatpush.msrb.mxu0 %v332_v12  ;;  %1614 = vmatpush.msra.mxu2 %v3644_v35 }
  0x6d   : > { %654 = vmatmul.f32.gmra.mxu0 %v490_v29  ;;  %784 = vmatmul.f32.gmra.mxu2 %v490_v29  ;;  %v518_v29 = vrot.slane %v395_v24, 1 }
  0x6f   : > { %3558 = vmatmul.msk.f32.gmra.mxu1 %vm581_vm1, %v507_v25  ;;  %3574 = vmatmul.msk.f32.gmra.mxu3 %vm581_vm1, %v507_v25  ;;  %v3642_v25 = vld [vmem:[%s6328_s1 + $0x338] sm:$0xff]  ;;  %v520_v33 = vsel %vm447_vm0, %v518_v29, %v519_v30  ;;  %v3629_v29 = vld [vmem:[%s6328_s1 + $0x2d0] sm:$0xff] }
  0x70   : > { %1534 = vmatpush.msra.mxu0 %v3642_v25 }
  0x72   : > { %1535 = vmatpush.msra.mxu0 %v3640_v36 }
  0x74   : > { %1536 = vmatpush.msra.mxu0 %v3638_v46 }
  0x75   : > { %657 = vmatmul.f32.gmra.mxu0 %v495_v43  ;;  %787 = vmatmul.f32.gmra.mxu2 %v495_v43  ;;  %v3639_v43 = vld [vmem:[%s6328_s1 + $0x320] sm:$0xff] }
  0x76   : > { %1405 = vmatpush.msra.mxu1 %v3639_v43  ;;  %1537 = vmatpush.msra.mxu0 %v3636_v53 }
  0x77   : > { %3559 = vmatmul.msk.f32.gmra.mxu1 %vm581_vm1, %v513_v39  ;;  %3575 = vmatmul.msk.f32.gmra.mxu3 %vm581_vm1, %v513_v39 }
  0x78   : > { %1406 = vmatpush.msra.mxu1 %v3637_v50 }
  0x7a   : > { %1407 = vmatpush.msra.mxu1 %v3635_v61 }
  0x7c   : > { %1408 = vmatpush.msra.mxu1 %v3633_v6  ;;  %v320_v6 = vld [vmem:[%s4047_s20 + $0xf8] sm:$0xff] }
  0x7d   : > { %660 = vmatmul.f32.gmra.mxu0 %v500_v54  ;;  %790 = vmatmul.f32.gmra.mxu2 %v500_v54 }
  0x7f   : > { %3560 = vmatmul.msk.f32.gmra.mxu1 %vm581_vm1, %v517_v51  ;;  %3576 = vmatmul.msk.f32.gmra.mxu3 %vm581_vm1, %v517_v51 }
  0x85   : > { %663 = vmatmul.f32.gmra.mxu0 %v505_v0  ;;  %793 = vmatmul.f32.gmra.mxu2 %v505_v0  ;;  %v3634_v0 = vld [vmem:[%s6328_s1 + $0x2f8] sm:$0xff] }
  0x86   : > { %1538 = vmatpush.msra.mxu0 %v3634_v0 }
  0x87   : > { %3561 = vmatmul.msk.f32.gmra.mxu1 %vm581_vm1, %v523_v62  ;;  %3577 = vmatmul.msk.f32.gmra.mxu3 %vm581_vm1, %v523_v62 }
  0x8d   : > { %666 = vmatmul.f32.gmra.mxu0 %v510_v10  ;;  %796 = vmatmul.f32.gmra.mxu2 %v510_v10 }
  0x8f   : > { %3562 = vmatmul.msk.f32.gmra.mxu1 %vm581_vm1, %v527_v8  ;;  %3578 = vmatmul.msk.f32.gmra.mxu3 %vm581_vm1, %v527_v8 }
  0x94   : > { %v4410_v17 = vpop.f32.mrf.mxu1 }
  0x95   : > { %669 = vmatmul.f32.gmra.mxu0 %v515_v22  ;;  %799 = vmatmul.f32.gmra.mxu2 %v515_v22  ;;  %v3630_v22 = vld [vmem:[%s6328_s1 + $0x2d8] sm:$0xff] }
  0x97   : > { %930 = vmatmul.f32.vlgmr.msrb.gmra.mxu1 %v299_v18  ;;  %3579 = vmatmul.msk.f32.vlgmr.msrb.gmra.mxu3 %vm581_vm1, %v300_v19 }
  0x9a   : > { %v826_v27 = vpop.f32.mrf.mxu3 }
  0x9c   : > { %v4427_v31 = vpop.f32.mrf.mxu1 }
  0x9d   : > { %672 = vmatmul.f32.gmra.mxu0 %v520_v33  ;;  %802 = vmatmul.f32.gmra.mxu2 %v520_v33 }
  0x9f   : > { %933 = vmatmul.f32.gmra.mxu1 %v4161_v47  ;;  %3580 = vmatmul.msk.f32.gmra.mxu3 %vm581_vm1, %v4068_v9 }
  0xa2   : > { %v829_v37 = vpop.f32.mrf.mxu3 }
  0xa4   : > { %v4440_v39 = vpop.f32.mrf.mxu1 }
  0xa5   : > { %675 = vmatmul.f32.gmra.mxu0 %v525_v45  ;;  %805 = vmatmul.f32.gmra.mxu2 %v525_v45  ;;  %v3643_v45 = vld [vmem:[%s6328_s1 + $0x340] sm:$0xff] }
  0xa6   : > { %1484 = vmatpush.msra.mxu3 %v3643_v45  ;;  %v324_v45 = vld [vmem:[%s4047_s20 + $0x128] sm:$0xff] }
  0xa7   : > { %936 = vmatmul.f32.gmra.mxu1 %v303_v40  ;;  %3581 = vmatmul.msk.f32.gmra.mxu3 %vm581_vm1, %v304_v41 }
  0xaa   : > { %v832_v48 = vpop.f32.mrf.mxu3  ;;  %v4457_v51 = vpop.f32.mrf.mxu0 }
  0xac   : > { %v4452_v49 = vpop.f32.mrf.mxu1 }
  0xad   : > { %1060 = vmatmul.f32.vlgmr.msrb.gmra.mxu0 %v299_v18  ;;  %3595 = vmatmul.msk.f32.vlgmr.msrb.gmra.mxu2 %vm581_vm1, %v300_v19  ;;  %v3631_v18 = vld [vmem:[%s6328_s1 + $0x2e0] sm:$0xff] }
  0xae   : > { %1409 = vmatpush.msra.mxu1 %v3631_v18 }
  0xaf   : > { %939 = vmatmul.f32.gmra.mxu1 %v4220_v13  ;;  %3582 = vmatmul.msk.f32.gmra.mxu3 %vm581_vm1, %v4111_v28 }
  0xb0   : > { %v761_v56 = vpop.f32.mrf.mxu2  ;;  %1410 = vmatpush.msra.mxu1 %v3629_v29 }
  0xb1   : > { %v4473_v62 = vadd.f32 %v826_v27, %v761_v56  ;;  %v3625_v56 = vld [vmem:[%s6328_s1 + $0x2b0] sm:$0xff] }
  0xb2   : > { %v835_v54 = vpop.f32.mrf.mxu3  ;;  %v4475_v63 = vpop.f32.mrf.mxu0 }
  0xb4   : > { %v4466_v55 = vpop.f32.mrf.mxu1 }
  0xb5   : > { %1063 = vmatmul.f32.gmra.mxu0 %v4161_v47  ;;  %3596 = vmatmul.msk.f32.gmra.mxu2 %vm581_vm1, %v4068_v9  ;;  %v3632_v9 = vld [vmem:[%s6328_s1 + $0x2e8] sm:$0xff] }
  0xb6   : > { %1539 = vmatpush.msra.mxu0 %v3632_v9  ;;  %v3623_v9 = vld [vmem:[%s6328_s1 + $0x2a0] sm:$0xff] }
  0xb7   : > { %942 = vmatmul.f32.gmra.mxu1 %v307_v58  ;;  %3583 = vmatmul.msk.f32.gmra.mxu3 %vm581_vm1, %v308_v59 }
  0xb8   : > { %v764_v5 = vpop.f32.mrf.mxu2  ;;  %1540 = vmatpush.msra.mxu0 %v3630_v22 }
  0xb9   : > { %v4489_v7 = vadd.f32 %v829_v37, %v764_v5  ;;  %v319_v5 = vld [vmem:[%s4047_s20 + $0xf0] sm:$0xff] }
  0xba   : > { %v838_v3 = vpop.f32.mrf.mxu3  ;;  %v4491_v8 = vpop.f32.mrf.mxu0 }
  0xbc   : > { %v4484_v4 = vpop.f32.mrf.mxu1 }
  0xbd   : > { %1066 = vmatmul.f32.gmra.mxu0 %v303_v40  ;;  %3597 = vmatmul.msk.f32.gmra.mxu2 %vm581_vm1, %v304_v41  ;;  %v316_v40 = vld [vmem:[%s4047_s20 + $0xc8] sm:$0xff]  ;;  %v3627_v41 = vld [vmem:[%s6328_s1 + $0x2c0] sm:$0xff] }
  0xbe   : > { %1411 = vmatpush.msra.mxu1 %v3627_v41  ;;  %v323_v41 = vld [vmem:[%s4047_s20 + $0x120] sm:$0xff] }
  0xbf   : > { %945 = vmatmul.f32.gmra.mxu1 %v4252_v34  ;;  %3584 = vmatmul.msk.f32.gmra.mxu3 %vm581_vm1, %v4188_v60 }
  0xc0   : > { %v767_v12 = vpop.f32.mrf.mxu2  ;;  %1412 = vmatpush.msra.mxu1 %v3625_v56  ;;  %v3618_v56 = vld [vmem:[%s6328_s1 + $0x278] sm:$0xff] }
  0xc1   : > { %v4507_v19 = vadd.f32 %v832_v48, %v767_v12  ;;  %v3626_v48 = vld [vmem:[%s6328_s1 + $0x2b8] sm:$0xff] }
  0xc2   : > { %v841_v10 = vpop.f32.mrf.mxu3  ;;  %v4509_v20 = vpop.f32.mrf.mxu0  ;;  %1413 = vmatpush.msra.mxu1 %v3623_v9 }
  0xc4   : > { %v4500_v11 = vpop.f32.mrf.mxu1 }
  0xc5   : > { %1069 = vmatmul.f32.gmra.mxu0 %v4220_v13  ;;  %3598 = vmatmul.msk.f32.gmra.mxu2 %vm581_vm1, %v4111_v28  ;;  %v3628_v28 = vld [vmem:[%s6328_s1 + $0x2c8] sm:$0xff] }
  0xc6   : > { %1541 = vmatpush.msra.mxu0 %v3628_v28 }
  0xc7   : > { %948 = vmatmul.f32.gmra.mxu1 %v311_v14  ;;  %3585 = vmatmul.msk.f32.gmra.mxu3 %vm581_vm1, %v312_v15 }
  0xc8   : > { %v770_v27 = vpop.f32.mrf.mxu2  ;;  %1542 = vmatpush.msra.mxu0 %v3626_v48 }
  0xc9   : > { %v4523_v30 = vadd.f32 %v835_v54, %v770_v27 }
  0xca   : > { %v844_v24 = vpop.f32.mrf.mxu3  ;;  %v4525_v32 = vpop.f32.mrf.mxu0 }
  0xcc   : > { %v4518_v25 = vpop.f32.mrf.mxu1 }
  0xcd   : > { %1072 = vmatmul.f32.gmra.mxu0 %v307_v58  ;;  %3599 = vmatmul.msk.f32.gmra.mxu2 %vm581_vm1, %v308_v59 }
  0xcf   : > { %951 = vmatmul.f32.gmra.mxu1 %v4290_v57  ;;  %3586 = vmatmul.msk.f32.gmra.mxu3 %vm581_vm1, %v4232_v21 }
  0xd0   : > { %v773_v37 = vpop.f32.mrf.mxu2 }
  0xd1   : > { %v4544_v43 = vadd.f32 %v838_v3, %v773_v37 }
  0xd2   : > { %v847_v33 = vpop.f32.mrf.mxu3  ;;  %v4549_v46 = vpop.f32.mrf.mxu0 }
  0xd4   : > { %v4537_v36 = vpop.f32.mrf.mxu1 }
  0xd5   : > { %1075 = vmatmul.f32.gmra.mxu0 %v4252_v34  ;;  %3600 = vmatmul.msk.f32.gmra.mxu2 %vm581_vm1, %v4188_v60  ;;  %v3624_v60 = vld [vmem:[%s6328_s1 + $0x2a8] sm:$0xff] }
  0xd6   : > { %1543 = vmatpush.msra.mxu0 %v3624_v60 }
  0xd7   : > { %954 = vmatmul.f32.gmra.mxu1 %v315_v38  ;;  %3587 = vmatmul.msk.f32.gmra.mxu3 %vm581_vm1, %v316_v40 }
  0xd8   : > { %v776_v54 = vpop.f32.mrf.mxu2 }
  0xd9   : > { %v4563_v58 = vadd.f32 %v841_v10, %v776_v54  ;;  %v3617_v54 = vld [vmem:[%s6328_s1 + $0x270] sm:$0xff] }
  0xda   : > { %v850_v50 = vpop.f32.mrf.mxu3  ;;  %v4565_v59 = vpop.f32.mrf.mxu0 }
  0xdc   : > { %v4558_v53 = vpop.f32.mrf.mxu1 }
  0xdd   : > { %1078 = vmatmul.f32.gmra.mxu0 %v311_v14  ;;  %3601 = vmatmul.msk.f32.gmra.mxu2 %vm581_vm1, %v312_v15  ;;  %v3622_v14 = vld [vmem:[%s6328_s1 + $0x298] sm:$0xff] }
  0xde   : > { %1544 = vmatpush.msra.mxu0 %v3622_v14 }
  0xdf   : > { %957 = vmatmul.f32.gmra.mxu1 %v4322_v16  ;;  %3588 = vmatmul.msk.f32.gmra.mxu3 %vm581_vm1, %v4264_v42 }
  0xe0   : > { %v779_v3 = vpop.f32.mrf.mxu2 }
  0xe1   : > { %v4581_v10 = vadd.f32 %v844_v24, %v779_v3  ;;  %v3621_v24 = vld [vmem:[%s6328_s1 + $0x290] sm:$0xff]  ;;  %v3611_v3 = vld [vmem:[%s6328_s1 + $0x240] sm:$0xff] }
  0xe2   : > { %v853_v61 = vpop.f32.mrf.mxu3  ;;  %v4583_v12 = vpop.f32.mrf.mxu0  ;;  %1414 = vmatpush.msra.mxu1 %v3621_v24 }
  0xe4   : > { %v4574_v0 = vpop.f32.mrf.mxu1 }
  0xe5   : > { %1081 = vmatmul.f32.gmra.mxu0 %v4290_v57  ;;  %3602 = vmatmul.msk.f32.gmra.mxu2 %vm581_vm1, %v4232_v21  ;;  %v3620_v21 = vld [vmem:[%s6328_s1 + $0x288] sm:$0xff] }
  0xe6   : > { %1545 = vmatpush.msra.mxu0 %v3620_v21 }
  0xe7   : > { %960 = vmatmul.f32.gmra.mxu1 %v319_v5  ;;  %3589 = vmatmul.msk.f32.gmra.mxu3 %vm581_vm1, %v320_v6 }
  0xe8   : > { %v782_v22 = vpop.f32.mrf.mxu2  ;;  %1546 = vmatpush.msra.mxu0 %v3618_v56 }
  0xe9   : > { %v4597_v27 = vadd.f32 %v847_v33, %v782_v22  ;;  %v3619_v33 = vld [vmem:[%s6328_s1 + $0x280] sm:$0xff] }
  0xea   : > { %v856_v15 = vpop.f32.mrf.mxu3  ;;  %v4599_v29 = vpop.f32.mrf.mxu0  ;;  %1415 = vmatpush.msra.mxu1 %v3619_v33 }
  0xec   : > { %v4592_v18 = vpop.f32.mrf.mxu1  ;;  %1416 = vmatpush.msra.mxu1 %v3617_v54  ;;  %v4657_v54 = vld [vmem:[%s4047_s20 + $0x158] sm:$0xff] }
  0xed   : > { %1084 = vmatmul.f32.gmra.mxu0 %v315_v38  ;;  %3603 = vmatmul.msk.f32.gmra.mxu2 %vm581_vm1, %v316_v40  ;;  %v3615_v40 = vld [vmem:[%s6328_s1 + $0x260] sm:$0xff] }
  0xee   : > { %1417 = vmatpush.msra.mxu1 %v3615_v40 }
  0xef   : > { %963 = vmatmul.f32.gmra.mxu1 %v4366_v44  ;;  %3590 = vmatmul.msk.f32.gmra.mxu3 %vm581_vm1, %v4302_v2 }
  0xf0   : > { %v785_v37 = vpop.f32.mrf.mxu2 }
  0xf1   : > { %v4615_v48 = vadd.f32 %v850_v50, %v785_v37  ;;  %v3613_v50 = vld [vmem:[%s6328_s1 + $0x250] sm:$0xff] }
  0xf2   : > { %v859_v28 = vpop.f32.mrf.mxu3  ;;  %v4620_v38 = vpop.f32.mrf.mxu0  ;;  %1418 = vmatpush.msra.mxu1 %v3613_v50  ;;  %v4654_v37 = vld [vmem:[%s4047_s20 + $0x150] sm:$0xff] }
  0xf4   : > { %v4611_v35 = vpop.f32.mrf.mxu1  ;;  %1419 = vmatpush.msra.mxu1 %v3611_v3 }
  0xf5   : > { %1087 = vmatmul.f32.gmra.mxu0 %v4322_v16  ;;  %3604 = vmatmul.msk.f32.gmra.mxu2 %vm581_vm1, %v4264_v42  ;;  %v3616_v42 = vld [vmem:[%s6328_s1 + $0x268] sm:$0xff] }
  0xf6   : > { %1547 = vmatpush.msra.mxu0 %v3616_v42  ;;  %v1174_v42 = vld [vmem:[%s4047_s20] sm:$0xfc] }
  0xf7   : > { %966 = vmatmul.f32.gmra.mxu1 %v323_v41  ;;  %3591 = vmatmul.msk.f32.gmra.mxu3 %vm581_vm1, %v324_v45 }
  0xf8   : > { %v788_v14 = vpop.f32.mrf.mxu2 }
  0xf9   : > { %v4640_v22 = vadd.f32 %v853_v61, %v788_v14  ;;  %v1175_v14 = vld [vmem:[%s4047_s20 + $0x8] sm:$0xfc] }
  0xfa   : > { %v862_v60 = vpop.f32.mrf.mxu3  ;;  %v4642_v24 = vpop.f32.mrf.mxu0 }
  0xfb   : > { %6338 = vst [vmem:[#allocation6_spill] sm:$0xff] %v4640_v22  ;;  %v697_v22 = vadd.f32 %v4410_v17, %v4457_v51 }
  0xfc   : > { %v4638_v9 = vpop.f32.mrf.mxu1 }
  0xfd   : > { %6337 = vst [vmem:[#allocation5_spill] sm:$0xff] %v4638_v9  ;;  %1090 = vmatmul.f32.gmra.mxu0 %v319_v5  ;;  %3605 = vmatmul.msk.f32.gmra.mxu2 %vm581_vm1, %v320_v6  ;;  %v3614_v5 = vld [vmem:[%s6328_s1 + $0x258] sm:$0xff] }
  0xfe   : > { %1548 = vmatpush.msra.mxu0 %v3614_v5  ;;  %v4689_v5 = vld [vmem:[%s4047_s20 + $0x18] sm:$0xff] }
  0xff   : > { %969 = vmatmul.f32.gmra.mxu1 %v4392_v1  ;;  %3592 = vmatmul.msk.f32.gmra.mxu3 %vm581_vm1, %v4337_v26  ;;  %6343 = vst [vmem:[#allocation11_spill] sm:$0xff] %v4689_v5 }
 0x100   : > { %v791_v61 = vpop.f32.mrf.mxu2 }
 0x101   : > { %v4659_v40 = vadd.f32 %v856_v15, %v791_v61 }
 0x102   : > { %v865_v21 = vpop.f32.mrf.mxu3  ;;  %v4661_v56 = vpop.f32.mrf.mxu0 }
 0x103   : > { %6340 = vst [vmem:[#allocation8_spill] sm:$0xff] %v4659_v40 }
 0x104   : > { %v4651_v33 = vpop.f32.mrf.mxu1 }
 0x105   : > { %6339 = vst [vmem:[#allocation7_spill] sm:$0xff] %v4651_v33  ;;  %1093 = vmatmul.f32.gmra.mxu0 %v4366_v44  ;;  %3606 = vmatmul.msk.f32.gmra.mxu2 %vm581_vm1, %v4302_v2  ;;  %v3612_v2 = vld [vmem:[%s6328_s1 + $0x248] sm:$0xff]  ;;  %v1242_v44 = vrot.slane %v1175_v14, 2  ;;  %v3714_v14 = vld [vmem:[%s6328_s1 + $0x478] sm:$0xff] }
 0x106   : > { %1549 = vmatpush.msra.mxu0 %v3612_v2  ;;  %2135 = vmatpush.msrb.mxu2 %v3714_v14  ;;  %v3713_v2 = vld [vmem:[%s6328_s1 + $0x470] sm:$0xff] }
 0x107   : > { %972 = vmatmul.f32.gmra.mxu1 %v4654_v37  ;;  %3593 = vmatmul.msk.f32.gmra.mxu3 %vm581_vm1, %v4657_v54 }
 0x108   : > { %v794_v50 = vpop.f32.mrf.mxu2  ;;  %2005 = vmatpush.msrb.mxu3 %v3713_v2 }
 0x109   : > { %v4676_v3 = vadd.f32 %v859_v28, %v794_v50  ;;  %v1243_v28 = vrot.slane %v4689_v5, 2  ;;  %v1239_v50 = vrot.slane %v1174_v42, 2 }
 0x10a   : > { %v4672_v6 = vpop.f32.mrf.mxu3  ;;  %v4680_v61 = vpop.f32.mrf.mxu0 }
 0x10b   : > { %6342 = vst [vmem:[#allocation10_spill] sm:$0xff] %v4676_v3  ;;  %v4700_v9 = vsel %vm1238_vm2, %v1242_v44, %v1243_v28 }
 0x10c   : > { %v4674_v15 = vpop.f32.mrf.mxu1 }
 0x10d   : > { %6341 = vst [vmem:[#allocation9_spill] sm:$0xff] %v4674_v15  ;;  %v1240_v15 = vrot.slane %v4161_v47, 2  ;;  %1096 = vmatmul.f32.gmra.mxu0 %v323_v41  ;;  %3607 = vmatmul.msk.f32.gmra.mxu2 %vm581_vm1, %v324_v45  ;;  %v1177_v41 = vld [vmem:[%s4047_s20 + $0x28] sm:$0x3]  ;;  %v1176_v45 = vld [vmem:[%s4047_s20 + $0x20] sm:$0x3] }
 0x10e   : > { %v1245_v44 = vrot.slane %v1176_v45, 2  ;;  %v700_v45 = vadd.f32 %v4427_v31, %v4475_v63 }
 0x10f   : > { %975 = vmatmul.f32.gmra.mxu1 %v4420_v23  ;;  %3594 = vmatmul.msk.f32.gmra.mxu3 %vm581_vm1, %v4375_v52  ;;  %v4703_v42 = vsel %vm1238_vm2, %v1239_v50, %v1240_v15 }
 0x110   : > { %v797_v40 = vpop.f32.mrf.mxu2 }
 0x111   : > { %v4705_v47 = vadd.f32 %v862_v60, %v797_v40  ;;  %v3710_v60 = vld [vmem:[%s6328_s1 + $0x458] sm:$0xff]  ;;  %v1247_v40 = vrot.slane %v1177_v41, 2 }
 0x112   : > { %v4694_v3 = vpop.f32.mrf.mxu3  ;;  %v4712_v5 = vpop.f32.mrf.mxu0  ;;  %2056 = vmatpush.msrb.mxu0 %v3710_v60 }
 0x113   : > { %6344 = vst [vmem:[#allocation12_spill] sm:$0xff] %v4705_v47  ;;  %v4728_v47 = vsel %vm1238_vm2, %v1243_v28, %v1247_v40  ;;  %v4751_v28 = vld [vmem:[%s4047_s20 + $0x48] sm:$0xff] }
 0x114   : > { %v931_v33 = vpop.f32.mrf.mxu1  ;;  %6345 = vst [vmem:[#allocation13_spill] sm:$0xff] %v4712_v5  ;;  %v4731_v5 = vsel %vm1238_vm2, %v1240_v15, %v1245_v44  ;;  %v1253_v60 = vrot.slane %v4751_v28, 2  ;;  %v1250_v44 = vrot.slane %v4220_v13, 2 }
 0x115   : > { %v932_v50 = vadd.f32 %v931_v33, %v697_v22  ;;  %1099 = vmatmul.f32.gmra.mxu0 %v4392_v1  ;;  %3608 = vmatmul.msk.f32.gmra.mxu2 %vm581_vm1, %v4337_v26  ;;  %v1179_v22 = vld [vmem:[%s4047_s20 + $0x38] sm:$0xfc]  ;;  %v1178_v33 = vld [vmem:[%s4047_s20 + $0x30] sm:$0xfc] }
 0x116   : > { %v3709_v26 = vld [vmem:[%s6328_s1 + $0x450] sm:$0xff]  ;;  %v1252_v15 = vrot.slane %v1179_v22, 2  ;;  %v1249_v40 = vrot.slane %v1178_v33, 2 }
 0x117   : > { %3647 = vmatmul.msk.f32.vlgmr.msra.gmra.mxu3 %vm581_vm1, %v4700_v9  ;;  %1420 = vmatmul.f32.vlgmr.msra.gmra.mxu1 %v4703_v42  ;;  %v1180_v33 = vld [vmem:[%s4047_s20 + $0x50] sm:$0x3] }
 0x118   : > { %v800_v2 = vpop.f32.mrf.mxu2  ;;  %1926 = vmatpush.msrb.mxu1 %v3709_v26  ;;  %v4761_v22 = vsel %vm1238_vm2, %v1252_v15, %v1253_v60  ;;  %v4764_v26 = vsel %vm1238_vm2, %v1249_v40, %v1250_v44  ;;  %v1255_v15 = vrot.slane %v1180_v33, 2 }
 0x119   : > { %v4733_v41 = vadd.f32 %v865_v21, %v800_v2  ;;  %v3708_v21 = vld [vmem:[%s6328_s1 + $0x448] sm:$0xff] }
 0x11a   : > { %v996_v17 = vpop.f32.mrf.mxu3  ;;  %v4740_v1 = vpop.f32.mrf.mxu0  ;;  %2057 = vmatpush.msrb.mxu0 %v3708_v21 }
 0x11b   : > { %v4725_v51 = vadd.f32 %v996_v17, %v932_v50 }
 0x11c   : > { %v934_v14 = vpop.f32.mrf.mxu1 }
 0x11d   : > { %v935_v31 = vadd.f32 %v934_v14, %v700_v45  ;;  %1102 = vmatmul.f32.gmra.mxu0 %v4654_v37  ;;  %3609 = vmatmul.msk.f32.gmra.mxu2 %vm581_vm1, %v4657_v54  ;;  %v1181_v14 = vld [vmem:[%s4047_s20 + $0x58] sm:$0x3]  ;;  %v3707_v37 = vld [vmem:[%s6328_s1 + $0x440] sm:$0xff]  ;;  %v703_v45 = vadd.f32 %v4440_v39, %v4491_v8 }
 0x11e   : > { %1927 = vmatpush.msrb.mxu1 %v3707_v37  ;;  %v1257_v21 = vrot.slane %v1181_v14, 2  ;;  %v4793_v37 = vsel %vm1238_vm2, %v1250_v44, %v1255_v15  ;;  %v4812_v44 = vld [vmem:[%s4047_s20 + $0x78] sm:$0xff]  ;;  %v1260_v15 = vrot.slane %v4252_v34, 2 }
 0x11f   : > { %3648 = vmatmul.msk.f32.gmra.mxu3 %vm581_vm1, %v4728_v47  ;;  %1423 = vmatmul.f32.gmra.mxu1 %v4731_v5 }
 0x120   : > { %v803_v2 = vpop.f32.mrf.mxu2 }
 0x121   : > { %v4767_v13 = vadd.f32 %v4672_v6, %v803_v2  ;;  %v3706_v6 = vld [vmem:[%s6328_s1 + $0x438] sm:$0xff]  ;;  %v4790_v2 = vsel %vm1238_vm2, %v1253_v60, %v1257_v21 }
 0x122   : > { %v999_v63 = vpop.f32.mrf.mxu3  ;;  %v4774_v54 = vpop.f32.mrf.mxu0  ;;  %2058 = vmatpush.msrb.mxu0 %v3706_v6  ;;  %v1263_v6 = vrot.slane %v4812_v44, 2 }
 0x123   : > { %v4758_v50 = vadd.f32 %v999_v63, %v935_v31 }
 0x124   : > { %v937_v17 = vpop.f32.mrf.mxu1 }
 0x125   : > { %v938_v40 = vadd.f32 %v937_v17, %v703_v45  ;;  %1105 = vmatmul.f32.gmra.mxu0 %v4420_v23  ;;  %3610 = vmatmul.msk.f32.gmra.mxu2 %vm581_vm1, %v4375_v52  ;;  %v1183_v17 = vld [vmem:[%s4047_s20 + $0x68] sm:$0xfc]  ;;  %v1182_v23 = vld [vmem:[%s4047_s20 + $0x60] sm:$0xfc]  ;;  %v3705_v52 = vld [vmem:[%s6328_s1 + $0x430] sm:$0xff]  ;;  %v706_v45 = vadd.f32 %v4452_v49, %v4509_v20 }
 0x126   : > { %1928 = vmatpush.msrb.mxu1 %v3705_v52  ;;  %v1262_v60 = vrot.slane %v1183_v17, 2  ;;  %v1259_v21 = vrot.slane %v1182_v23, 2 }
 0x127   : > { %3649 = vmatmul.msk.f32.gmra.mxu3 %vm581_vm1, %v4761_v22  ;;  %1426 = vmatmul.f32.gmra.mxu1 %v4764_v26 }
 0x128   : > { %v806_v63 = vpop.f32.mrf.mxu2  ;;  %v4823_v52 = vsel %vm1238_vm2, %v1262_v60, %v1263_v6  ;;  %v4826_v23 = vsel %vm1238_vm2, %v1259_v21, %v1260_v15 }
 0x129   : > { %v4796_v14 = vadd.f32 %v4694_v3, %v806_v63  ;;  %v3704_v3 = vld [vmem:[%s6328_s1 + $0x428] sm:$0xff] }
 0x12a   : > { %v1002_v39 = vpop.f32.mrf.mxu3  ;;  %v1061_v33 = vpop.f32.mrf.mxu0  ;;  %2059 = vmatpush.msrb.mxu0 %v3704_v3 }
 0x12b   : > { %v4787_v8 = vadd.f32 %v1002_v39, %v938_v40  ;;  %v1062_v40 = vadd.f32 %v1061_v33, %v4473_v62  ;;  %v709_v62 = vadd.f32 %v4466_v55, %v4525_v32  ;;  %v3702_v33 = vld [vmem:[%s6328_s1 + $0x418] sm:$0xff] }
 0x12c   : > { %v940_v31 = vpop.f32.mrf.mxu1  ;;  %2060 = vmatpush.msrb.mxu0 %v3702_v33 }
 0x12d   : > { %v941_v49 = vadd.f32 %v940_v31, %v706_v45  ;;  %3663 = vmatmul.msk.f32.vlgmr.msra.gmra.mxu2 %vm581_vm1, %v4700_v9  ;;  %1550 = vmatmul.f32.vlgmr.msra.gmra.mxu0 %v4703_v42  ;;  %v1185_v31 = vld [vmem:[%s4047_s20 + $0x88] sm:$0x3]  ;;  %v1184_v45 = vld [vmem:[%s4047_s20 + $0x80] sm:$0x3] }
 0x12e   : > { %v3703_v9 = vld [vmem:[%s6328_s1 + $0x420] sm:$0xff]  ;;  %v1267_v3 = vrot.slane %v1185_v31, 2  ;;  %v1265_v60 = vrot.slane %v1184_v45, 2  ;;  %v1187_v45 = vld [vmem:[%s4047_s20 + $0x98] sm:$0xfc] }
 0x12f   : > { %3650 = vmatmul.msk.f32.gmra.mxu3 %vm581_vm1, %v4790_v2  ;;  %1429 = vmatmul.f32.gmra.mxu1 %v4793_v37 }
 0x130   : > { %v1126_v17 = vpop.f32.mrf.mxu2  ;;  %1929 = vmatpush.msrb.mxu1 %v3703_v9  ;;  %v4853_v31 = vsel %vm1238_vm2, %v1260_v15, %v1265_v60  ;;  %v712_v9 = vadd.f32 %v4484_v4, %v4549_v46  ;;  %v1272_v15 = vrot.slane %v1187_v45, 2 }
 0x131   : > { %v4828_v34 = vadd.f32 %v1126_v17, %v1062_v40  ;;  %v4850_v17 = vsel %vm1238_vm2, %v1263_v6, %v1267_v3  ;;  %v3700_v6 = vld [vmem:[%s6328_s1 + $0x408] sm:$0xff]  ;;  %v1270_v3 = vrot.slane %v4290_v57, 2 }
 0x132   : > { %v1005_v20 = vpop.f32.mrf.mxu3  ;;  %v1064_v42 = vpop.f32.mrf.mxu0  ;;  %2061 = vmatpush.msrb.mxu0 %v3700_v6 }
 0x133   : > { %v4820_v39 = vadd.f32 %v1005_v20, %v941_v49  ;;  %v1065_v32 = vadd.f32 %v1064_v42, %v4489_v7  ;;  %v4871_v42 = vld [vmem:[%s4047_s20 + $0xa8] sm:$0xff] }
 0x134   : > { %v943_v63 = vpop.f32.mrf.mxu1 }
 0x135   : > { %v944_v21 = vadd.f32 %v943_v63, %v709_v62  ;;  %3664 = vmatmul.msk.f32.gmra.mxu2 %vm581_vm1, %v4728_v47  ;;  %1553 = vmatmul.f32.gmra.mxu0 %v4731_v5  ;;  %v1186_v47 = vld [vmem:[%s4047_s20 + $0x90] sm:$0xfc]  ;;  %v1273_v62 = vrot.slane %v4871_v42, 2 }
 0x136   : > { %v3701_v5 = vld [vmem:[%s6328_s1 + $0x410] sm:$0xff]  ;;  %v1269_v33 = vrot.slane %v1186_v47, 2 }
 0x137   : > { %3651 = vmatmul.msk.f32.gmra.mxu3 %vm581_vm1, %v4823_v52  ;;  %1432 = vmatmul.f32.gmra.mxu1 %v4826_v23  ;;  %v1188_v47 = vld [vmem:[%s4047_s20 + $0xb0] sm:$0x3] }
 0x138   : > { %v1129_v40 = vpop.f32.mrf.mxu2  ;;  %1930 = vmatpush.msrb.mxu1 %v3701_v5  ;;  %v4885_v45 = vsel %vm1238_vm2, %v1269_v33, %v1270_v3  ;;  %v3698_v5 = vld [vmem:[%s6328_s1 + $0x3f8] sm:$0xff] }
 0x139   : > { %v4855_v63 = vadd.f32 %v1129_v40, %v1065_v32  ;;  %v4882_v40 = vsel %vm1238_vm2, %v1272_v15, %v1273_v62  ;;  %2062 = vmatpush.msrb.mxu0 %v3698_v5 }
 0x13a   : > { %v1008_v55 = vpop.f32.mrf.mxu3  ;;  %v1067_v7 = vpop.f32.mrf.mxu0 }
 0x13b   : > { %v4847_v49 = vadd.f32 %v1008_v55, %v944_v21  ;;  %v1068_v60 = vadd.f32 %v1067_v7, %v4507_v19  ;;  %v715_v19 = vadd.f32 %v4500_v11, %v4565_v59 }
 0x13c   : > { %v946_v20 = vpop.f32.mrf.mxu1 }
 0x13d   : > { %v947_v4 = vadd.f32 %v946_v20, %v712_v9  ;;  %3665 = vmatmul.msk.f32.gmra.mxu2 %vm581_vm1, %v4761_v22  ;;  %1556 = vmatmul.f32.gmra.mxu0 %v4764_v26  ;;  %v1189_v20 = vld [vmem:[%s4047_s20 + $0xb8] sm:$0x3]  ;;  %v3699_v22 = vld [vmem:[%s6328_s1 + $0x400] sm:$0xff]  ;;  %v1275_v9 = vrot.slane %v1188_v47, 2 }
 0x13e   : > { %1931 = vmatpush.msrb.mxu1 %v3699_v22  ;;  %v1277_v7 = vrot.slane %v1189_v20, 2  ;;  %v718_v20 = vadd.f32 %v4518_v25, %v4583_v12  ;;  %v4930_v47 = vld [vmem:[%s4047_s20 + $0xd8] sm:$0xff] }
 0x13f   : > { %3652 = vmatmul.msk.f32.gmra.mxu3 %vm581_vm1, %v4850_v17  ;;  %1435 = vmatmul.f32.gmra.mxu1 %v4853_v31  ;;  %v1283_v22 = vrot.slane %v4930_v47, 2 }
 0x140   : > { %v1132_v32 = vpop.f32.mrf.mxu2 }
 0x141   : > { %v4887_v57 = vadd.f32 %v1132_v32, %v1068_v60  ;;  %v4912_v60 = vsel %vm1238_vm2, %v1270_v3, %v1275_v9  ;;  %v1191_v32 = vld [vmem:[%s4047_s20 + $0xc8] sm:$0xfc] }
 0x142   : > { %v1011_v46 = vpop.f32.mrf.mxu3  ;;  %v1070_v26 = vpop.f32.mrf.mxu0  ;;  %v1282_v3 = vrot.slane %v1191_v32, 2  ;;  %v3712_v9 = vld [vmem:[%s6328_s1 + $0x468] sm:$0xff] }
 0x143   : > { %v4879_v21 = vadd.f32 %v1011_v46, %v947_v4  ;;  %v1071_v59 = vadd.f32 %v1070_v26, %v4523_v30  ;;  %v4909_v46 = vsel %vm1238_vm2, %v1273_v62, %v1277_v7  ;;  %v3696_v62 = vld [vmem:[%s6328_s1 + $0x3e8] sm:$0xff]  ;;  %2136 = vmatpush.msrb.mxu2 %v3712_v9 }
 0x144   : > { %v949_v55 = vpop.f32.mrf.mxu1  ;;  %2063 = vmatpush.msrb.mxu0 %v3696_v62 }
 0x145   : > { %v950_v6 = vadd.f32 %v949_v55, %v715_v19  ;;  %3666 = vmatmul.msk.f32.gmra.mxu2 %vm581_vm1, %v4790_v2  ;;  %1559 = vmatmul.f32.gmra.mxu0 %v4793_v37  ;;  %v1190_v2 = vld [vmem:[%s4047_s20 + $0xc0] sm:$0xfc]  ;;  %v3697_v37 = vld [vmem:[%s6328_s1 + $0x3f0] sm:$0xff]  ;;  %v1280_v19 = vrot.slane %v4322_v16, 2  ;;  %v4944_v16 = vsel %vm1238_vm2, %v1282_v3, %v1283_v22 }
 0x146   : > { %1932 = vmatpush.msrb.mxu1 %v3697_v37  ;;  %v1279_v26 = vrot.slane %v1190_v2, 2  ;;  %v721_v2 = vadd.f32 %v4537_v36, %v4599_v29  ;;  %v3694_v37 = vld [vmem:[%s6328_s1 + $0x3d8] sm:$0xff] }
 0x147   : > { %3653 = vmatmul.msk.f32.gmra.mxu3 %vm581_vm1, %v4882_v40  ;;  %1438 = vmatmul.f32.gmra.mxu1 %v4885_v45 }
 0x148   : > { %v1135_v4 = vpop.f32.mrf.mxu2  ;;  %2064 = vmatpush.msrb.mxu0 %v3694_v37 }
 0x149   : > { %v4914_v55 = vadd.f32 %v1135_v4, %v1071_v59  ;;  %v4947_v59 = vsel %vm1238_vm2, %v1279_v26, %v1280_v19  ;;  %v3711_v4 = vld [vmem:[%s6328_s1 + $0x460] sm:$0xff] }
 0x14a   : > { %v1014_v11 = vpop.f32.mrf.mxu3  ;;  %v1073_v30 = vpop.f32.mrf.mxu0  ;;  %2006 = vmatpush.msrb.mxu3 %v3711_v4  ;;  %v4999_v4 = vld [vmem:[%s4047_s20 + $0x100] sm:$0xff] }
 0x14b   : > { %v4906_v15 = vadd.f32 %v1014_v11, %v950_v6  ;;  %v1074_v5 = vadd.f32 %v1073_v30, %v4544_v43  ;;  %v3695_v43 = vld [vmem:[%s6328_s1 + $0x3e0] sm:$0xff] }
 0x14c   : > { %v952_v33 = vpop.f32.mrf.mxu1  ;;  %1933 = vmatpush.msrb.mxu1 %v3695_v43 }
 0x14d   : > { %v953_v25 = vadd.f32 %v952_v33, %v718_v20  ;;  %3667 = vmatmul.msk.f32.gmra.mxu2 %vm581_vm1, %v4823_v52  ;;  %1562 = vmatmul.f32.gmra.mxu0 %v4826_v23  ;;  %v1193_v52 = vld [vmem:[%s4047_s20 + $0xe8] sm:$0x3]  ;;  %v1192_v33 = vld [vmem:[%s4047_s20 + $0xe0] sm:$0x3] }
 0x14e   : > { %v1287_v30 = vrot.slane %v1193_v52, 2  ;;  %v1285_v20 = vrot.slane %v1192_v33, 2  ;;  %v4995_v52 = vld [vmem:[%s4047_s20 + $0x108] sm:$0xff] }
 0x14f   : > { %3654 = vmatmul.msk.f32.gmra.mxu3 %vm581_vm1, %v4909_v46  ;;  %1441 = vmatmul.f32.gmra.mxu1 %v4912_v60  ;;  %v1293_v33 = vrot.slane %v4995_v52, 2 }
 0x150   : > { %v1138_v11 = vpop.f32.mrf.mxu2 }
 0x151   : > { %v4950_v23 = vadd.f32 %v1138_v11, %v1074_v5  ;;  %v4977_v5 = vsel %vm1238_vm2, %v1280_v19, %v1285_v20  ;;  %v724_v11 = vadd.f32 %v4558_v53, %v4620_v38  ;;  %v1290_v53 = vrot.slane %v4999_v4, 2 }
 0x152   : > { %v1017_v12 = vpop.f32.mrf.mxu3  ;;  %v1076_v32 = vpop.f32.mrf.mxu0 }
 0x153   : > { %v4938_v7 = vadd.f32 %v1017_v12, %v953_v25  ;;  %v1077_v29 = vadd.f32 %v1076_v32, %v4563_v58  ;;  %v4974_v12 = vsel %vm1238_vm2, %v1283_v22, %v1287_v30  ;;  %v3693_v58 = vld [vmem:[%s6328_s1 + $0x3d0] sm:$0xff]  ;;  %v3692_v22 = vld [vmem:[%s6328_s1 + $0x3c8] sm:$0xff] }
 0x154   : > { %v955_v6 = vpop.f32.mrf.mxu1  ;;  %1934 = vmatpush.msrb.mxu1 %v3693_v58  ;;  %2065 = vmatpush.msrb.mxu0 %v3692_v22 }
 0x155   : > { %v956_v62 = vadd.f32 %v955_v6, %v721_v2  ;;  %3668 = vmatmul.msk.f32.gmra.mxu2 %vm581_vm1, %v4850_v17  ;;  %1565 = vmatmul.f32.gmra.mxu0 %v4853_v31  ;;  %v1195_v17 = vld [vmem:[%s4047_s20 + $0xf8] sm:$0xfc]  ;;  %v1194_v6 = vld [vmem:[%s4047_s20 + $0xf0] sm:$0xfc] }
 0x156   : > { %v1292_v19 = vrot.slane %v1195_v17, 2  ;;  %v1289_v43 = vrot.slane %v1194_v6, 2  ;;  %v3690_v17 = vld [vmem:[%s6328_s1 + $0x3b8] sm:$0xff] }
 0x157   : > { %3655 = vmatmul.msk.f32.gmra.mxu3 %vm581_vm1, %v4944_v16  ;;  %1444 = vmatmul.f32.gmra.mxu1 %v4947_v59 }
 0x158   : > { %v1141_v25 = vpop.f32.mrf.mxu2  ;;  %2066 = vmatpush.msrb.mxu0 %v3690_v17 }
 0x159   : > { %v4979_v9 = vadd.f32 %v1141_v25, %v1077_v29  ;;  %v1196_v25 = vld [vmem:[%s4047_s20 + $0x110] sm:$0x3] }
 0x15a   : > { %v1020_v36 = vpop.f32.mrf.mxu3  ;;  %v1079_v31 = vpop.f32.mrf.mxu0  ;;  %v1295_v58 = vrot.slane %v1196_v25, 2 }
 0x15b   : > { %v4971_v3 = vadd.f32 %v1020_v36, %v956_v62  ;;  %v1080_v2 = vadd.f32 %v1079_v31, %v4581_v10  ;;  %v5009_v62 = vsel %vm1238_vm2, %v1292_v19, %v1293_v33  ;;  %v5012_v36 = vsel %vm1238_vm2, %v1289_v43, %v1290_v53 }
 0x15c   : > { %v958_v26 = vpop.f32.mrf.mxu1  ;;  %v727_v10 = vadd.f32 %v4574_v0, %v4642_v24 }
 0x15d   : > { %v959_v38 = vadd.f32 %v958_v26, %v724_v11  ;;  %3669 = vmatmul.msk.f32.gmra.mxu2 %vm581_vm1, %v4882_v40  ;;  %1568 = vmatmul.f32.gmra.mxu0 %v4885_v45  ;;  %v1197_v26 = vld [vmem:[%s4047_s20 + $0x118] sm:$0x3]  ;;  %v3691_v40 = vld [vmem:[%s6328_s1 + $0x3c0] sm:$0xff] }
 0x15e   : > { %1935 = vmatpush.msrb.mxu1 %v3691_v40  ;;  %v1297_v6 = vrot.slane %v1197_v26, 2  ;;  %v5061_v40 = vld [vmem:[%s4047_s20 + $0x130] sm:$0xff] }
 0x15f   : > { %3656 = vmatmul.msk.f32.gmra.mxu3 %vm581_vm1, %v4974_v12  ;;  %1447 = vmatmul.f32.gmra.mxu1 %v4977_v5 }
 0x160   : > { %v1144_v20 = vpop.f32.mrf.mxu2  ;;  %v5036_v43 = vsel %vm1238_vm2, %v1293_v33, %v1297_v6  ;;  %v3688_v33 = vld [vmem:[%s6328_s1 + $0x3a8] sm:$0xff]  ;;  %v3687_v6 = vld [vmem:[%s6328_s1 + $0x3a0] sm:$0xff] }
 0x161   : > { %v5014_v29 = vadd.f32 %v1144_v20, %v1080_v2  ;;  %v1198_v2 = vld [vmem:[%s4047_s20 + $0x120] sm:$0xfc]  ;;  %v5057_v20 = vld [vmem:[%s4047_s20 + $0x138] sm:$0xff]  ;;  %2067 = vmatpush.msrb.mxu0 %v3688_v33 }
 0x162   : > { %v1023_v32 = vpop.f32.mrf.mxu3  ;;  %v1082_v45 = vpop.f32.mrf.mxu0  ;;  %v1303_v26 = vrot.slane %v5057_v20, 2  ;;  %v1299_v25 = vrot.slane %v1198_v2, 2  ;;  %v3683_v2 = vld [vmem:[%s6328_s1 + $0x380] sm:$0xff] }
 0x163   : > { %v5006_v37 = vadd.f32 %v1023_v32, %v959_v38  ;;  %v1083_v24 = vadd.f32 %v1082_v45, %v4597_v27  ;;  %v5039_v38 = vsel %vm1238_vm2, %v1290_v53, %v1295_v58  ;;  %v3689_v27 = vld [vmem:[%s6328_s1 + $0x3b0] sm:$0xff] }
 0x164   : > { %v961_v30 = vpop.f32.mrf.mxu1  ;;  %1936 = vmatpush.msrb.mxu1 %v3689_v27  ;;  %v3686_v27 = vld [vmem:[%s6328_s1 + $0x398] sm:$0xff] }
 0x165   : > { %v962_v31 = vadd.f32 %v961_v30, %v727_v10  ;;  %3670 = vmatmul.msk.f32.gmra.mxu2 %vm581_vm1, %v4909_v46  ;;  %1571 = vmatmul.f32.gmra.mxu0 %v4912_v60  ;;  %v1199_v46 = vld [vmem:[%s4047_s20 + $0x128] sm:$0xfc]  ;;  %v730_v30 = vadd.f32 %v4592_v18, %v4661_v56  ;;  %v1300_v18 = vrot.slane %v5061_v40, 2 }
 0x166   : > { %v1302_v53 = vrot.slane %v1199_v46, 2  ;;  %1937 = vmatpush.msrb.mxu1 %v3687_v6  ;;  %v733_v46 = vadd.f32 %v4611_v35, %v4680_v61  ;;  %2068 = vmatpush.msrb.mxu0 %v3686_v27  ;;  %v3681_v35 = vld [vmem:[%s6328_s1 + $0x370] sm:$0xff] }
 0x167   : > { %3657 = vmatmul.msk.f32.gmra.mxu3 %vm581_vm1, %v5009_v62  ;;  %1450 = vmatmul.f32.gmra.mxu1 %v5012_v36 }
 0x168   : > { %v1147_v19 = vpop.f32.mrf.mxu2 }
 0x169   : > { %v5041_v32 = vadd.f32 %v1147_v19, %v1083_v24  ;;  %v5077_v24 = vsel %vm1238_vm2, %v1299_v25, %v1300_v18 }
 0x16a   : > { %v1026_v0 = vpop.f32.mrf.mxu3  ;;  %v1085_v60 = vpop.f32.mrf.mxu0 }
 0x16b   : > { %v5033_v11 = vadd.f32 %v1026_v0, %v962_v31  ;;  %v1086_v10 = vadd.f32 %v1085_v60, %v4615_v48  ;;  %v5074_v0 = vsel %vm1238_vm2, %v1302_v53, %v1303_v26  ;;  %v3685_v48 = vld [vmem:[%s6328_s1 + $0x390] sm:$0xff]  ;;  %v6346_v53 = vld [vmem:[#allocation6_spill] sm:$0xff] }
 0x16c   : > { %v964_v22 = vpop.f32.mrf.mxu1  ;;  %1938 = vmatpush.msrb.mxu1 %v3685_v48  ;;  %v6347_v48 = vld [vmem:[#allocation13_spill] sm:$0xff] }
 0x16d   : > { %v965_v56 = vadd.f32 %v964_v22, %v730_v30  ;;  %3671 = vmatmul.msk.f32.gmra.mxu2 %vm581_vm1, %v4944_v16  ;;  %1574 = vmatmul.f32.gmra.mxu0 %v4947_v59  ;;  %v1201_v59 = vld [vmem:[%s4047_s20 + $0x148] sm:$0x3]  ;;  %v1200_v22 = vld [vmem:[%s4047_s20 + $0x140] sm:$0x3] }
 0x16e   : > { %v1307_v60 = vrot.slane %v1201_v59, 2  ;;  %v1305_v30 = vrot.slane %v1200_v22, 2  ;;  %1939 = vmatpush.msrb.mxu1 %v3683_v2  ;;  %v1202_v59 = vld [vmem:[%s4047_s20 + $0x150] sm:$0xfc]  ;;  %v5128_v2 = vld [vmem:[%s4047_s20 + $0x168] sm:$0xff] }
 0x16f   : > { %3658 = vmatmul.msk.f32.gmra.mxu3 %vm581_vm1, %v5036_v43  ;;  %1453 = vmatmul.f32.gmra.mxu1 %v5039_v38  ;;  %v1313_v27 = vrot.slane %v5128_v2, 2 }
 0x170   : > { %v1150_v31 = vpop.f32.mrf.mxu2  ;;  %1940 = vmatpush.msrb.mxu1 %v3681_v35 }
 0x171   : > { %v5079_v16 = vadd.f32 %v1150_v31, %v1086_v10  ;;  %v1203_v31 = vld [vmem:[%s4047_s20 + $0x158] sm:$0xfc] }
 0x172   : > { %v1029_v45 = vpop.f32.mrf.mxu3  ;;  %v1088_v19 = vpop.f32.mrf.mxu0 }
 0x173   : > { %v5068_v17 = vadd.f32 %v1029_v45, %v965_v56  ;;  %v1089_v25 = vadd.f32 %v1088_v19, %v6346_v53  ;;  %v3679_v45 = vld [vmem:[%s6328_s1 + $0x360] sm:$0xff]  ;;  %v6349_v53 = vld [vmem:[#allocation8_spill] sm:$0xff] }
 0x174   : > { %v967_v58 = vpop.f32.mrf.mxu1  ;;  %1941 = vmatpush.msrb.mxu1 %v3679_v45  ;;  %v6348_v19 = vld [vmem:[#allocation5_spill] sm:$0xff] }
 0x175   : > { %v968_v33 = vadd.f32 %v967_v58, %v733_v46  ;;  %3672 = vmatmul.msk.f32.gmra.mxu2 %vm581_vm1, %v4974_v12  ;;  %1577 = vmatmul.f32.gmra.mxu0 %v4977_v5  ;;  %v5110_v12 = vsel %vm1238_vm2, %v1303_v26, %v1307_v60  ;;  %v5113_v5 = vsel %vm1238_vm2, %v1300_v18, %v1305_v30  ;;  %v3684_v26 = vld [vmem:[%s6328_s1 + $0x388] sm:$0xff]  ;;  %v1312_v18 = vrot.slane %v1203_v31, 2  ;;  %v5132_v30 = vld [vmem:[%s4047_s20 + $0x160] sm:$0xff] }
 0x176   : > { %v736_v46 = vadd.f32 %v6348_v19, %v6347_v48  ;;  %v1309_v60 = vrot.slane %v1202_v59, 2  ;;  %2069 = vmatpush.msrb.mxu0 %v3684_v26 }
 0x177   : > { %3659 = vmatmul.msk.f32.gmra.mxu3 %vm581_vm1, %v5074_v0  ;;  %1456 = vmatmul.f32.gmra.mxu1 %v5077_v24  ;;  %v5142_v59 = vsel %vm1238_vm2, %v1312_v18, %v1313_v27 }
 0x178   : > { %v1153_v6 = vpop.f32.mrf.mxu2 }
 0x179   : > { %v5115_v58 = vadd.f32 %v1153_v6, %v1089_v25 }
 0x17a   : > { %v1032_v61 = vpop.f32.mrf.mxu3  ;;  %v1091_v22 = vpop.f32.mrf.mxu0 }
 0x17b   : > { %v5104_v56 = vadd.f32 %v1032_v61, %v968_v33  ;;  %v1310_v33 = vrot.slane %v5132_v30, 2  ;;  %v1092_v25 = vadd.f32 %v1091_v22, %v6349_v53  ;;  %v3682_v22 = vld [vmem:[%s6328_s1 + $0x378] sm:$0xff] }
 0x17c   : > { %v970_v10 = vpop.f32.mrf.mxu1  ;;  %2070 = vmatpush.msrb.mxu0 %v3682_v22 }
 0x17d   : > { %v971_v35 = vadd.f32 %v970_v10, %v736_v46  ;;  %3673 = vmatmul.msk.f32.gmra.mxu2 %vm581_vm1, %v5009_v62  ;;  %1580 = vmatmul.f32.gmra.mxu0 %v5012_v36  ;;  %v5145_v48 = vsel %vm1238_vm2, %v1309_v60, %v1310_v33  ;;  %v1205_v10 = vld [vmem:[%s4047_s20 + $0x178] sm:$0x3]  ;;  %v1204_v46 = vld [vmem:[%s4047_s20 + $0x170] sm:$0x3] }
 0x17e   : > { %v6351_v36 = vld [vmem:[#allocation7_spill] sm:$0xff]  ;;  %v1317_v18 = vrot.slane %v1205_v10, 2  ;;  %v1315_v60 = vrot.slane %v1204_v46, 2  ;;  %v1697_v46 = vld [vmem:[%s4047_s20 + $0x8] sm:$0xf8] }
 0x17f   : > { %3660 = vmatmul.msk.f32.gmra.mxu3 %vm581_vm1, %v5110_v12  ;;  %1459 = vmatmul.f32.gmra.mxu1 %v5113_v5  ;;  %v739_v26 = vadd.f32 %v6351_v36, %v4740_v1 }
 0x180   : > { %v1156_v31 = vpop.f32.mrf.mxu2  ;;  %v5169_v10 = vsel %vm1238_vm2, %v1310_v33, %v1315_v60  ;;  %v6354_v33 = vld [vmem:[#allocation11_spill] sm:$0xff] }
 0x181   : > { %v5147_v19 = vadd.f32 %v1156_v31, %v1092_v25 }
 0x182   : > { %v1035_v61 = vpop.f32.mrf.mxu3  ;;  %v1094_v62 = vpop.f32.mrf.mxu0 }
 0x183   : > { %v5139_v45 = vadd.f32 %v1035_v61, %v971_v35  ;;  %6350 = vst [vmem:[#allocation6_spill] sm:$0xff] %v5147_v19  ;;  %v6352_v61 = vld [vmem:[#allocation10_spill] sm:$0xff]  ;;  %v5166_v19 = vsel %vm1238_vm2, %v1313_v27, %v1317_v18  ;;  %v1765_v18 = vrot.slane %v6354_v33, 3 }
 0x184   : > { %v973_v6 = vpop.f32.mrf.mxu1  ;;  %v1095_v53 = vadd.f32 %v1094_v62, %v6352_v61  ;;  %v3680_v27 = vld [vmem:[%s6328_s1 + $0x368] sm:$0xff]  ;;  %v1764_v62 = vrot.slane %v1697_v46, 3 }
 0x185   : > { %v974_v35 = vadd.f32 %v973_v6, %v739_v26  ;;  %3674 = vmatmul.msk.f32.gmra.mxu2 %vm581_vm1, %v5036_v43  ;;  %1583 = vmatmul.f32.gmra.mxu0 %v5039_v38  ;;  %v1696_v43 = vld [vmem:[%s4047_s20] sm:$0xf8] }
 0x186   : > { %v6353_v38 = vld [vmem:[#allocation9_spill] sm:$0xff]  ;;  %v1761_v60 = vrot.slane %v1696_v43, 3  ;;  %2071 = vmatpush.msrb.mxu0 %v3680_v27 }
 0x187   : > { %3661 = vmatmul.msk.f32.gmra.mxu3 %vm581_vm1, %v5142_v59  ;;  %1462 = vmatmul.f32.gmra.mxu1 %v5145_v48  ;;  %v742_v22 = vadd.f32 %v6353_v38, %v4774_v54  ;;  %v5195_v38 = vsel %vm1760_vm3, %v1764_v62, %v1765_v18  ;;  %v3778_v62 = vld [vmem:[%s6328_s1 + $0x578] sm:$0xff] }
 0x188   : > { %v1159_v36 = vpop.f32.mrf.mxu2  ;;  %2578 = vmatpush.msra.mxu0 %v3778_v62  ;;  %v5244_v62 = vld [vmem:[%s4047_s20 + $0x40] sm:$0xff] }
 0x189   : > { %v5171_v6 = vadd.f32 %v1159_v36, %v1095_v53  ;;  %v6356_v53 = vld [vmem:[#allocation12_spill] sm:$0xff] }
 0x18a   : > { %v1038_v1 = vpop.f32.mrf.mxu3  ;;  %v1097_v26 = vpop.f32.mrf.mxu0 }
 0x18b   : > { %v5163_v25 = vadd.f32 %v1038_v1, %v974_v35  ;;  %v5185_v35 = vld [vmem:[%s4047_s20 + $0x10] sm:$0xff]  ;;  %v1098_v36 = vadd.f32 %v1097_v26, %v6356_v53 }
 0x18c   : > { %v976_v31 = vpop.f32.mrf.mxu1  ;;  %6355 = vst [vmem:[#allocation13_spill] sm:$0xff] %v5185_v35  ;;  %v1762_v1 = vrot.slane %v5185_v35, 3  ;;  %v3781_v26 = vld [vmem:[%s6328_s1 + $0x590] sm:$0xff] }
 0x18d   : > { %v977_v54 = vadd.f32 %v976_v31, %v742_v22  ;;  %3675 = vmatmul.msk.f32.gmra.mxu2 %vm581_vm1, %v5074_v0  ;;  %1586 = vmatmul.f32.gmra.mxu0 %v5077_v24  ;;  %v1699_v22 = vld [vmem:[%s4047_s20 + $0x28] sm:$0x7]  ;;  %v1698_v0 = vld [vmem:[%s4047_s20 + $0x20] sm:$0x7]  ;;  %v3782_v24 = vld [vmem:[%s6328_s1 + $0x598] sm:$0xff] }
 0x18e   : > { %v5198_v35 = vsel %vm1760_vm3, %v1761_v60, %v1762_v1  ;;  %2657 = vmatpush.msra.mxu2 %v3782_v24  ;;  %v1769_v60 = vrot.slane %v1699_v22, 3  ;;  %2527 = vmatpush.msra.mxu3 %v3781_v26 }
 0x18f   : > { %3662 = vmatmul.msk.f32.gmra.mxu3 %vm581_vm1, %v5166_v19  ;;  %1465 = vmatmul.f32.gmra.mxu1 %v5169_v10 }
 0x190   : > { %v1162_v43 = vpop.f32.mrf.mxu2  ;;  %v5221_v24 = vsel %vm1760_vm3, %v1765_v18, %v1769_v60  ;;  %v1772_v60 = vrot.slane %v5244_v62, 3 }
 0x191   : > { %v5200_v31 = vadd.f32 %v1162_v43, %v1098_v36 }
 0x192   : > { %v1041_v61 = vpop.f32.mrf.mxu3  ;;  %v1100_v27 = vpop.f32.mrf.mxu0 }
 0x193   : > { %v5192_v46 = vadd.f32 %v1041_v61, %v977_v54  ;;  %6357 = vst [vmem:[#allocation5_spill] sm:$0xff] %v5200_v31  ;;  %v1767_v54 = vrot.slane %v1698_v0, 3  ;;  %v1101_v53 = vadd.f32 %v1100_v27, %v4733_v41  ;;  %v3777_v41 = vld [vmem:[%s6328_s1 + $0x570] sm:$0xff] }
 0x194   : > { %v1421_v33 = vpop.f32.mrf.mxu1  ;;  %2448 = vmatpush.msra.mxu1 %v3777_v41 }
 0x195   : > { %3676 = vmatmul.msk.f32.gmra.mxu2 %vm581_vm1, %v5110_v12  ;;  %1589 = vmatmul.f32.gmra.mxu0 %v5113_v5  ;;  %v5224_v22 = vsel %vm1760_vm3, %v1762_v1, %v1767_v54  ;;  %v1701_v12 = vld [vmem:[%s4047_s20 + $0x38] sm:$0xf8]  ;;  %v1700_v5 = vld [vmem:[%s4047_s20 + $0x30] sm:$0xf8]  ;;  %v1775_v1 = vrot.slane %v4751_v28, 3 }
 0x196   : > { %v1774_v18 = vrot.slane %v1701_v12, 3  ;;  %v1771_v27 = vrot.slane %v1700_v5, 3 }
 0x197   : > { %3715 = vmatmul.msk.f32.vlgmr.msrb.gmra.mxu3 %vm581_vm1, %v5195_v38  ;;  %1942 = vmatmul.f32.vlgmr.msrb.gmra.mxu1 %v5198_v35 }
 0x198   : > { %v1165_v43 = vpop.f32.mrf.mxu2  ;;  %v5252_v28 = vsel %vm1760_vm3, %v1774_v18, %v1775_v1  ;;  %v5255_v12 = vsel %vm1760_vm3, %v1771_v27, %v1772_v60 }
 0x199   : > { %v5229_v26 = vadd.f32 %v1165_v43, %v1101_v53 }
 0x19a   : > { %v1486_v61 = vpop.f32.mrf.mxu3 }
 0x19b   : > { %v1487_v36 = vadd.f32 %v1486_v61, %v1421_v33  ;;  %v1103_v33 = vpop.f32.mrf.mxu0 }
 0x19c   : > { %v1424_v31 = vpop.f32.mrf.mxu1  ;;  %v1104_v61 = vadd.f32 %v1103_v33, %v4767_v13  ;;  %v3775_v13 = vld [vmem:[%s6328_s1 + $0x560] sm:$0xff] }
 0x19d   : > { %v5227_v0 = vadd.f32 %v1487_v36, %v4725_v51  ;;  %v3776_v51 = vld [vmem:[%s6328_s1 + $0x568] sm:$0xff]  ;;  %3677 = vmatmul.msk.f32.gmra.mxu2 %vm581_vm1, %v5142_v59  ;;  %1592 = vmatmul.f32.gmra.mxu0 %v5145_v48  ;;  %v1703_v59 = vld [vmem:[%s4047_s20 + $0x58] sm:$0x7] }
 0x19e   : > { %2579 = vmatpush.msra.mxu0 %v3776_v51  ;;  %v1702_v51 = vld [vmem:[%s4047_s20 + $0x50] sm:$0x7]  ;;  %2449 = vmatpush.msra.mxu1 %v3775_v13 }
 0x19f   : > { %3716 = vmatmul.msk.f32.gmra.mxu3 %vm581_vm1, %v5221_v24  ;;  %1945 = vmatmul.f32.gmra.mxu1 %v5224_v22  ;;  %v1777_v33 = vrot.slane %v1702_v51, 3 }
 0x1a0   : > { %v1168_v36 = vpop.f32.mrf.mxu2 }
 0x1a1   : > { %v5260_v41 = vadd.f32 %v1168_v36, %v1104_v61  ;;  %v5281_v13 = vsel %vm1760_vm3, %v1772_v60, %v1777_v33  ;;  %v1785_v60 = vrot.slane %v4812_v44, 3 }
 0x1a2   : > { %v1489_v54 = vpop.f32.mrf.mxu3 }
 0x1a3   : > { %v1490_v53 = vadd.f32 %v1489_v54, %v1424_v31  ;;  %v1106_v48 = vpop.f32.mrf.mxu0  ;;  %v1779_v31 = vrot.slane %v1703_v59, 3 }
 0x1a4   : > { %v1427_v43 = vpop.f32.mrf.mxu1  ;;  %v1107_v27 = vadd.f32 %v1106_v48, %v4796_v14  ;;  %v3773_v14 = vld [vmem:[%s6328_s1 + $0x550] sm:$0xff] }
 0x1a5   : > { %v5258_v5 = vadd.f32 %v1490_v53, %v4758_v50  ;;  %v3774_v50 = vld [vmem:[%s6328_s1 + $0x558] sm:$0xff]  ;;  %3678 = vmatmul.msk.f32.gmra.mxu2 %vm581_vm1, %v5166_v19  ;;  %1595 = vmatmul.f32.gmra.mxu0 %v5169_v10  ;;  %v5278_v53 = vsel %vm1760_vm3, %v1775_v1, %v1779_v31  ;;  %v1705_v19 = vld [vmem:[%s4047_s20 + $0x68] sm:$0xf8]  ;;  %v1704_v10 = vld [vmem:[%s4047_s20 + $0x60] sm:$0xf8] }
 0x1a6   : > { %2580 = vmatpush.msra.mxu0 %v3774_v50  ;;  %2450 = vmatpush.msra.mxu1 %v3773_v14  ;;  %v1784_v1 = vrot.slane %v1705_v19, 3  ;;  %v1781_v48 = vrot.slane %v1704_v10, 3  ;;  %v5301_v50 = vld [vmem:[%s4047_s20 + $0x70] sm:$0xff]  ;;  %v1707_v14 = vld [vmem:[%s4047_s20 + $0x88] sm:$0x7] }
 0x1a7   : > { %3717 = vmatmul.msk.f32.gmra.mxu3 %vm581_vm1, %v5252_v28  ;;  %1948 = vmatmul.f32.gmra.mxu1 %v5255_v12  ;;  %v1782_v31 = vrot.slane %v5301_v50, 3 }
 0x1a8   : > { %v1171_v61 = vpop.f32.mrf.mxu2 }
 0x1a9   : > { %v5286_v51 = vadd.f32 %v1171_v61, %v1107_v27  ;;  %v5311_v44 = vsel %vm1760_vm3, %v1781_v48, %v1782_v31 }
 0x1aa   : > { %v1492_v18 = vpop.f32.mrf.mxu3 }
 0x1ab   : > { %v1493_v54 = vadd.f32 %v1492_v18, %v1427_v43  ;;  %v1551_v43 = vpop.f32.mrf.mxu0 }
 0x1ac   : > { %v1430_v36 = vpop.f32.mrf.mxu1 }
 0x1ad   : > { %v5284_v59 = vadd.f32 %v1493_v54, %v4787_v8  ;;  %v3772_v8 = vld [vmem:[%s6328_s1 + $0x548] sm:$0xff]  ;;  %3731 = vmatmul.msk.f32.vlgmr.msrb.gmra.mxu2 %vm581_vm1, %v5195_v38  ;;  %2072 = vmatmul.f32.vlgmr.msrb.gmra.mxu0 %v5198_v35  ;;  %v5308_v54 = vsel %vm1760_vm3, %v1784_v1, %v1785_v60  ;;  %v3771_v35 = vld [vmem:[%s6328_s1 + $0x540] sm:$0xff] }
 0x1ae   : > { %2581 = vmatpush.msra.mxu0 %v3772_v8  ;;  %v1706_v8 = vld [vmem:[%s4047_s20 + $0x80] sm:$0x7]  ;;  %2451 = vmatpush.msra.mxu1 %v3771_v35  ;;  %v1709_v35 = vld [vmem:[%s4047_s20 + $0x98] sm:$0xf8] }
 0x1af   : > { %3718 = vmatmul.msk.f32.gmra.mxu3 %vm581_vm1, %v5278_v53  ;;  %1951 = vmatmul.f32.gmra.mxu1 %v5281_v13  ;;  %v1787_v1 = vrot.slane %v1706_v8, 3 }
 0x1b0   : > { %v1616_v27 = vpop.f32.mrf.mxu2 }
 0x1b1   : > { %v1617_v10 = vadd.f32 %v1616_v27, %v1551_v43  ;;  %v1789_v43 = vrot.slane %v1707_v14, 3 }
 0x1b2   : > { %v1495_v33 = vpop.f32.mrf.mxu3 }
 0x1b3   : > { %v1496_v18 = vadd.f32 %v1495_v33, %v1430_v36  ;;  %v1554_v38 = vpop.f32.mrf.mxu0  ;;  %v5322_v36 = vadd.f32 %v1617_v10, %v4828_v34  ;;  %v5337_v10 = vsel %vm1760_vm3, %v1782_v31, %v1787_v1  ;;  %v1794_v31 = vrot.slane %v1709_v35, 3 }
 0x1b4   : > { %v1433_v61 = vpop.f32.mrf.mxu1 }
 0x1b5   : > { %v5314_v19 = vadd.f32 %v1496_v18, %v4820_v39  ;;  %v3770_v39 = vld [vmem:[%s6328_s1 + $0x538] sm:$0xff]  ;;  %3732 = vmatmul.msk.f32.gmra.mxu2 %vm581_vm1, %v5221_v24  ;;  %2075 = vmatmul.f32.gmra.mxu0 %v5224_v22  ;;  %v5334_v18 = vsel %vm1760_vm3, %v1785_v60, %v1789_v43  ;;  %v3769_v24 = vld [vmem:[%s6328_s1 + $0x530] sm:$0xff]  ;;  %v5358_v43 = vld [vmem:[%s4047_s20 + $0xa0] sm:$0xff] }
 0x1b6   : > { %2582 = vmatpush.msra.mxu0 %v3770_v39  ;;  %v1708_v39 = vld [vmem:[%s4047_s20 + $0x90] sm:$0xf8]  ;;  %2452 = vmatpush.msra.mxu1 %v3769_v24  ;;  %v1711_v24 = vld [vmem:[%s4047_s20 + $0xb8] sm:$0x7] }
 0x1b7   : > { %3719 = vmatmul.msk.f32.gmra.mxu3 %vm581_vm1, %v5308_v54  ;;  %1954 = vmatmul.f32.gmra.mxu1 %v5311_v44 }
 0x1b8   : > { %v1619_v33 = vpop.f32.mrf.mxu2 }
 0x1b9   : > { %v1620_v8 = vadd.f32 %v1619_v33, %v1554_v38  ;;  %v1791_v38 = vrot.slane %v1708_v39, 3 }
 0x1ba   : > { %v1498_v34 = vpop.f32.mrf.mxu3 }
 0x1bb   : > { %v1499_v48 = vadd.f32 %v1498_v34, %v1433_v61  ;;  %v1557_v22 = vpop.f32.mrf.mxu0  ;;  %v5348_v60 = vadd.f32 %v1620_v8, %v4855_v63  ;;  %v1795_v61 = vrot.slane %v4871_v42, 3  ;;  %v1792_v63 = vrot.slane %v5358_v43, 3 }
 0x1bc   : > { %v1436_v27 = vpop.f32.mrf.mxu1 }
 0x1bd   : > { %v5340_v14 = vadd.f32 %v1499_v48, %v4847_v49  ;;  %v3768_v49 = vld [vmem:[%s6328_s1 + $0x528] sm:$0xff]  ;;  %3733 = vmatmul.msk.f32.gmra.mxu2 %vm581_vm1, %v5252_v28  ;;  %2078 = vmatmul.f32.gmra.mxu0 %v5255_v12  ;;  %v5365_v33 = vsel %vm1760_vm3, %v1794_v31, %v1795_v61  ;;  %v5368_v42 = vsel %vm1760_vm3, %v1791_v38, %v1792_v63  ;;  %v3767_v28 = vld [vmem:[%s6328_s1 + $0x520] sm:$0xff] }
 0x1be   : > { %2583 = vmatpush.msra.mxu0 %v3768_v49  ;;  %v1710_v49 = vld [vmem:[%s4047_s20 + $0xb0] sm:$0x7]  ;;  %2453 = vmatpush.msra.mxu1 %v3767_v28  ;;  %v1713_v28 = vld [vmem:[%s4047_s20 + $0xc8] sm:$0xf8] }
 0x1bf   : > { %3720 = vmatmul.msk.f32.gmra.mxu3 %vm581_vm1, %v5334_v18  ;;  %1957 = vmatmul.f32.gmra.mxu1 %v5337_v10  ;;  %v1797_v31 = vrot.slane %v1710_v49, 3 }
 0x1c0   : > { %v1622_v48 = vpop.f32.mrf.mxu2 }
 0x1c1   : > { %v1623_v39 = vadd.f32 %v1622_v48, %v1557_v22  ;;  %v1799_v22 = vrot.slane %v1711_v24, 3 }
 0x1c2   : > { %v1501_v1 = vpop.f32.mrf.mxu3 }
 0x1c3   : > { %v1502_v34 = vadd.f32 %v1501_v1, %v1436_v27  ;;  %v1560_v12 = vpop.f32.mrf.mxu0  ;;  %v5379_v27 = vadd.f32 %v1623_v39, %v4887_v57  ;;  %v5394_v39 = vsel %vm1760_vm3, %v1792_v63, %v1797_v31  ;;  %v1804_v63 = vrot.slane %v1713_v28, 3  ;;  %v1715_v28 = vld [vmem:[%s4047_s20 + $0xe8] sm:$0x7] }
 0x1c4   : > { %v1439_v8 = vpop.f32.mrf.mxu1 }
 0x1c5   : > { %v5371_v35 = vadd.f32 %v1502_v34, %v4879_v21  ;;  %v3766_v21 = vld [vmem:[%s6328_s1 + $0x518] sm:$0xff]  ;;  %3734 = vmatmul.msk.f32.gmra.mxu2 %vm581_vm1, %v5278_v53  ;;  %2081 = vmatmul.f32.gmra.mxu0 %v5281_v13  ;;  %v5391_v34 = vsel %vm1760_vm3, %v1795_v61, %v1799_v22  ;;  %v3765_v53 = vld [vmem:[%s6328_s1 + $0x510] sm:$0xff] }
 0x1c6   : > { %2584 = vmatpush.msra.mxu0 %v3766_v21  ;;  %v1712_v21 = vld [vmem:[%s4047_s20 + $0xc0] sm:$0xf8]  ;;  %2454 = vmatpush.msra.mxu1 %v3765_v53  ;;  %v5415_v22 = vld [vmem:[%s4047_s20 + $0xd0] sm:$0xff] }
 0x1c7   : > { %3721 = vmatmul.msk.f32.gmra.mxu3 %vm581_vm1, %v5365_v33  ;;  %1960 = vmatmul.f32.gmra.mxu1 %v5368_v42 }
 0x1c8   : > { %v1625_v1 = vpop.f32.mrf.mxu2 }
 0x1c9   : > { %v1626_v49 = vadd.f32 %v1625_v1, %v1560_v12  ;;  %v1801_v12 = vrot.slane %v1712_v21, 3 }
 0x1ca   : > { %v1504_v57 = vpop.f32.mrf.mxu3 }
 0x1cb   : > { %v1505_v38 = vadd.f32 %v1504_v57, %v1439_v8  ;;  %v1563_v13 = vpop.f32.mrf.mxu0  ;;  %v5405_v61 = vadd.f32 %v1626_v49, %v4914_v55  ;;  %v1805_v8 = vrot.slane %v4930_v47, 3  ;;  %v1802_v55 = vrot.slane %v5415_v22, 3 }
 0x1cc   : > { %v1442_v48 = vpop.f32.mrf.mxu1 }
 0x1cd   : > { %v5397_v24 = vadd.f32 %v1505_v38, %v4906_v15  ;;  %v3764_v15 = vld [vmem:[%s6328_s1 + $0x508] sm:$0xff]  ;;  %3735 = vmatmul.msk.f32.gmra.mxu2 %vm581_vm1, %v5308_v54  ;;  %2084 = vmatmul.f32.gmra.mxu0 %v5311_v44  ;;  %v5422_v1 = vsel %vm1760_vm3, %v1804_v63, %v1805_v8  ;;  %v5425_v47 = vsel %vm1760_vm3, %v1801_v12, %v1802_v55  ;;  %v3763_v44 = vld [vmem:[%s6328_s1 + $0x500] sm:$0xff]  ;;  %v1809_v12 = vrot.slane %v1715_v28, 3 }
 0x1ce   : > { %2585 = vmatpush.msra.mxu0 %v3764_v15  ;;  %v1714_v15 = vld [vmem:[%s4047_s20 + $0xe0] sm:$0x7]  ;;  %v3780_v54 = vld [vmem:[%s6328_s1 + $0x588] sm:$0xff]  ;;  %2455 = vmatpush.msra.mxu1 %v3763_v44 }
 0x1cf   : > { %3722 = vmatmul.msk.f32.gmra.mxu3 %vm581_vm1, %v5391_v34  ;;  %1963 = vmatmul.f32.gmra.mxu1 %v5394_v39 }
 0x1d0   : > { %v1628_v38 = vpop.f32.mrf.mxu2  ;;  %2658 = vmatpush.msra.mxu2 %v3780_v54 }
 0x1d1   : > { %v1629_v53 = vadd.f32 %v1628_v38, %v1563_v13  ;;  %v3762_v13 = vld [vmem:[%s6328_s1 + $0x4f8] sm:$0xff] }
 0x1d2   : > { %v1507_v31 = vpop.f32.mrf.mxu3  ;;  %2586 = vmatpush.msra.mxu0 %v3762_v13  ;;  %v1716_v13 = vld [vmem:[%s4047_s20 + $0xf0] sm:$0xf8] }
 0x1d3   : > { %v1508_v57 = vadd.f32 %v1507_v31, %v1442_v48  ;;  %v1566_v48 = vpop.f32.mrf.mxu0  ;;  %v5439_v63 = vadd.f32 %v1629_v53, %v4950_v23  ;;  %v1807_v31 = vrot.slane %v1714_v15, 3  ;;  %v5454_v53 = vsel %vm1760_vm3, %v1805_v8, %v1809_v12 }
 0x1d4   : > { %v1445_v49 = vpop.f32.mrf.mxu1  ;;  %v1812_v12 = vrot.slane %v4999_v4, 3 }
 0x1d5   : > { %v5429_v21 = vadd.f32 %v1508_v57, %v4938_v7  ;;  %v3779_v7 = vld [vmem:[%s6328_s1 + $0x580] sm:$0xff]  ;;  %3736 = vmatmul.msk.f32.gmra.mxu2 %vm581_vm1, %v5334_v18  ;;  %2087 = vmatmul.f32.gmra.mxu0 %v5337_v10  ;;  %v5457_v44 = vsel %vm1760_vm3, %v1802_v55, %v1807_v31  ;;  %v3761_v18 = vld [vmem:[%s6328_s1 + $0x4f0] sm:$0xff]  ;;  %v1815_v55 = vrot.slane %v4995_v52, 3 }
 0x1d6   : > { %2528 = vmatpush.msra.mxu3 %v3779_v7  ;;  %v1717_v7 = vld [vmem:[%s4047_s20 + $0xf8] sm:$0xf8]  ;;  %2456 = vmatpush.msra.mxu1 %v3761_v18 }
 0x1d7   : > { %3723 = vmatmul.msk.f32.gmra.mxu3 %vm581_vm1, %v5422_v1  ;;  %1966 = vmatmul.f32.gmra.mxu1 %v5425_v47  ;;  %v1814_v8 = vrot.slane %v1717_v7, 3  ;;  %v1719_v7 = vld [vmem:[%s4047_s20 + $0x118] sm:$0x7] }
 0x1d8   : > { %v1631_v38 = vpop.f32.mrf.mxu2  ;;  %v1819_v18 = vrot.slane %v1719_v7, 3  ;;  %v1721_v7 = vld [vmem:[%s4047_s20 + $0x128] sm:$0xf8] }
 0x1d9   : > { %v1632_v15 = vadd.f32 %v1631_v38, %v1566_v48  ;;  %v1811_v48 = vrot.slane %v1716_v13, 3  ;;  %v1718_v13 = vld [vmem:[%s4047_s20 + $0x110] sm:$0x7] }
 0x1da   : > { %v1510_v23 = vpop.f32.mrf.mxu3 }
 0x1db   : > { %v1511_v57 = vadd.f32 %v1510_v23, %v1445_v49  ;;  %v1569_v10 = vpop.f32.mrf.mxu0  ;;  %v5468_v49 = vadd.f32 %v1632_v15, %v4979_v9  ;;  %v5485_v15 = vsel %vm1760_vm3, %v1811_v48, %v1812_v12  ;;  %v5508_v48 = vsel %vm1760_vm3, %v1815_v55, %v1819_v18  ;;  %v3755_v18 = vld [vmem:[%s6328_s1 + $0x4c0] sm:$0xff] }
 0x1dc   : > { %v1448_v54 = vpop.f32.mrf.mxu1 }
 0x1dd   : > { %v5460_v28 = vadd.f32 %v1511_v57, %v4971_v3  ;;  %v3760_v3 = vld [vmem:[%s6328_s1 + $0x4e8] sm:$0xff]  ;;  %3737 = vmatmul.msk.f32.gmra.mxu2 %vm581_vm1, %v5365_v33  ;;  %2090 = vmatmul.f32.gmra.mxu0 %v5368_v42  ;;  %v5482_v57 = vsel %vm1760_vm3, %v1814_v8, %v1815_v55  ;;  %v3759_v33 = vld [vmem:[%s6328_s1 + $0x4e0] sm:$0xff]  ;;  %v1824_v55 = vrot.slane %v1721_v7, 3 }
 0x1de   : > { %2587 = vmatpush.msra.mxu0 %v3760_v3  ;;  %2457 = vmatpush.msra.mxu1 %v3759_v33 }
 0x1df   : > { %3724 = vmatmul.msk.f32.gmra.mxu3 %vm581_vm1, %v5454_v53  ;;  %1969 = vmatmul.f32.gmra.mxu1 %v5457_v44 }
 0x1e0   : > { %v1634_v23 = vpop.f32.mrf.mxu2 }
 0x1e1   : > { %v1635_v4 = vadd.f32 %v1634_v23, %v1569_v10  ;;  %v1817_v10 = vrot.slane %v1718_v13, 3  ;;  %v1720_v13 = vld [vmem:[%s4047_s20 + $0x120] sm:$0xf8] }
 0x1e2   : > { %v1513_v9 = vpop.f32.mrf.mxu3  ;;  %v1821_v33 = vrot.slane %v1720_v13, 3  ;;  %v3754_v13 = vld [vmem:[%s6328_s1 + $0x4b8] sm:$0xff] }
 0x1e3   : > { %v1514_v31 = vadd.f32 %v1513_v9, %v1448_v54  ;;  %v1572_v42 = vpop.f32.mrf.mxu0  ;;  %v5496_v54 = vadd.f32 %v1635_v4, %v5014_v29 }
 0x1e4   : > { %v1451_v38 = vpop.f32.mrf.mxu1 }
 0x1e5   : > { %v5488_v52 = vadd.f32 %v1514_v31, %v5006_v37  ;;  %v3758_v37 = vld [vmem:[%s6328_s1 + $0x4d8] sm:$0xff]  ;;  %3738 = vmatmul.msk.f32.gmra.mxu2 %vm581_vm1, %v5391_v34  ;;  %2093 = vmatmul.f32.gmra.mxu0 %v5394_v39  ;;  %v5511_v31 = vsel %vm1760_vm3, %v1812_v12, %v1817_v10  ;;  %v3757_v34 = vld [vmem:[%s6328_s1 + $0x4d0] sm:$0xff]  ;;  %v1825_v12 = vrot.slane %v5057_v20, 3 }
 0x1e6   : > { %2588 = vmatpush.msra.mxu0 %v3758_v37  ;;  %2458 = vmatpush.msra.mxu1 %v3757_v34 }
 0x1e7   : > { %3725 = vmatmul.msk.f32.gmra.mxu3 %vm581_vm1, %v5482_v57  ;;  %1972 = vmatmul.f32.gmra.mxu1 %v5485_v15  ;;  %v5539_v20 = vsel %vm1760_vm3, %v1824_v55, %v1825_v12 }
 0x1e8   : > { %v1637_v8 = vpop.f32.mrf.mxu2  ;;  %2459 = vmatpush.msra.mxu1 %v3755_v18 }
 0x1e9   : > { %v1638_v4 = vadd.f32 %v1637_v8, %v1572_v42  ;;  %v1822_v42 = vrot.slane %v5061_v40, 3  ;;  %v1722_v8 = vld [vmem:[%s4047_s20 + $0x140] sm:$0x7] }
 0x1ea   : > { %v1516_v29 = vpop.f32.mrf.mxu3 }
 0x1eb   : > { %v1517_v3 = vadd.f32 %v1516_v29, %v1451_v38  ;;  %v1575_v39 = vpop.f32.mrf.mxu0  ;;  %v5522_v38 = vadd.f32 %v1638_v4, %v5041_v32 }
 0x1ec   : > { %v1454_v9 = vpop.f32.mrf.mxu1 }
 0x1ed   : > { %v5514_v23 = vadd.f32 %v1517_v3, %v5033_v11  ;;  %v3756_v11 = vld [vmem:[%s6328_s1 + $0x4c8] sm:$0xff]  ;;  %3739 = vmatmul.msk.f32.gmra.mxu2 %vm581_vm1, %v5422_v1  ;;  %2096 = vmatmul.f32.gmra.mxu0 %v5425_v47  ;;  %v5542_v3 = vsel %vm1760_vm3, %v1821_v33, %v1822_v42  ;;  %v3747_v33 = vld [vmem:[%s6328_s1 + $0x480] sm:$0xff] }
 0x1ee   : > { %2589 = vmatpush.msra.mxu0 %v3756_v11  ;;  %v1723_v47 = vld [vmem:[%s4047_s20 + $0x148] sm:$0x7] }
 0x1ef   : > { %3726 = vmatmul.msk.f32.gmra.mxu3 %vm581_vm1, %v5508_v48  ;;  %1975 = vmatmul.f32.gmra.mxu1 %v5511_v31  ;;  %v1829_v34 = vrot.slane %v1723_v47, 3  ;;  %v1724_v47 = vld [vmem:[%s4047_s20 + $0x150] sm:$0xf8] }
 0x1f0   : > { %v1640_v10 = vpop.f32.mrf.mxu2  ;;  %2590 = vmatpush.msra.mxu0 %v3754_v13 }
 0x1f1   : > { %v1641_v1 = vadd.f32 %v1640_v10, %v1575_v39  ;;  %v1827_v39 = vrot.slane %v1722_v8, 3 }
 0x1f2   : > { %v1519_v32 = vpop.f32.mrf.mxu3 }
 0x1f3   : > { %v1520_v37 = vadd.f32 %v1519_v32, %v1454_v9  ;;  %v3753_v9 = vld [vmem:[%s6328_s1 + $0x4b0] sm:$0xff]  ;;  %v1578_v4 = vpop.f32.mrf.mxu0  ;;  %v5553_v7 = vadd.f32 %v1641_v1, %v5079_v16  ;;  %v1725_v1 = vld [vmem:[%s4047_s20 + $0x158] sm:$0xf8] }
 0x1f4   : > { %v1457_v29 = vpop.f32.mrf.mxu1  ;;  %2460 = vmatpush.msra.mxu1 %v3753_v9  ;;  %v3749_v16 = vld [vmem:[%s6328_s1 + $0x490] sm:$0xff]  ;;  %v1831_v9 = vrot.slane %v1724_v47, 3 }
 0x1f5   : > { %v5545_v40 = vadd.f32 %v1520_v37, %v5068_v17  ;;  %v3751_v17 = vld [vmem:[%s6328_s1 + $0x4a0] sm:$0xff]  ;;  %3740 = vmatmul.msk.f32.gmra.mxu2 %vm581_vm1, %v5454_v53  ;;  %2099 = vmatmul.f32.gmra.mxu0 %v5457_v44  ;;  %v5574_v37 = vsel %vm1760_vm3, %v1825_v12, %v1829_v34  ;;  %v5577_v53 = vsel %vm1760_vm3, %v1822_v42, %v1827_v39  ;;  %v3752_v12 = vld [vmem:[%s6328_s1 + $0x4a8] sm:$0xff]  ;;  %v1834_v42 = vrot.slane %v1725_v1, 3 }
 0x1f6   : > { %2461 = vmatpush.msra.mxu1 %v3751_v17  ;;  %2591 = vmatpush.msra.mxu0 %v3752_v12 }
 0x1f7   : > { %3727 = vmatmul.msk.f32.gmra.mxu3 %vm581_vm1, %v5539_v20  ;;  %1978 = vmatmul.f32.gmra.mxu1 %v5542_v3 }
 0x1f8   : > { %2462 = vmatpush.msra.mxu1 %v3749_v16  ;;  %v1643_v32 = vpop.f32.mrf.mxu2 }
 0x1f9   : > { %v1644_v10 = vadd.f32 %v1643_v32, %v1578_v4  ;;  %v1832_v4 = vrot.slane %v5132_v30, 3 }
 0x1fa   : > { %v1522_v11 = vpop.f32.mrf.mxu3  ;;  %2463 = vmatpush.msra.mxu1 %v3747_v33 }
 0x1fb   : > { %v1523_v55 = vadd.f32 %v1522_v11, %v1457_v29  ;;  %v1581_v29 = vpop.f32.mrf.mxu0  ;;  %v5585_v8 = vadd.f32 %v1644_v10, %v5115_v58  ;;  %v5602_v16 = vsel %vm1760_vm3, %v1831_v9, %v1832_v4  ;;  %v1727_v11 = vld [vmem:[%s4047_s20 + $0x178] sm:$0x7] }
 0x1fc   : > { %v1460_v18 = vpop.f32.mrf.mxu1 }
 0x1fd   : > { %v5580_v44 = vadd.f32 %v1523_v55, %v5104_v56  ;;  %v1835_v56 = vrot.slane %v5128_v2, 3  ;;  %3741 = vmatmul.msk.f32.gmra.mxu2 %vm581_vm1, %v5482_v57  ;;  %2102 = vmatmul.f32.gmra.mxu0 %v5485_v15  ;;  %v1726_v55 = vld [vmem:[%s4047_s20 + $0x170] sm:$0x7]  ;;  %v6358_v57 = vld [vmem:[#allocation6_spill] sm:$0xff]  ;;  %v3750_v15 = vld [vmem:[%s6328_s1 + $0x498] sm:$0xff] }
 0x1fe   : > { %2592 = vmatpush.msra.mxu0 %v3750_v15 }
 0x1ff   : > { %3728 = vmatmul.msk.f32.gmra.mxu3 %vm581_vm1, %v5574_v37  ;;  %1981 = vmatmul.f32.gmra.mxu1 %v5577_v53  ;;  %v5599_v34 = vsel %vm1760_vm3, %v1834_v42, %v1835_v56 }
 0x200   : > { %v1646_v13 = vpop.f32.mrf.mxu2 }
 0x201   : > { %v1647_v30 = vadd.f32 %v1646_v13, %v1581_v29  ;;  %v2218_v13 = vld [vmem:[%s4047_s20] sm:$0xf0] }
 0x202   : > { %v1525_v58 = vpop.f32.mrf.mxu3 }
 0x203   : > { %v1526_v17 = vadd.f32 %v1525_v58, %v1460_v18  ;;  %v1584_v33 = vpop.f32.mrf.mxu0  ;;  %v5610_v32 = vadd.f32 %v1647_v30, %v6358_v57  ;;  %v1837_v18 = vrot.slane %v1726_v55, 3  ;;  %v2283_v30 = vrot.slane %v2218_v13, 4 }
 0x204   : > { %v1463_v39 = vpop.f32.mrf.mxu1 }
 0x205   : > { %v5605_v2 = vadd.f32 %v1526_v17, %v5139_v45  ;;  %6359 = vst [vmem:[#allocation8_spill] sm:$0xff] %v5610_v32  ;;  %v1839_v45 = vrot.slane %v1727_v11, 3  ;;  %3742 = vmatmul.msk.f32.gmra.mxu2 %vm581_vm1, %v5508_v48  ;;  %2105 = vmatmul.f32.gmra.mxu0 %v5511_v31  ;;  %v5625_v42 = vsel %vm1760_vm3, %v1832_v4, %v1837_v18  ;;  %v2219_v17 = vld [vmem:[%s4047_s20 + $0x8] sm:$0xf0]  ;;  %v6360_v11 = vld [vmem:[#allocation13_spill] sm:$0xff] }
 0x206   : > { %v2286_v4 = vrot.slane %v2219_v17, 4  ;;  %v2284_v55 = vrot.slane %v6360_v11, 4  ;;  %v6361_v17 = vld [vmem:[#allocation5_spill] sm:$0xff] }
 0x207   : > { %3729 = vmatmul.msk.f32.gmra.mxu3 %vm581_vm1, %v5599_v34  ;;  %1984 = vmatmul.f32.gmra.mxu1 %v5602_v16  ;;  %v5622_v29 = vsel %vm1760_vm3, %v1835_v56, %v1839_v45  ;;  %v3748_v56 = vld [vmem:[%s6328_s1 + $0x488] sm:$0xff] }
 0x208   : > { %v1649_v47 = vpop.f32.mrf.mxu2  ;;  %2593 = vmatpush.msra.mxu0 %v3748_v56  ;;  %v5650_v18 = vsel %vm2282_vm4, %v2283_v30, %v2284_v55 }
 0x209   : > { %v1650_v58 = vadd.f32 %v1649_v47, %v1584_v33  ;;  %v2221_v47 = vld [vmem:[%s4047_s20 + $0x28] sm:$0xf] }
 0x20a   : > { %v1528_v10 = vpop.f32.mrf.mxu3 }
 0x20b   : > { %v1529_v1 = vadd.f32 %v1528_v10, %v1463_v39  ;;  %v1587_v48 = vpop.f32.mrf.mxu0  ;;  %v5633_v31 = vadd.f32 %v1650_v58, %v5171_v6  ;;  %v3923_v39 = vld [vmem:[%s4047_s20 + $0x18] sm:$0xff]  ;;  %v2220_v58 = vld [vmem:[%s4047_s20 + $0x20] sm:$0xf] }
 0x20c   : > { %v1466_v12 = vpop.f32.mrf.mxu1  ;;  %v2289_v13 = vrot.slane %v2220_v58, 4 }
 0x20d   : > { %v5628_v9 = vadd.f32 %v1529_v1, %v5163_v25  ;;  %v2287_v25 = vrot.slane %v3923_v39, 4  ;;  %3743 = vmatmul.msk.f32.gmra.mxu2 %vm581_vm1, %v5539_v20  ;;  %2108 = vmatmul.f32.gmra.mxu0 %v5542_v3 }
 0x20e   : > { %v5670_v30 = vsel %vm2282_vm4, %v2284_v55, %v2289_v13  ;;  %v3924_v55 = vld [vmem:[%s4047_s20 + $0x48] sm:$0xff] }
 0x20f   : > { %3730 = vmatmul.msk.f32.gmra.mxu3 %vm581_vm1, %v5622_v29  ;;  %1987 = vmatmul.f32.gmra.mxu1 %v5625_v42  ;;  %v5647_v15 = vsel %vm2282_vm4, %v2286_v4, %v2287_v25 }
 0x210   : > { %v1652_v57 = vpop.f32.mrf.mxu2 }
 0x211   : > { %v1653_v1 = vadd.f32 %v1652_v57, %v1587_v48  ;;  %v2222_v57 = vld [vmem:[%s4047_s20 + $0x30] sm:$0xf0] }
 0x212   : > { %v1531_v6 = vpop.f32.mrf.mxu3 }
 0x213   : > { %v1532_v33 = vadd.f32 %v1531_v6, %v1466_v12  ;;  %v1590_v20 = vpop.f32.mrf.mxu0  ;;  %v5658_v3 = vadd.f32 %v1653_v1, %v6361_v17  ;;  %v2291_v12 = vrot.slane %v2221_v47, 4  ;;  %v2293_v1 = vrot.slane %v2222_v57, 4 }
 0x214   : > { %v1943_v45 = vpop.f32.mrf.mxu1 }
 0x215   : > { %v5653_v10 = vadd.f32 %v1532_v33, %v5192_v46  ;;  %3744 = vmatmul.msk.f32.gmra.mxu2 %vm581_vm1, %v5574_v37  ;;  %2111 = vmatmul.f32.gmra.mxu0 %v5577_v53  ;;  %v5667_v4 = vsel %vm2282_vm4, %v2287_v25, %v2291_v12  ;;  %v2223_v33 = vld [vmem:[%s4047_s20 + $0x38] sm:$0xf0] }
 0x216   : > { %v2296_v25 = vrot.slane %v2223_v33, 4 }
 0x217   : > { %3783 = vmatmul.msk.f32.vlgmr.msra.gmra.mxu3 %vm581_vm1, %v5647_v15  ;;  %2464 = vmatmul.f32.vlgmr.msra.gmra.mxu1 %v5650_v18 }
 0x218   : > { %v1655_v56 = vpop.f32.mrf.mxu2 }
 0x219   : > { %v1656_v6 = vadd.f32 %v1655_v56, %v1590_v20 }
 0x21a   : > { %v2008_v46 = vpop.f32.mrf.mxu3 }
 0x21b   : > { %v2009_v48 = vadd.f32 %v2008_v46, %v1943_v45  ;;  %v1593_v37 = vpop.f32.mrf.mxu0  ;;  %v5678_v53 = vadd.f32 %v1656_v6, %v5229_v26  ;;  %v2297_v45 = vrot.slane %v3924_v55, 4 }
 0x21c   : > { %v1946_v39 = vpop.f32.mrf.mxu1 }
 0x21d   : > { %v5673_v11 = vadd.f32 %v2009_v48, %v5227_v0  ;;  %v2294_v0 = vrot.slane %v5244_v62, 4  ;;  %3745 = vmatmul.msk.f32.gmra.mxu2 %vm581_vm1, %v5599_v34  ;;  %2114 = vmatmul.f32.gmra.mxu0 %v5602_v16  ;;  %v5689_v20 = vsel %vm2282_vm4, %v2296_v25, %v2297_v45  ;;  %v2225_v62 = vld [vmem:[%s4047_s20 + $0x58] sm:$0xf]  ;;  %v2224_v48 = vld [vmem:[%s4047_s20 + $0x50] sm:$0xf] }
 0x21e   : > { %v2301_v16 = vrot.slane %v2225_v62, 4 }
 0x21f   : > { %3784 = vmatmul.msk.f32.gmra.mxu3 %vm581_vm1, %v5667_v4  ;;  %2467 = vmatmul.f32.gmra.mxu1 %v5670_v30  ;;  %v5692_v12 = vsel %vm2282_vm4, %v2293_v1, %v2294_v0  ;;  %v2227_v1 = vld [vmem:[%s4047_s20 + $0x68] sm:$0xf0] }
 0x220   : > { %v1658_v58 = vpop.f32.mrf.mxu2 }
 0x221   : > { %v1659_v46 = vadd.f32 %v1658_v58, %v1593_v37 }
 0x222   : > { %v2011_v26 = vpop.f32.mrf.mxu3 }
 0x223   : > { %v2012_v47 = vadd.f32 %v2011_v26, %v1946_v39  ;;  %v1596_v56 = vpop.f32.mrf.mxu0  ;;  %v5700_v34 = vadd.f32 %v1659_v46, %v5260_v41  ;;  %v2299_v39 = vrot.slane %v2224_v48, 4  ;;  %v5709_v41 = vsel %vm2282_vm4, %v2297_v45, %v2301_v16  ;;  %v2226_v26 = vld [vmem:[%s4047_s20 + $0x60] sm:$0xf0] }
 0x224   : > { %v1949_v17 = vpop.f32.mrf.mxu1  ;;  %v2306_v45 = vrot.slane %v2227_v1, 4  ;;  %v2303_v58 = vrot.slane %v2226_v26, 4 }
 0x225   : > { %v5695_v13 = vadd.f32 %v2012_v47, %v5258_v5  ;;  %3746 = vmatmul.msk.f32.gmra.mxu2 %vm581_vm1, %v5622_v29  ;;  %2117 = vmatmul.f32.gmra.mxu0 %v5625_v42  ;;  %v5712_v37 = vsel %vm2282_vm4, %v2294_v0, %v2299_v39  ;;  %v3925_v0 = vld [vmem:[%s4047_s20 + $0x78] sm:$0xff] }
 0x226   : > { %v2307_v47 = vrot.slane %v3925_v0, 4  ;;  %v2231_v0 = vld [vmem:[%s4047_s20 + $0x98] sm:$0xf0] }
 0x227   : > { %3785 = vmatmul.msk.f32.gmra.mxu3 %vm581_vm1, %v5689_v20  ;;  %2470 = vmatmul.f32.gmra.mxu1 %v5692_v12 }
 0x228   : > { %v1661_v33 = vpop.f32.mrf.mxu2  ;;  %v5731_v62 = vsel %vm2282_vm4, %v2306_v45, %v2307_v47 }
 0x229   : > { %v1662_v55 = vadd.f32 %v1661_v33, %v1596_v56 }
 0x22a   : > { %v2014_v5 = vpop.f32.mrf.mxu3 }
 0x22b   : > { %v2015_v6 = vadd.f32 %v2014_v5, %v1949_v17  ;;  %v2073_v29 = vpop.f32.mrf.mxu0  ;;  %v5720_v42 = vadd.f32 %v1662_v55, %v5286_v51  ;;  %v2228_v5 = vld [vmem:[%s4047_s20 + $0x80] sm:$0xf] }
 0x22c   : > { %v1952_v57 = vpop.f32.mrf.mxu1  ;;  %v2309_v33 = vrot.slane %v2228_v5, 4 }
 0x22d   : > { %v5715_v25 = vadd.f32 %v2015_v6, %v5284_v59  ;;  %v2304_v59 = vrot.slane %v5301_v50, 4  ;;  %3799 = vmatmul.msk.f32.vlgmr.msra.gmra.mxu2 %vm581_vm1, %v5647_v15  ;;  %2594 = vmatmul.f32.vlgmr.msra.gmra.mxu0 %v5650_v18  ;;  %v2229_v50 = vld [vmem:[%s4047_s20 + $0x88] sm:$0xf] }
 0x22e   : > { %v2311_v18 = vrot.slane %v2229_v50, 4 }
 0x22f   : > { %3786 = vmatmul.msk.f32.gmra.mxu3 %vm581_vm1, %v5709_v41  ;;  %2473 = vmatmul.f32.gmra.mxu1 %v5712_v37  ;;  %v5734_v56 = vsel %vm2282_vm4, %v2303_v58, %v2304_v59  ;;  %v5754_v26 = vsel %vm2282_vm4, %v2304_v59, %v2309_v33  ;;  %v2230_v58 = vld [vmem:[%s4047_s20 + $0x90] sm:$0xf0]  ;;  %v3926_v59 = vld [vmem:[%s4047_s20 + $0xa8] sm:$0xff]  ;;  %v2232_v33 = vld [vmem:[%s4047_s20 + $0xb0] sm:$0xf] }
 0x230   : > { %v2138_v46 = vpop.f32.mrf.mxu2 }
 0x231   : > { %v2139_v39 = vadd.f32 %v2138_v46, %v2073_v29 }
 0x232   : > { %v2017_v51 = vpop.f32.mrf.mxu3 }
 0x233   : > { %v2018_v17 = vadd.f32 %v2017_v51, %v1952_v57  ;;  %v2076_v6 = vpop.f32.mrf.mxu0  ;;  %v5742_v15 = vadd.f32 %v2139_v39, %v5322_v36  ;;  %v5751_v36 = vsel %vm2282_vm4, %v2307_v47, %v2311_v18  ;;  %v2316_v47 = vrot.slane %v2231_v0, 4 }
 0x234   : > { %v1955_v48 = vpop.f32.mrf.mxu1  ;;  %v2317_v51 = vrot.slane %v3926_v59, 4  ;;  %v2234_v59 = vld [vmem:[%s4047_s20 + $0xc0] sm:$0xf0] }
 0x235   : > { %v5737_v16 = vadd.f32 %v2018_v17, %v5314_v19  ;;  %3800 = vmatmul.msk.f32.gmra.mxu2 %vm581_vm1, %v5667_v4  ;;  %2597 = vmatmul.f32.gmra.mxu0 %v5670_v30  ;;  %v2313_v17 = vrot.slane %v2230_v58, 4 }
 0x236   : > { %v5773_v39 = vsel %vm2282_vm4, %v2316_v47, %v2317_v51  ;;  %v2235_v47 = vld [vmem:[%s4047_s20 + $0xc8] sm:$0xf0] }
 0x237   : > { %3787 = vmatmul.msk.f32.gmra.mxu3 %vm581_vm1, %v5731_v62  ;;  %2476 = vmatmul.f32.gmra.mxu1 %v5734_v56 }
 0x238   : > { %v2141_v55 = vpop.f32.mrf.mxu2 }
 0x239   : > { %v2142_v45 = vadd.f32 %v2141_v55, %v2076_v6 }
 0x23a   : > { %v2020_v19 = vpop.f32.mrf.mxu3 }
 0x23b   : > { %v2021_v57 = vadd.f32 %v2020_v19, %v1955_v48  ;;  %v2079_v4 = vpop.f32.mrf.mxu0  ;;  %v5762_v30 = vadd.f32 %v2142_v45, %v5348_v60 }
 0x23c   : > { %v1958_v1 = vpop.f32.mrf.mxu1 }
 0x23d   : > { %v5757_v29 = vadd.f32 %v2021_v57, %v5340_v14  ;;  %v2314_v14 = vrot.slane %v5358_v43, 4  ;;  %3801 = vmatmul.msk.f32.gmra.mxu2 %vm581_vm1, %v5689_v20  ;;  %2600 = vmatmul.f32.gmra.mxu0 %v5692_v12  ;;  %v2233_v43 = vld [vmem:[%s4047_s20 + $0xb8] sm:$0xf]  ;;  %v2319_v57 = vrot.slane %v2232_v33, 4 }
 0x23e   : > { %v2321_v12 = vrot.slane %v2233_v43, 4 }
 0x23f   : > { %3788 = vmatmul.msk.f32.gmra.mxu3 %vm581_vm1, %v5751_v36  ;;  %2479 = vmatmul.f32.gmra.mxu1 %v5754_v26  ;;  %v5776_v5 = vsel %vm2282_vm4, %v2313_v17, %v2314_v14  ;;  %v5796_v0 = vsel %vm2282_vm4, %v2314_v14, %v2319_v57  ;;  %v3927_v17 = vld [vmem:[%s4047_s20 + $0xd8] sm:$0xff] }
 0x240   : > { %v2144_v48 = vpop.f32.mrf.mxu2  ;;  %v2327_v14 = vrot.slane %v3927_v17, 4 }
 0x241   : > { %v2145_v18 = vadd.f32 %v2144_v48, %v2079_v4 }
 0x242   : > { %v2023_v60 = vpop.f32.mrf.mxu3 }
 0x243   : > { %v2024_v46 = vadd.f32 %v2023_v60, %v1958_v1  ;;  %v2082_v19 = vpop.f32.mrf.mxu0  ;;  %v5784_v20 = vadd.f32 %v2145_v18, %v5379_v27  ;;  %v5793_v27 = vsel %vm2282_vm4, %v2317_v51, %v2321_v12  ;;  %v2326_v51 = vrot.slane %v2235_v47, 4  ;;  %v2239_v47 = vld [vmem:[%s4047_s20 + $0xf8] sm:$0xf0] }
 0x244   : > { %v1961_v50 = vpop.f32.mrf.mxu1  ;;  %v2323_v60 = vrot.slane %v2234_v59, 4  ;;  %v2238_v59 = vld [vmem:[%s4047_s20 + $0xf0] sm:$0xf0] }
 0x245   : > { %v5779_v6 = vadd.f32 %v2024_v46, %v5371_v35  ;;  %3802 = vmatmul.msk.f32.gmra.mxu2 %vm581_vm1, %v5709_v41  ;;  %2603 = vmatmul.f32.gmra.mxu0 %v5712_v37 }
 0x247   : > { %3789 = vmatmul.msk.f32.gmra.mxu3 %vm581_vm1, %v5773_v39  ;;  %2482 = vmatmul.f32.gmra.mxu1 %v5776_v5 }
 0x248   : > { %v2147_v1 = vpop.f32.mrf.mxu2 }
 0x249   : > { %v2148_v4 = vadd.f32 %v2147_v1, %v2082_v19  ;;  %v2237_v19 = vld [vmem:[%s4047_s20 + $0xe8] sm:$0xf] }
 0x24a   : > { %v2026_v35 = vpop.f32.mrf.mxu3  ;;  %v2331_v57 = vrot.slane %v2237_v19, 4 }
 0x24b   : > { %v2027_v55 = vadd.f32 %v2026_v35, %v1961_v50  ;;  %v2085_v41 = vpop.f32.mrf.mxu0  ;;  %v5804_v37 = vadd.f32 %v2148_v4, %v5405_v61  ;;  %v5815_v50 = vsel %vm2282_vm4, %v2326_v51, %v2327_v14  ;;  %v3928_v51 = vld [vmem:[%s4047_s20 + $0x108] sm:$0xff] }
 0x24c   : > { %v1964_v45 = vpop.f32.mrf.mxu1  ;;  %v2337_v17 = vrot.slane %v3928_v51, 4  ;;  %v2242_v51 = vld [vmem:[%s4047_s20 + $0x120] sm:$0xf0] }
 0x24d   : > { %v5799_v58 = vadd.f32 %v2027_v55, %v5397_v24  ;;  %v2324_v24 = vrot.slane %v5415_v22, 4  ;;  %3803 = vmatmul.msk.f32.gmra.mxu2 %vm581_vm1, %v5731_v62  ;;  %2606 = vmatmul.f32.gmra.mxu0 %v5734_v56  ;;  %v2236_v62 = vld [vmem:[%s4047_s20 + $0xe0] sm:$0xf] }
 0x24e   : > { %v2329_v35 = vrot.slane %v2236_v62, 4  ;;  %v2241_v62 = vld [vmem:[%s4047_s20 + $0x118] sm:$0xf] }
 0x24f   : > { %3790 = vmatmul.msk.f32.gmra.mxu3 %vm581_vm1, %v5793_v27  ;;  %2485 = vmatmul.f32.gmra.mxu1 %v5796_v0  ;;  %v5820_v43 = vsel %vm2282_vm4, %v2323_v60, %v2324_v24  ;;  %v3929_v60 = vld [vmem:[%s4047_s20 + $0x100] sm:$0xff] }
 0x250   : > { %v2150_v48 = vpop.f32.mrf.mxu2 }
 0x251   : > { %v2151_v22 = vadd.f32 %v2150_v48, %v2085_v41 }
 0x252   : > { %v2029_v61 = vpop.f32.mrf.mxu3 }
 0x253   : > { %v2030_v46 = vadd.f32 %v2029_v61, %v1964_v45  ;;  %v2088_v56 = vpop.f32.mrf.mxu0  ;;  %v5828_v12 = vadd.f32 %v2151_v22, %v5439_v63  ;;  %v5839_v63 = vsel %vm2282_vm4, %v2327_v14, %v2331_v57  ;;  %v5844_v45 = vsel %vm2282_vm4, %v2324_v24, %v2329_v35 }
 0x254   : > { %v5817_v18 = vpop.f32.mrf.mxu1  ;;  %v2333_v14 = vrot.slane %v2238_v59, 4  ;;  %v2334_v24 = vrot.slane %v3929_v60, 4 }
 0x255   : > { %v5823_v33 = vadd.f32 %v2030_v46, %v5429_v21  ;;  %3804 = vmatmul.msk.f32.gmra.mxu2 %vm581_vm1, %v5751_v36  ;;  %2609 = vmatmul.f32.gmra.mxu0 %v5754_v26  ;;  %v2336_v26 = vrot.slane %v2239_v47, 4 }
 0x256   : > { %v5867_v22 = vsel %vm2282_vm4, %v2333_v14, %v2334_v24 }
 0x257   : > { %3791 = vmatmul.msk.f32.gmra.mxu3 %vm581_vm1, %v5815_v50  ;;  %2488 = vmatmul.f32.gmra.mxu1 %v5820_v43  ;;  %v5862_v46 = vsel %vm2282_vm4, %v2336_v26, %v2337_v17  ;;  %v2243_v26 = vld [vmem:[%s4047_s20 + $0x128] sm:$0xf0] }
 0x258   : > { %v2153_v55 = vpop.f32.mrf.mxu2 }
 0x259   : > { %v2154_v4 = vadd.f32 %v2153_v55, %v2088_v56  ;;  %v2240_v56 = vld [vmem:[%s4047_s20 + $0x110] sm:$0xf] }
 0x25a   : > { %v5836_v21 = vpop.f32.mrf.mxu3  ;;  %v2339_v35 = vrot.slane %v2240_v56, 4 }
 0x25b   : > { %v2091_v41 = vpop.f32.mrf.mxu0  ;;  %v5849_v36 = vadd.f32 %v2154_v4, %v5468_v49 }
 0x25c   : > { %v5841_v1 = vpop.f32.mrf.mxu1  ;;  %v5886_v59 = vsel %vm2282_vm4, %v2334_v24, %v2339_v35  ;;  %v2343_v24 = vrot.slane %v2242_v51, 4 }
 0x25d   : > { %3805 = vmatmul.msk.f32.gmra.mxu2 %vm581_vm1, %v5773_v39  ;;  %2612 = vmatmul.f32.gmra.mxu0 %v5776_v5  ;;  %v2341_v5 = vrot.slane %v2241_v62, 4 }
 0x25f   : > { %3792 = vmatmul.msk.f32.gmra.mxu3 %vm581_vm1, %v5839_v63  ;;  %2491 = vmatmul.f32.gmra.mxu1 %v5844_v45 }
 0x260   : > { %v2156_v61 = vpop.f32.mrf.mxu2 }
 0x261   : > { %v2157_v19 = vadd.f32 %v2156_v61, %v2091_v41  ;;  %v3931_v61 = vld [vmem:[%s4047_s20 + $0x130] sm:$0xff] }
 0x262   : > { %v5859_v49 = vpop.f32.mrf.mxu3 }
 0x263   : > { %v2094_v57 = vpop.f32.mrf.mxu0  ;;  %v5872_v39 = vadd.f32 %v2157_v19, %v5496_v54  ;;  %v5883_v54 = vsel %vm2282_vm4, %v2337_v17, %v2341_v5  ;;  %v3930_v17 = vld [vmem:[%s4047_s20 + $0x138] sm:$0xff]  ;;  %v2344_v19 = vrot.slane %v3931_v61, 4 }
 0x264   : > { %v5864_v48 = vpop.f32.mrf.mxu1  ;;  %v2347_v60 = vrot.slane %v3930_v17, 4 }
 0x265   : > { %3806 = vmatmul.msk.f32.gmra.mxu2 %vm581_vm1, %v5793_v27  ;;  %2615 = vmatmul.f32.gmra.mxu0 %v5796_v0  ;;  %v2346_v0 = vrot.slane %v2243_v26, 4  ;;  %v2345_v35 = vsel %vm2282_vm4, %v2343_v24, %v2344_v19  ;;  %v2244_v26 = vld [vmem:[%s4047_s20 + $0x140] sm:$0xf] }
 0x267   : > { %3793 = vmatmul.msk.f32.gmra.mxu3 %vm581_vm1, %v5862_v46  ;;  %2494 = vmatmul.f32.gmra.mxu1 %v5867_v22 }
 0x268   : > { %v2159_v4 = vpop.f32.mrf.mxu2 }
 0x269   : > { %v2160_v41 = vadd.f32 %v2159_v4, %v2094_v57  ;;  %v2348_v57 = vsel %vm2282_vm4, %v2346_v0, %v2347_v60 }
 0x26a   : > { %v5880_v55 = vpop.f32.mrf.mxu3 }
 0x26b   : > { %v5890_v14 = vpop.f32.mrf.mxu0  ;;  %v5893_v27 = vadd.f32 %v2160_v41, %v5522_v38  ;;  %v2245_v41 = vld [vmem:[%s4047_s20 + $0x148] sm:$0xf] }
 0x26c   : > { %v1976_v47 = vpop.f32.mrf.mxu1 }
 0x26d   : > { %3807 = vmatmul.msk.f32.gmra.mxu2 %vm581_vm1, %v5815_v50  ;;  %2618 = vmatmul.f32.gmra.mxu0 %v5820_v43  ;;  %v2351_v50 = vrot.slane %v2245_v41, 4  ;;  %v2349_v43 = vrot.slane %v2244_v26, 4  ;;  %v2246_v41 = vld [vmem:[%s4047_s20 + $0x150] sm:$0xf0] }
 0x26f   : > { %3794 = vmatmul.msk.f32.gmra.mxu3 %vm581_vm1, %v5883_v54  ;;  %2497 = vmatmul.f32.gmra.mxu1 %v5886_v59  ;;  %v2352_v17 = vsel %vm2282_vm4, %v2347_v60, %v2351_v50  ;;  %v2350_v61 = vsel %vm2282_vm4, %v2344_v19, %v2349_v43  ;;  %v3933_v60 = vld [vmem:[%s4047_s20 + $0x160] sm:$0xff] }
 0x270   : > { %v5903_v56 = vpop.f32.mrf.mxu2  ;;  %v2354_v50 = vrot.slane %v3933_v60, 4 }
 0x272   : > { %v2041_v38 = vpop.f32.mrf.mxu3 }
 0x273   : > { %v2042_v62 = vadd.f32 %v2041_v38, %v1976_v47  ;;  %v5912_v51 = vpop.f32.mrf.mxu0 }
 0x274   : > { %v1979_v5 = vpop.f32.mrf.mxu1 }
 0x275   : > { %v5908_v4 = vadd.f32 %v2042_v62, %v5545_v40  ;;  %3808 = vmatmul.msk.f32.gmra.mxu2 %vm581_vm1, %v5839_v63  ;;  %2621 = vmatmul.f32.gmra.mxu0 %v5844_v45  ;;  %v2247_v62 = vld [vmem:[%s4047_s20 + $0x158] sm:$0xf0]  ;;  %v3932_v45 = vld [vmem:[%s4047_s20 + $0x168] sm:$0xff] }
 0x276   : > { %v2356_v63 = vrot.slane %v2247_v62, 4 }
 0x277   : > { %3795 = vmatmul.msk.f32.gmra.mxu3 %vm581_vm1, %v2348_v57  ;;  %2500 = vmatmul.f32.gmra.mxu1 %v2345_v35 }
 0x278   : > { %v5918_v0 = vpop.f32.mrf.mxu2 }
 0x27a   : > { %v2044_v47 = vpop.f32.mrf.mxu3 }
 0x27b   : > { %v2045_v40 = vadd.f32 %v2044_v47, %v1979_v5  ;;  %v5927_v26 = vpop.f32.mrf.mxu0  ;;  %v2357_v5 = vrot.slane %v3932_v45, 4  ;;  %v2353_v47 = vrot.slane %v2246_v41, 4  ;;  %v2249_v41 = vld [vmem:[%s4047_s20 + $0x178] sm:$0xf]  ;;  %v2248_v45 = vld [vmem:[%s4047_s20 + $0x170] sm:$0xf] }
 0x27c   : > { %v1982_v24 = vpop.f32.mrf.mxu1  ;;  %6363 = vst [vmem:[#allocation10_spill] sm:$0xff] %v5927_v26 }
 0x27d   : > { %v5923_v38 = vadd.f32 %v2045_v40, %v5580_v44  ;;  %3809 = vmatmul.msk.f32.gmra.mxu2 %vm581_vm1, %v5862_v46  ;;  %2624 = vmatmul.f32.gmra.mxu0 %v5867_v22  ;;  %v2358_v40 = vsel %vm2282_vm4, %v2356_v63, %v2357_v5  ;;  %v2355_v62 = vsel %vm2282_vm4, %v2353_v47, %v2354_v50  ;;  %v2361_v46 = vrot.slane %v2249_v41, 4 }
 0x27e   : > { %v2359_v22 = vrot.slane %v2248_v45, 4 }
 0x27f   : > { %6362 = vst [vmem:[#allocation7_spill] sm:$0xff] %v5923_v38  ;;  %3796 = vmatmul.msk.f32.gmra.mxu3 %vm581_vm1, %v2352_v17  ;;  %2503 = vmatmul.f32.gmra.mxu1 %v2350_v61  ;;  %v2362_v47 = vsel %vm2282_vm4, %v2357_v5, %v2361_v46 }
 0x280   : > { %v5935_v43 = vpop.f32.mrf.mxu2 }
 0x281   : > { %6364 = vst [vmem:[#allocation9_spill] sm:$0xff] %v5935_v43 }
 0x282   : > { %v2047_v44 = vpop.f32.mrf.mxu3 }
 0x283   : > { %v2048_v19 = vadd.f32 %v2047_v44, %v1982_v24  ;;  %v2106_v60 = vpop.f32.mrf.mxu0 }
 0x284   : > { %v1985_v32 = vpop.f32.mrf.mxu1 }
 0x285   : > { %v5940_v26 = vadd.f32 %v2048_v19, %v5605_v2  ;;  %3810 = vmatmul.msk.f32.gmra.mxu2 %vm581_vm1, %v5883_v54  ;;  %2627 = vmatmul.f32.gmra.mxu0 %v5886_v59  ;;  %v2360_v19 = vsel %vm2282_vm4, %v2354_v50, %v2359_v22  ;;  %v2740_v22 = vld [vmem:[%s6329_s2] sm:$0x3] }
 0x287   : > { %6365 = vst [vmem:[#allocation11_spill] sm:$0xff] %v5940_v26  ;;  %3797 = vmatmul.msk.f32.gmra.mxu3 %vm581_vm1, %v2358_v40  ;;  %2506 = vmatmul.f32.gmra.mxu1 %v2355_v62 }
 0x288   : > { %v2171_v44 = vpop.f32.mrf.mxu2 }
 0x289   : > { %v2172_v43 = vadd.f32 %v2171_v44, %v2106_v60 }
 0x28a   : > { %v2050_v24 = vpop.f32.mrf.mxu3 }
 0x28b   : > { %v2051_v63 = vadd.f32 %v2050_v24, %v1985_v32  ;;  %v2109_v38 = vpop.f32.mrf.mxu0  ;;  %v5954_v41 = vadd.f32 %v2172_v43, %v5633_v31 }
 0x28c   : > { %v1988_v2 = vpop.f32.mrf.mxu1 }
 0x28d   : > { %v5951_v26 = vadd.f32 %v2051_v63, %v5628_v9  ;;  %3811 = vmatmul.msk.f32.gmra.mxu2 %vm581_vm1, %v2348_v57  ;;  %2630 = vmatmul.f32.gmra.mxu0 %v2345_v35 }
 0x28f   : > { %3798 = vmatmul.msk.f32.gmra.mxu3 %vm581_vm1, %v2362_v47  ;;  %2509 = vmatmul.f32.gmra.mxu1 %v2360_v19 }
 0x290   : > { %v2174_v59 = vpop.f32.mrf.mxu2 }
 0x291   : > { %v2175_v9 = vadd.f32 %v2174_v59, %v2109_v38 }
 0x292   : > { %v2053_v32 = vpop.f32.mrf.mxu3 }
 0x293   : > { %v2054_v54 = vadd.f32 %v2053_v32, %v1988_v2  ;;  %v2112_v45 = vpop.f32.mrf.mxu0  ;;  %v5962_v60 = vadd.f32 %v2175_v9, %v5658_v3  ;;  %v5972_v3 = vperm.slane %v2740_v22, 0 }
 0x294   : > { %v2465_v5 = vpop.f32.mrf.mxu1 }
 0x295   : > { %v5959_v50 = vadd.f32 %v2054_v54, %v5653_v10  ;;  %3812 = vmatmul.msk.f32.gmra.mxu2 %vm581_vm1, %v2352_v17  ;;  %2633 = vmatmul.f32.gmra.mxu0 %v2350_v61 }
 0x298   : > { %v2177_v46 = vpop.f32.mrf.mxu2 }
 0x299   : > { %v2178_v10 = vadd.f32 %v2177_v46, %v2112_v45 }
 0x29a   : > { %v2530_v31 = vpop.f32.mrf.mxu3 }
 0x29b   : > { %v2531_v43 = vadd.f32 %v2530_v31, %v2465_v5  ;;  %v2115_v24 = vpop.f32.mrf.mxu0  ;;  %v5970_v38 = vadd.f32 %v2178_v10, %v5678_v53 }
 0x29c   : > { %v2468_v57 = vpop.f32.mrf.mxu1 }
 0x29d   : > { %v2708_v35 = vadd.f32 %v2531_v43, %v5673_v11  ;;  %3813 = vmatmul.msk.f32.gmra.mxu2 %vm581_vm1, %v2358_v40  ;;  %2636 = vmatmul.f32.gmra.mxu0 %v2355_v62 }
 0x29f   : > { %v2746_v63 = vadd.f32 %v5972_v3, %v2708_v35  ;;  %v3979_v35 = vmov 16.0  }
 0x2a0   : > { %v2180_v44 = vpop.f32.mrf.mxu2 }
 0x2a1   : > { %v2181_v32 = vadd.f32 %v2180_v44, %v2115_v24  ;;  %3841 = vtanh.f32 %v2746_v63 }
 0x2a2   : > { %v2533_v17 = vpop.f32.mrf.mxu3 }
 0x2a3   : > { %v2534_v61 = vadd.f32 %v2533_v17, %v2468_v57  ;;  %v2118_v54 = vpop.f32.mrf.mxu0  ;;  %v5979_v53 = vadd.f32 %v2181_v32, %v5700_v34 }
 0x2a4   : > { %v2471_v11 = vpop.f32.mrf.mxu1 }
 0x2a5   : > { %v2710_v2 = vadd.f32 %v2534_v61, %v5695_v13  ;;  %3814 = vmatmul.msk.f32.gmra.mxu2 %vm581_vm1, %v2362_v47  ;;  %2639 = vmatmul.f32.gmra.mxu0 %v2360_v19 }
 0x2a7   : > { %v2748_v59 = vadd.f32 %v5972_v3, %v2710_v2  ;;  %v3842_v13 = vpop.eup %3841 }
 0x2a8   : > { %v2183_v5 = vpop.f32.mrf.mxu2 }
 0x2a9   : > { %3843 = vtanh.f32 %v2748_v59  ;;  %v2184_v31 = vadd.f32 %v2183_v5, %v2118_v54  ;;  %v5990_v54 = vperm.slane %v2740_v22, 1 }
 0x2aa   : > { %v2536_v40 = vpop.f32.mrf.mxu3  ;;  %3845 = vrcp.f32 %v3979_v35 }
 0x2ab   : > { %v2537_v62 = vadd.f32 %v2536_v40, %v2471_v11  ;;  %v2595_v43 = vpop.f32.mrf.mxu0  ;;  %v5984_v57 = vadd.f32 %v2184_v31, %v5720_v42 }
 0x2ac   : > { %v2474_v9 = vpop.f32.mrf.mxu1 }
 0x2ad   : > { %v2712_v45 = vadd.f32 %v2537_v62, %v5715_v25 }
 0x2af   : > { %v3844_v46 = vpop.eup %3843  ;;  %v2750_v47 = vadd.f32 %v5972_v3, %v2712_v45 }
 0x2b0   : > { %v2810_v34 = vadd.f32 %v3844_v46, %v3842_v13  ;;  %v2660_v19 = vpop.f32.mrf.mxu2  ;;  %v3846_v42 = vpop.eup %3845 }
 0x2b1   : > { %v2661_v63 = vadd.f32 %v2660_v19, %v2595_v43  ;;  %3847 = vtanh.f32 %v2750_v47  ;;  %v2923_v40 = vmul.f32 16.0, %v3846_v42  ;;  %vm2927_vm5 = vweird.f32 %v3846_v42 }
 0x2b2   : > { %v2539_v10 = vpop.f32.mrf.mxu3  ;;  %v2811_v25 = vrot.slane %v2810_v34, 4 }
 0x2b3   : > { %v2540_v24 = vadd.f32 %v2539_v10, %v2474_v9  ;;  %v2598_v44 = vpop.f32.mrf.mxu0  ;;  %v2709_v2 = vadd.f32 %v2661_v63, %v5742_v15  ;;  %v3070_v15 = vld [vmem:[#allocation2 + $0x3e8] sm:$0xff]  ;;  %v2924_v10 = vsub.f32 1.0, %v2923_v40 }
 0x2b4   : > { %v2477_v17 = vpop.f32.mrf.mxu1  ;;  %v2812_v32 = vadd.f32 %v2811_v25, %v2810_v34  ;;  %3182 = vmatpush.msrb.mxu2 %v3070_v15 }
 0x2b5   : > { %v2714_v61 = vadd.f32 %v2540_v24, %v5737_v16  ;;  %v2747_v43 = vadd.f32 %v5990_v54, %v2709_v2 }
 0x2b6   : > { %v2813_v13 = vrot.slane %v2812_v32, 2 }
 0x2b7   : > { %v2752_v11 = vadd.f32 %v5972_v3, %v2714_v61  ;;  %v3848_v31 = vpop.eup %3847 }
 0x2b8   : > { %v2663_v5 = vpop.f32.mrf.mxu2  ;;  %v2814_v47 = vadd.f32 %v2813_v13, %v2812_v32 }
 0x2b9   : > { %3849 = vtanh.f32 %v2752_v11  ;;  %v2664_v45 = vadd.f32 %v2663_v5, %v2598_v44 }
 0x2ba   : > { %v2542_v59 = vpop.f32.mrf.mxu3  ;;  %3851 = vtanh.f32 %v2747_v43  ;;  %v3006_v43 = vld [vmem:[#allocation2 + $0x1e8] sm:$0xff] }
 0x2bb   : > { %v2543_v62 = vadd.f32 %v2542_v59, %v2477_v17  ;;  %v2601_v46 = vpop.f32.mrf.mxu0  ;;  %v2711_v34 = vadd.f32 %v2664_v45, %v5762_v30  ;;  %v2815_v30 = vrot.slane %v2814_v47, 1  ;;  %3162 = vmatpush.msrb.mxu0 %v3006_v43 }
 0x2bc   : > { %v2480_v9 = vpop.f32.mrf.mxu1 }
 0x2bd   : > { %v2716_v16 = vadd.f32 %v2543_v62, %v5757_v29  ;;  %v2749_v24 = vadd.f32 %v5990_v54, %v2711_v34  ;;  %v2925_v29 = vmul.f32 %v3846_v42, %v2924_v10 }
 0x2bf   : > { %v3850_v35 = vpop.eup %3849  ;;  %3853 = vtanh.f32 %v2749_v24  ;;  %v2754_v25 = vadd.f32 %v5972_v3, %v2716_v16  ;;  %v2926_v5 = vadd.f32 %v3846_v42, %v2925_v29  ;;  %v3065_v29 = vld [vmem:[#allocation2 + $0x3c0] sm:$0xff] }
 0x2c0   : > { %v2824_v22 = vadd.f32 %v3850_v35, %v3848_v31  ;;  %v2666_v44 = vpop.f32.mrf.mxu2  ;;  %v3852_v31 = vpop.eup %3851 }
 0x2c1   : > { %v2667_v59 = vadd.f32 %v2666_v44, %v2601_v46  ;;  %3855 = vtanh.f32 %v2754_v25  ;;  %v6000_v10 = vsel %vm2927_vm5, %v3846_v42, %v2926_v5  ;;  %v3002_v25 = vld [vmem:[#allocation2 + $0x1c8] sm:$0xff]  ;;  %v3001_v44 = vld [vmem:[#allocation2 + $0x1c0] sm:$0xff] }
 0x2c2   : > { %v2825_v19 = vrot.slane %v2824_v22, 4  ;;  %v2545_v17 = vpop.f32.mrf.mxu3  ;;  %3163 = vmatpush.msrb.mxu0 %v3002_v25 }
 0x2c3   : > { %v2546_v61 = vadd.f32 %v2545_v17, %v2480_v9  ;;  %v2604_v62 = vpop.f32.mrf.mxu0  ;;  %v2713_v45 = vadd.f32 %v2667_v59, %v5784_v20  ;;  %v3069_v9 = vld [vmem:[#allocation2 + $0x3e0] sm:$0xff]  ;;  %v3066_v17 = vld [vmem:[#allocation2 + $0x3c8] sm:$0xff] }
 0x2c4   : > { %v2826_v63 = vadd.f32 %v2825_v19, %v2824_v22  ;;  %v2483_v11 = vpop.f32.mrf.mxu1  ;;  %3142 = vmatpush.msrb.mxu3 %v3069_v9  ;;  %v3005_v19 = vld [vmem:[#allocation2 + $0x1e0] sm:$0xff]  ;;  %3183 = vmatpush.msrb.mxu2 %v3066_v17 }
 0x2c5   : > { %v2718_v2 = vadd.f32 %v2546_v61, %v5779_v6  ;;  %v3854_v16 = vpop.eup %3853  ;;  %v2816_v6 = vadd.f32 %v2815_v30, %v2814_v47  ;;  %3122 = vmatpush.msrb.mxu1 %v3005_v19  ;;  %v3062_v47 = vld [vmem:[#allocation2 + $0x3a8] sm:$0xff]  ;;  %v2751_v59 = vadd.f32 %v5990_v54, %v2713_v45 }
 0x2c6   : > { %v2827_v40 = vrot.slane %v2826_v63, 2  ;;  %v2817_v15 = vadd.f32 %v3854_v16, %v3852_v31  ;;  %3143 = vmatpush.msrb.mxu3 %v3065_v29  ;;  %3184 = vmatpush.msrb.mxu2 %v3062_v47 }
 0x2c7   : > { %v2756_v32 = vadd.f32 %v5972_v3, %v2718_v2  ;;  %v3856_v2 = vpop.eup %3855  ;;  %v2929_v42 = vmul.f32 %v6000_v10, %v2816_v6  ;;  %3123 = vmatpush.msrb.mxu1 %v3001_v44 }
 0x2c8   : > { %v2828_v13 = vadd.f32 %v2827_v40, %v2826_v63  ;;  %v2669_v24 = vpop.f32.mrf.mxu2  ;;  %v2818_v5 = vrot.slane %v2817_v15, 4 }
 0x2c9   : > { %3857 = vtanh.f32 %v2756_v32  ;;  %v2670_v63 = vadd.f32 %v2669_v24, %v2604_v62 }
 0x2ca   : > { %v2829_v46 = vrot.slane %v2828_v13, 1  ;;  %v2548_v35 = vpop.f32.mrf.mxu3  ;;  %3859 = vtanh.f32 %v2751_v59  ;;  %v2819_v43 = vadd.f32 %v2818_v5, %v2817_v15  ;;  %v3061_v15 = vld [vmem:[#allocation2 + $0x3a0] sm:$0xff] }
 0x2cb   : > { %v2549_v34 = vadd.f32 %v2548_v35, %v2483_v11  ;;  %v2607_v30 = vpop.f32.mrf.mxu0  ;;  %3144 = vmatpush.msrb.mxu3 %v3061_v15  ;;  %v2997_v5 = vld [vmem:[#allocation2 + $0x1a0] sm:$0xff] }
 0x2cc   : > { %v2830_v22 = vadd.f32 %v2829_v46, %v2828_v13  ;;  %v2486_v20 = vpop.f32.mrf.mxu1  ;;  %v2820_v19 = vrot.slane %v2819_v43, 2  ;;  %3124 = vmatpush.msrb.mxu1 %v2997_v5 }
 0x2cd   : > { %v2720_v61 = vadd.f32 %v2549_v34, %v5799_v58  ;;  %v2715_v58 = vadd.f32 %v2670_v63, %v5804_v37 }
 0x2ce   : > { %v2931_v11 = vmul.f32 %v6000_v10, %v2830_v22 }
 0x2cf   : > { %v3858_v40 = vpop.eup %3857  ;;  %v2753_v31 = vadd.f32 %v5990_v54, %v2715_v58  ;;  %v2758_v6 = vadd.f32 %v5972_v3, %v2720_v61  ;;  %v2033_v61 = vadd.f32 %v5836_v21, %v5817_v18  ;;  %v3058_v58 = vld [vmem:[#allocation2 + $0x388] sm:$0xff]  ;;  %v2993_v21 = vld [vmem:[#allocation2 + $0x180] sm:$0xff] }
 0x2d0   : > { %v2838_v62 = vadd.f32 %v3858_v40, %v3856_v2  ;;  %v6008_v32 = vsel %vm3099_vm6, %v2931_v11, %v2929_v42  ;;  %v2672_v46 = vpop.f32.mrf.mxu2  ;;  %v3860_v63 = vpop.eup %3859  ;;  %v2821_v42 = vadd.f32 %v2820_v19, %v2819_v43  ;;  %3185 = vmatpush.msrb.mxu2 %v3058_v58  ;;  %v2994_v18 = vld [vmem:[#allocation2 + $0x188] sm:$0xff]  ;;  %3125 = vmatpush.msrb.mxu1 %v2993_v21 }
 0x2d1   : > { %3861 = vtanh.f32 %v2753_v31  ;;  %v2673_v34 = vadd.f32 %v2672_v46, %v2607_v30  ;;  %v2202_v31 = vadd.f32 %v2033_v61, %v5460_v28  ;;  %v2036_v28 = vadd.f32 %v5859_v49, %v5841_v1  ;;  %v2989_v1 = vld [vmem:[#allocation2 + $0x160] sm:$0xff] }
 0x2d2   : > { %v2839_v13 = vrot.slane %v2838_v62, 4  ;;  %v2551_v9 = vpop.f32.mrf.mxu3  ;;  %3863 = vtanh.f32 %v2758_v6  ;;  %3126 = vmatpush.msrb.mxu1 %v2989_v1  ;;  %v2970_v1 = vld [vmem:[#allocation2 + $0xc8] sm:$0xff] }
 0x2d3   : > { %v2552_v45 = vadd.f32 %v2551_v9, %v2486_v20  ;;  %v2610_v24 = vpop.f32.mrf.mxu0  ;;  %v2717_v29 = vadd.f32 %v2673_v34, %v5828_v12  ;;  %v2998_v20 = vld [vmem:[#allocation2 + $0x1a8] sm:$0xff]  ;;  %v2204_v49 = vadd.f32 %v2036_v28, %v5488_v52 }
 0x2d4   : > { %v2840_v16 = vadd.f32 %v2839_v13, %v2838_v62  ;;  %v2489_v35 = vpop.f32.mrf.mxu1  ;;  %3164 = vmatpush.msrb.mxu0 %v2998_v20  ;;  %v3057_v62 = vld [vmem:[#allocation2 + $0x380] sm:$0xff]  ;;  %v3054_v9 = vld [vmem:[#allocation2 + $0x368] sm:$0xff] }
 0x2d5   : > { %v2722_v37 = vadd.f32 %v2552_v45, %v5823_v33  ;;  %v2755_v6 = vadd.f32 %v5990_v54, %v2717_v29  ;;  %3145 = vmatpush.msrb.mxu3 %v3057_v62  ;;  %3186 = vmatpush.msrb.mxu2 %v3054_v9  ;;  %v2990_v20 = vld [vmem:[#allocation2 + $0x168] sm:$0xff]  ;;  %v3053_v62 = vld [vmem:[#allocation2 + $0x360] sm:$0xff] }
 0x2d6   : > { %v2841_v22 = vrot.slane %v2840_v16, 2  ;;  %3165 = vmatpush.msrb.mxu0 %v2994_v18 }
 0x2d7   : > { %v2760_v17 = vadd.f32 %v5972_v3, %v2722_v37  ;;  %v3862_v44 = vpop.eup %3861  ;;  %v2822_v37 = vrot.slane %v2821_v42, 1  ;;  %3146 = vmatpush.msrb.mxu3 %v3053_v62 }
 0x2d8   : > { %v2842_v25 = vadd.f32 %v2841_v22, %v2840_v16  ;;  %v2831_v47 = vadd.f32 %v3862_v44, %v3860_v63  ;;  %v2675_v12 = vpop.f32.mrf.mxu2  ;;  %v3864_v45 = vpop.eup %3863  ;;  %3166 = vmatpush.msrb.mxu0 %v2990_v20  ;;  %v2969_v20 = vld [vmem:[#allocation2 + $0xc0] sm:$0xff] }
 0x2d9   : > { %3865 = vtanh.f32 %v2760_v17  ;;  %v2676_v13 = vadd.f32 %v2675_v12, %v2610_v24  ;;  %v2823_v44 = vadd.f32 %v2822_v37, %v2821_v42  ;;  %v3050_v37 = vld [vmem:[#allocation2 + $0x348] sm:$0xff] }
 0x2da   : > { %v2843_v33 = vrot.slane %v2842_v25, 1  ;;  %v2554_v2 = vpop.f32.mrf.mxu3  ;;  %v2832_v59 = vrot.slane %v2831_v47, 4  ;;  %3867 = vtanh.f32 %v2755_v6  ;;  %3187 = vmatpush.msrb.mxu2 %v3050_v37 }
 0x2db   : > { %v2555_v30 = vadd.f32 %v2554_v2, %v2489_v35  ;;  %v2613_v46 = vpop.f32.mrf.mxu0  ;;  %v2719_v34 = vadd.f32 %v2676_v13, %v5849_v36  ;;  %v2930_v21 = vmul.f32 %v6000_v10, %v2823_v44 }
 0x2dc   : > { %v2844_v11 = vadd.f32 %v2843_v33, %v2842_v25  ;;  %v2492_v40 = vpop.f32.mrf.mxu1  ;;  %v2833_v16 = vadd.f32 %v2832_v59, %v2831_v47  ;;  %v2985_v59 = vld [vmem:[#allocation2 + $0x140] sm:$0xff] }
 0x2dd   : > { %v2724_v19 = vadd.f32 %v2555_v30, %v2202_v31  ;;  %v2757_v29 = vadd.f32 %v5990_v54, %v2719_v34  ;;  %3127 = vmatpush.msrb.mxu1 %v2985_v59  ;;  %v2981_v31 = vld [vmem:[#allocation2 + $0x120] sm:$0xff] }
 0x2de   : > { %v2933_v43 = vmul.f32 %v6000_v10, %v2844_v11  ;;  %v2834_v22 = vrot.slane %v2833_v16, 2  ;;  %v2986_v11 = vld [vmem:[#allocation2 + $0x148] sm:$0xff]  ;;  %v3049_v34 = vld [vmem:[#allocation2 + $0x340] sm:$0xff] }
 0x2df   : > { %v3866_v35 = vpop.eup %3865  ;;  %3869 = vtanh.f32 %v2757_v29  ;;  %3167 = vmatpush.msrb.mxu0 %v2986_v11  ;;  %3128 = vmatpush.msrb.mxu1 %v2981_v31  ;;  %v2974_v29 = vld [vmem:[#allocation2 + $0xe8] sm:$0xff] }
 0x2e0   : > { %v2852_v24 = vadd.f32 %v3866_v35, %v3864_v45  ;;  %v6025_v17 = vsel %vm3101_vm7, %v2933_v43, %v6008_v32  ;;  %v2835_v63 = vadd.f32 %v2834_v22, %v2833_v16  ;;  %v2762_v32 = vadd.f32 %v5972_v3, %v2724_v19  ;;  %v2678_v47 = vpop.f32.mrf.mxu2  ;;  %v3868_v18 = vpop.eup %3867  ;;  %v2978_v43 = vld [vmem:[#allocation2 + $0x108] sm:$0xff]  ;;  %v2977_v16 = vld [vmem:[#allocation2 + $0x100] sm:$0xff]  ;;  %3147 = vmatpush.msrb.mxu3 %v3049_v34 }
 0x2e1   : > { %v2679_v12 = vadd.f32 %v2678_v47, %v2613_v46  ;;  %v2039_v46 = vadd.f32 %v5880_v55, %v5864_v48  ;;  %v3046_v22 = vld [vmem:[#allocation2 + $0x328] sm:$0xff]  ;;  %3129 = vmatpush.msrb.mxu1 %v2977_v16  ;;  %v2973_v19 = vld [vmem:[#allocation2 + $0xe0] sm:$0xff] }
 0x2e2   : > { %v2853_v25 = vrot.slane %v2852_v24, 4  ;;  %v2557_v15 = vpop.f32.mrf.mxu3  ;;  %v2836_v61 = vrot.slane %v2835_v63, 1  ;;  %3871 = vtanh.f32 %v2762_v32  ;;  %3188 = vmatpush.msrb.mxu2 %v3046_v22  ;;  %v2965_v47 = vld [vmem:[#allocation2 + $0xa0] sm:$0xff] }
 0x2e3   : > { %v2558_v36 = vadd.f32 %v2557_v15, %v2492_v40  ;;  %v2616_v52 = vpop.f32.mrf.mxu0  ;;  %v2982_v40 = vld [vmem:[#allocation2 + $0x128] sm:$0xff]  ;;  %v2721_v13 = vadd.f32 %v2679_v12, %v5872_v39  ;;  %3130 = vmatpush.msrb.mxu1 %v2973_v19  ;;  %v3045_v19 = vld [vmem:[#allocation2 + $0x320] sm:$0xff] }
 0x2e4   : > { %v2854_v33 = vadd.f32 %v2853_v25, %v2852_v24  ;;  %v2495_v2 = vpop.f32.mrf.mxu1  ;;  %v2837_v5 = vadd.f32 %v2836_v61, %v2835_v63  ;;  %3168 = vmatpush.msrb.mxu0 %v2982_v40  ;;  %3148 = vmatpush.msrb.mxu3 %v3045_v19 }
 0x2e5   : > { %v2726_v30 = vadd.f32 %v2558_v36, %v2204_v49  ;;  %v3870_v6 = vpop.eup %3869  ;;  %v2206_v49 = vadd.f32 %v2039_v46, %v5514_v23  ;;  %3131 = vmatpush.msrb.mxu1 %v2969_v20  ;;  %v2953_v46 = vld [vmem:[#allocation2 + $0x40] sm:$0xff]  ;;  %v3038_v20 = vld [vmem:[#allocation2 + $0x2e8] sm:$0xff] }
 0x2e6   : > { %v2855_v58 = vrot.slane %v2854_v33, 2  ;;  %v2932_v9 = vmul.f32 %v6000_v10, %v2837_v5  ;;  %3169 = vmatpush.msrb.mxu0 %v2978_v43  ;;  %v2845_v39 = vadd.f32 %v3870_v6, %v3868_v18  ;;  %v2958_v18 = vld [vmem:[#allocation2 + $0x68] sm:$0xff] }
 0x2e7   : > { %v2764_v42 = vadd.f32 %v5972_v3, %v2726_v30  ;;  %3132 = vmatpush.msrb.mxu1 %v2965_v47 }
 0x2e8   : > { %v2856_v45 = vadd.f32 %v2855_v58, %v2854_v33  ;;  %v6037_v24 = vsel %vm3099_vm6, %v2932_v9, %v2930_v21  ;;  %v2846_v25 = vrot.slane %v2845_v39, 4  ;;  %v2681_v48 = vpop.f32.mrf.mxu2  ;;  %3170 = vmatpush.msrb.mxu0 %v2974_v29  ;;  %v3872_v44 = vpop.eup %3871  ;;  %v2759_v33 = vadd.f32 %v5990_v54, %v2721_v13  ;;  %v2961_v58 = vld [vmem:[#allocation2 + $0x80] sm:$0xff] }
 0x2e9   : > { %3873 = vtanh.f32 %v2764_v42  ;;  %v2682_v36 = vadd.f32 %v2681_v48, %v2616_v52  ;;  %v2962_v52 = vld [vmem:[#allocation2 + $0x88] sm:$0xff]  ;;  %3133 = vmatpush.msrb.mxu1 %v2961_v58  ;;  %v2163_v9 = vadd.f32 %v5903_v56, %v5890_v14  ;;  %v2949_v14 = vld [vmem:[#allocation2 + $0x20] sm:$0xff] }
 0x2ea   : > { %v2857_v35 = vrot.slane %v2856_v45, 1  ;;  %v2560_v28 = vpop.f32.mrf.mxu3  ;;  %v2847_v61 = vadd.f32 %v2846_v25, %v2845_v39  ;;  %3171 = vmatpush.msrb.mxu0 %v2970_v1  ;;  %3875 = vtanh.f32 %v2759_v33  ;;  %v2950_v56 = vld [vmem:[#allocation2 + $0x28] sm:$0xff] }
 0x2eb   : > { %v2561_v15 = vadd.f32 %v2560_v28, %v2495_v2  ;;  %v2619_v32 = vpop.f32.mrf.mxu0  ;;  %v2966_v2 = vld [vmem:[#allocation2 + $0xa8] sm:$0xff]  ;;  %v2723_v30 = vadd.f32 %v2682_v36, %v5893_v27  ;;  %v2957_v27 = vld [vmem:[#allocation2 + $0x60] sm:$0xff]  ;;  %v2203_v25 = vadd.f32 %v2163_v9, %v5553_v7 }
 0x2ec   : > { %v2858_v63 = vadd.f32 %v2857_v35, %v2856_v45  ;;  %v2498_v55 = vpop.f32.mrf.mxu1  ;;  %v2848_v12 = vrot.slane %v2847_v61, 2  ;;  %3172 = vmatpush.msrb.mxu0 %v2966_v2  ;;  %3134 = vmatpush.msrb.mxu1 %v2957_v27  ;;  %v2954_v35 = vld [vmem:[#allocation2 + $0x48] sm:$0xff]  ;;  %v2945_v36 = vld [vmem:[#allocation2] sm:$0xff]  ;;  %v3008_v2 = vld [vmem:[#allocation2 + $0x1f8] sm:$0xff] }
 0x2ed   : > { %v2728_v23 = vadd.f32 %v2561_v15, %v2206_v49  ;;  %v2761_v40 = vadd.f32 %v5990_v54, %v2723_v30  ;;  %v2166_v49 = vadd.f32 %v5918_v0, %v5912_v51  ;;  %v3003_v51 = vld [vmem:[#allocation2 + $0x1d0] sm:$0xff]  ;;  %v3004_v0 = vld [vmem:[#allocation2 + $0x1d8] sm:$0xff] }
 0x2ee   : > { %v2935_v11 = vmul.f32 %v6000_v10, %v2858_v63  ;;  %v2849_v31 = vadd.f32 %v2848_v12, %v2847_v61  ;;  %3173 = vmatpush.msrb.mxu0 %v2962_v52  ;;  %3135 = vmatpush.msrb.mxu1 %v2953_v46  ;;  %v3007_v61 = vld [vmem:[#allocation2 + $0x1f0] sm:$0xff] }
 0x2ef   : > { %v3874_v59 = vpop.eup %3873  ;;  %3877 = vtanh.f32 %v2761_v40  ;;  %v2205_v58 = vadd.f32 %v2166_v49, %v5585_v8  ;;  %v2999_v40 = vld [vmem:[#allocation2 + $0x1b0] sm:$0xff] }
 0x2f0   : > { %v2866_v5 = vadd.f32 %v3874_v59, %v3872_v44  ;;  %v6045_v62 = vsel %vm3103_vm8, %v2935_v11, %v6025_v17  ;;  %v2850_v45 = vrot.slane %v2849_v31, 1  ;;  %v2766_v17 = vadd.f32 %v5972_v3, %v2728_v23  ;;  %v2684_v16 = vpop.f32.mrf.mxu2  ;;  %3174 = vmatpush.msrb.mxu0 %v2958_v18  ;;  %v3876_v63 = vpop.eup %3875  ;;  %3136 = vmatpush.msrb.mxu1 %v2949_v14  ;;  %v2946_v44 = vld [vmem:[#allocation2 + $0x8] sm:$0xff]  ;;  %v2987_v14 = vld [vmem:[#allocation2 + $0x150] sm:$0xff] }
 0x2f1   : > { %v2685_v34 = vadd.f32 %v2684_v16, %v2619_v32  ;;  %v6366_v16 = vld [vmem:[#allocation7_spill] sm:$0xff] }
 0x2f2   : > { %v2867_v42 = vrot.slane %v2866_v5, 4  ;;  %v2563_v13 = vpop.f32.mrf.mxu3  ;;  %v2851_v28 = vadd.f32 %v2850_v45, %v2849_v31  ;;  %3175 = vmatpush.msrb.mxu0 %v2954_v35  ;;  %3879 = vtanh.f32 %v2766_v17  ;;  %3137 = vmatpush.msrb.mxu1 %v2945_v36  ;;  %v3000_v31 = vld [vmem:[#allocation2 + $0x1b8] sm:$0xff]  ;;  %v2995_v45 = vld [vmem:[#allocation2 + $0x190] sm:$0xff] }
 0x2f3   : > { %v2564_v21 = vadd.f32 %v2563_v13, %v2498_v55  ;;  %v2622_v22 = vpop.f32.mrf.mxu0  ;;  %v3041_v55 = vld [vmem:[#allocation2 + $0x300] sm:$0xff]  ;;  %v2725_v32 = vadd.f32 %v2685_v34, %v2203_v25  ;;  %v2983_v49 = vld [vmem:[#allocation2 + $0x130] sm:$0xff]  ;;  %v2984_v36 = vld [vmem:[#allocation2 + $0x138] sm:$0xff] }
 0x2f4   : > { %v2868_v43 = vadd.f32 %v2867_v42, %v2866_v5  ;;  %v2501_v6 = vpop.f32.mrf.mxu1  ;;  %v2934_v15 = vmul.f32 %v6000_v10, %v2851_v28  ;;  %3176 = vmatpush.msrb.mxu0 %v2950_v56  ;;  %3149 = vmatpush.msrb.mxu3 %v3041_v55  ;;  %v2992_v28 = vld [vmem:[#allocation2 + $0x178] sm:$0xff]  ;;  %v3037_v55 = vld [vmem:[#allocation2 + $0x2e0] sm:$0xff] }
 0x2f5   : > { %v2730_v39 = vadd.f32 %v2564_v21, %v5908_v4  ;;  %v3042_v4 = vld [vmem:[#allocation2 + $0x308] sm:$0xff]  ;;  %v3878_v1 = vpop.eup %3877  ;;  %3202 = vmatpush.msra.mxu1 %v3007_v61  ;;  %v2763_v13 = vadd.f32 %v5990_v54, %v2725_v32  ;;  %v2988_v56 = vld [vmem:[#allocation2 + $0x158] sm:$0xff] }
 0x2f6   : > { %v2869_v37 = vrot.slane %v2868_v43, 2  ;;  %3189 = vmatpush.msrb.mxu2 %v3042_v4  ;;  %v2859_v33 = vadd.f32 %v3878_v1, %v3876_v63  ;;  %3177 = vmatpush.msrb.mxu0 %v2946_v44  ;;  %v6059_v11 = vsel %vm3101_vm7, %v2934_v15, %v6037_v24  ;;  %v6368_v63 = vld [vmem:[#allocation9_spill] sm:$0xff] }
 0x2f7   : > { %v2768_v29 = vadd.f32 %v5972_v3, %v2730_v39  ;;  %3203 = vmatpush.msra.mxu1 %v3003_v51  ;;  %v2991_v39 = vld [vmem:[#allocation2 + $0x170] sm:$0xff]  ;;  %3150 = vmatpush.msrb.mxu3 %v3037_v55  ;;  %v3030_v51 = vld [vmem:[#allocation2 + $0x2a8] sm:$0xff] }
 0x2f8   : > { %v2870_v48 = vadd.f32 %v2869_v37, %v2868_v43  ;;  %3190 = vmatpush.msrb.mxu2 %v3038_v20  ;;  %v2860_v30 = vrot.slane %v2859_v33, 4  ;;  %v2687_v5 = vpop.f32.mrf.mxu2  ;;  %3242 = vmatpush.msra.mxu0 %v3008_v2  ;;  %v3880_v42 = vpop.eup %3879  ;;  %v2996_v43 = vld [vmem:[#allocation2 + $0x198] sm:$0xff]  ;;  %v6369_v20 = vld [vmem:[#allocation11_spill] sm:$0xff]  ;;  %v3033_v2 = vld [vmem:[#allocation2 + $0x2c0] sm:$0xff] }
 0x2f9   : > { %3881 = vtanh.f32 %v2768_v29  ;;  %v2688_v52 = vadd.f32 %v2687_v5, %v2622_v22  ;;  %3204 = vmatpush.msra.mxu1 %v2999_v40  ;;  %v6367_v29 = vld [vmem:[#allocation10_spill] sm:$0xff]  ;;  %3151 = vmatpush.msrb.mxu3 %v3033_v2  ;;  %v2960_v2 = vld [vmem:[#allocation2 + $0x78] sm:$0xff] }
 0x2fa   : > { %v2871_v7 = vrot.slane %v2870_v48, 1  ;;  %v2566_v47 = vpop.f32.mrf.mxu3  ;;  %v2861_v24 = vadd.f32 %v2860_v30, %v2859_v33  ;;  %3243 = vmatpush.msra.mxu0 %v3004_v0  ;;  %3883 = vtanh.f32 %v2763_v13  ;;  %v2169_v25 = vadd.f32 %v6368_v63, %v6367_v29  ;;  %v2968_v29 = vld [vmem:[#allocation2 + $0xb8] sm:$0xff] }
 0x2fb   : > { %v2567_v12 = vadd.f32 %v2566_v47, %v2501_v6  ;;  %v2625_v27 = vpop.f32.mrf.mxu0  ;;  %v2727_v9 = vadd.f32 %v2688_v52, %v2205_v58  ;;  %3205 = vmatpush.msra.mxu1 %v2995_v45  ;;  %v3034_v47 = vld [vmem:[#allocation2 + $0x2c8] sm:$0xff]  ;;  %v2980_v58 = vld [vmem:[#allocation2 + $0x118] sm:$0xff] }
 0x2fc   : > { %v2872_v59 = vadd.f32 %v2871_v7, %v2870_v48  ;;  %v2504_v23 = vpop.f32.mrf.mxu1  ;;  %v2862_v17 = vrot.slane %v2861_v24, 2  ;;  %3244 = vmatpush.msra.mxu0 %v3000_v31  ;;  %3191 = vmatpush.msrb.mxu2 %v3034_v47  ;;  %v3029_v31 = vld [vmem:[#allocation2 + $0x2a0] sm:$0xff]  ;;  %v3026_v45 = vld [vmem:[#allocation2 + $0x288] sm:$0xff] }
 0x2fd   : > { %v2732_v6 = vadd.f32 %v2567_v12, %v6366_v16  ;;  %v2765_v35 = vadd.f32 %v5990_v54, %v2727_v9  ;;  %3206 = vmatpush.msra.mxu1 %v2991_v39  ;;  %v6370_v12 = vld [vmem:[#allocation8_spill] sm:$0xff]  ;;  %3152 = vmatpush.msrb.mxu3 %v3029_v31 }
 0x2fe   : > { %v2937_v18 = vmul.f32 %v6000_v10, %v2872_v59  ;;  %v2863_v37 = vadd.f32 %v2862_v17, %v2861_v24  ;;  %3245 = vmatpush.msra.mxu0 %v2996_v43  ;;  %v2979_v59 = vld [vmem:[#allocation2 + $0x110] sm:$0xff]  ;;  %v2207_v5 = vadd.f32 %v2169_v25, %v6370_v12  ;;  %3192 = vmatpush.msrb.mxu2 %v3030_v51  ;;  %v3025_v43 = vld [vmem:[#allocation2 + $0x280] sm:$0xff] }
 0x2ff   : > { %v3882_v21 = vpop.eup %3881  ;;  %3885 = vtanh.f32 %v2765_v35  ;;  %v2770_v48 = vadd.f32 %v5972_v3, %v2732_v6  ;;  %3207 = vmatpush.msra.mxu1 %v2987_v14  ;;  %3153 = vmatpush.msrb.mxu3 %v3025_v43  ;;  %v2971_v6 = vld [vmem:[#allocation2 + $0xd0] sm:$0xff]  ;;  %v2972_v35 = vld [vmem:[#allocation2 + $0xd8] sm:$0xff] }
 0x300   : > { %v2880_v8 = vadd.f32 %v3882_v21, %v3880_v42  ;;  %v6067_v46 = vsel %vm3105_vm9, %v2937_v18, %v6045_v62  ;;  %v2864_v62 = vrot.slane %v2863_v37, 1  ;;  %v2690_v4 = vpop.f32.mrf.mxu2  ;;  %3246 = vmatpush.msra.mxu0 %v2992_v28  ;;  %v3884_v30 = vpop.eup %3883  ;;  %v2975_v18 = vld [vmem:[#allocation2 + $0xf0] sm:$0xff]  ;;  %v2976_v21 = vld [vmem:[#allocation2 + $0xf8] sm:$0xff]  ;;  %3193 = vmatpush.msrb.mxu2 %v3026_v45 }
 0x301   : > { %v2691_v7 = vadd.f32 %v2690_v4, %v2625_v27  ;;  %3887 = vtanh.f32 %v2770_v48  ;;  %3208 = vmatpush.msra.mxu1 %v2983_v49  ;;  %v3018_v48 = vld [vmem:[#allocation2 + $0x248] sm:$0xff]  ;;  %v2963_v49 = vld [vmem:[#allocation2 + $0x90] sm:$0xff]  ;;  %v3068_v43 = vld [vmem:[#allocation2 + $0x3d8] sm:$0xff] }
 0x302   : > { %v2881_v34 = vrot.slane %v2880_v8, 4  ;;  %v2569_v22 = vpop.f32.mrf.mxu3  ;;  %v2865_v44 = vadd.f32 %v2864_v62, %v2863_v37  ;;  %3247 = vmatpush.msra.mxu0 %v2988_v56  ;;  %v3022_v37 = vld [vmem:[#allocation2 + $0x268] sm:$0xff]  ;;  %v2967_v56 = vld [vmem:[#allocation2 + $0xb0] sm:$0xff] }
 0x303   : > { %v2570_v19 = vadd.f32 %v2569_v22, %v2504_v23  ;;  %v2628_v32 = vpop.f32.mrf.mxu0  ;;  %v2729_v13 = vadd.f32 %v2691_v7, %v2207_v5  ;;  %3209 = vmatpush.msra.mxu1 %v2979_v59  ;;  %3194 = vmatpush.msrb.mxu2 %v3022_v37  ;;  %v3014_v7 = vld [vmem:[#allocation2 + $0x228] sm:$0xff]  ;;  %v2955_v59 = vld [vmem:[#allocation2 + $0x50] sm:$0xff] }
 0x304   : > { %v2882_v15 = vadd.f32 %v2881_v34, %v2880_v8  ;;  %v2507_v33 = vpop.f32.mrf.mxu1  ;;  %3248 = vmatpush.msra.mxu0 %v2984_v36  ;;  %v2936_v52 = vmul.f32 %v6000_v10, %v2865_v44  ;;  %v3021_v34 = vld [vmem:[#allocation2 + $0x260] sm:$0xff]  ;;  %v2964_v36 = vld [vmem:[#allocation2 + $0x98] sm:$0xff]  ;;  %v3067_v45 = vld [vmem:[#allocation2 + $0x3d0] sm:$0xff] }
 0x305   : > { %v2734_v1 = vadd.f32 %v2570_v19, %v6369_v20  ;;  %v3886_v40 = vpop.eup %3885  ;;  %3210 = vmatpush.msra.mxu1 %v2975_v18  ;;  %v2767_v19 = vadd.f32 %v5990_v54, %v2729_v13  ;;  %3154 = vmatpush.msrb.mxu3 %v3021_v34 }
 0x306   : > { %v2883_v61 = vrot.slane %v2882_v15, 2  ;;  %v2873_v24 = vadd.f32 %v3886_v40, %v3884_v30  ;;  %v6079_v9 = vsel %vm3103_vm8, %v2936_v52, %v6059_v11  ;;  %3249 = vmatpush.msra.mxu0 %v2980_v58  ;;  %3195 = vmatpush.msrb.mxu2 %v3018_v48  ;;  %v2956_v58 = vld [vmem:[#allocation2 + $0x58] sm:$0xff]  ;;  %v3071_v52 = vld [vmem:[#allocation2 + $0x3f0] sm:$0xff] }
 0x307   : > { %v2772_v0 = vadd.f32 %v5972_v3, %v2734_v1  ;;  %v3888_v22 = vpop.eup %3887  ;;  %3211 = vmatpush.msra.mxu1 %v2971_v6  ;;  %v3072_v40 = vld [vmem:[#allocation2 + $0x3f8] sm:$0xff] }
 0x308   : > { %v2884_v23 = vadd.f32 %v2883_v61, %v2882_v15  ;;  %v2874_v17 = vrot.slane %v2873_v24, 4  ;;  %v2693_v16 = vpop.f32.mrf.mxu2  ;;  %3250 = vmatpush.msra.mxu0 %v2976_v21  ;;  %v3017_v15 = vld [vmem:[#allocation2 + $0x240] sm:$0xff]  ;;  %3196 = vmatpush.msrb.mxu2 %v3014_v7  ;;  %v2952_v21 = vld [vmem:[#allocation2 + $0x38] sm:$0xff] }
 0x309   : > { %3889 = vtanh.f32 %v2772_v0  ;;  %v2694_v28 = vadd.f32 %v2693_v16, %v2628_v32  ;;  %3155 = vmatpush.msrb.mxu3 %v3017_v15  ;;  %3212 = vmatpush.msra.mxu1 %v2967_v56  ;;  %v3010_v0 = vld [vmem:[#allocation2 + $0x208] sm:$0xff] }
 0x30a   : > { %v2885_v42 = vrot.slane %v2884_v23, 1  ;;  %v2572_v27 = vpop.f32.mrf.mxu3  ;;  %v2875_v11 = vadd.f32 %v2874_v17, %v2873_v24  ;;  %3251 = vmatpush.msra.mxu0 %v2972_v35  ;;  %3891 = vtanh.f32 %v2767_v19  ;;  %3197 = vmatpush.msrb.mxu2 %v3010_v0  ;;  %v3063_v35 = vld [vmem:[#allocation2 + $0x3b0] sm:$0xff]  ;;  %v3060_v19 = vld [vmem:[#allocation2 + $0x398] sm:$0xff] }
 0x30b   : > { %v2573_v8 = vadd.f32 %v2572_v27, %v2507_v33  ;;  %v2631_v14 = vpop.f32.mrf.mxu0  ;;  %v2731_v62 = vadd.f32 %v2694_v28, %v5954_v41  ;;  %v3013_v41 = vld [vmem:[#allocation2 + $0x220] sm:$0xff]  ;;  %3213 = vmatpush.msra.mxu1 %v2963_v49  ;;  %v3040_v0 = vld [vmem:[#allocation2 + $0x2f8] sm:$0xff] }
 0x30c   : > { %v2886_v39 = vadd.f32 %v2885_v42, %v2884_v23  ;;  %v2876_v4 = vrot.slane %v2875_v11, 2  ;;  %v2510_v1 = vpop.f32.mrf.mxu1  ;;  %3252 = vmatpush.msra.mxu0 %v2968_v29  ;;  %3156 = vmatpush.msrb.mxu3 %v3013_v41  ;;  %v2951_v42 = vld [vmem:[#allocation2 + $0x30] sm:$0xff] }
 0x30d   : > { %v2736_v20 = vadd.f32 %v2573_v8, %v5951_v26  ;;  %v2769_v61 = vadd.f32 %v5990_v54, %v2731_v62  ;;  %v2959_v26 = vld [vmem:[#allocation2 + $0x70] sm:$0xff]  ;;  %3262 = vmatpush.msra.mxu2 %v3072_v40  ;;  %v3056_v62 = vld [vmem:[#allocation2 + $0x378] sm:$0xff] }
 0x30e   : > { %v2939_v63 = vmul.f32 %v6000_v10, %v2886_v39  ;;  %v2877_v33 = vadd.f32 %v2876_v4, %v2875_v11  ;;  %3253 = vmatpush.msra.mxu0 %v2964_v36  ;;  %3214 = vmatpush.msra.mxu1 %v2959_v26  ;;  %v2947_v8 = vld [vmem:[#allocation2 + $0x10] sm:$0xff]  ;;  %v3064_v39 = vld [vmem:[#allocation2 + $0x3b8] sm:$0xff] }
 0x30f   : > { %v3890_v25 = vpop.eup %3889  ;;  %3893 = vtanh.f32 %v2769_v61  ;;  %v2774_v5 = vadd.f32 %v5972_v3, %v2736_v20  ;;  %3263 = vmatpush.msra.mxu2 %v3068_v43  ;;  %v3059_v11 = vld [vmem:[#allocation2 + $0x390] sm:$0xff]  ;;  %v3052_v20 = vld [vmem:[#allocation2 + $0x358] sm:$0xff] }
 0x310   : > { %v2894_v55 = vadd.f32 %v3890_v25, %v3888_v22  ;;  %v6087_v44 = vsel %vm3107_vm10, %v2939_v63, %v6067_v46  ;;  %v3009_v46 = vld [vmem:[#allocation2 + $0x200] sm:$0xff]  ;;  %v2878_v30 = vrot.slane %v2877_v33, 1  ;;  %v2696_v23 = vpop.f32.mrf.mxu2  ;;  %3254 = vmatpush.msra.mxu0 %v2960_v2  ;;  %3215 = vmatpush.msra.mxu1 %v2955_v59  ;;  %v3892_v16 = vpop.eup %3891  ;;  %v3055_v25 = vld [vmem:[#allocation2 + $0x370] sm:$0xff]  ;;  %v3044_v2 = vld [vmem:[#allocation2 + $0x318] sm:$0xff] }
 0x311   : > { %3157 = vmatpush.msrb.mxu3 %v3009_v46  ;;  %v2697_v27 = vadd.f32 %v2696_v23, %v2631_v14  ;;  %3895 = vtanh.f32 %v2774_v5  ;;  %3264 = vmatpush.msra.mxu2 %v3064_v39  ;;  %v3043_v26 = vld [vmem:[#allocation2 + $0x310] sm:$0xff]  ;;  %v3036_v5 = vld [vmem:[#allocation2 + $0x2d8] sm:$0xff] }
 0x312   : > { %v2895_v32 = vrot.slane %v2894_v55, 4  ;;  %v2575_v47 = vpop.f32.mrf.mxu3  ;;  %v2879_v24 = vadd.f32 %v2878_v30, %v2877_v33  ;;  %3255 = vmatpush.msra.mxu0 %v2956_v58  ;;  %3216 = vmatpush.msra.mxu1 %v2951_v42  ;;  %v3047_v33 = vld [vmem:[#allocation2 + $0x330] sm:$0xff] }
 0x313   : > { %v2576_v51 = vadd.f32 %v2575_v47, %v2510_v1  ;;  %v2634_v18 = vpop.f32.mrf.mxu0  ;;  %3222 = vmatpush.msra.mxu3 %v3071_v52  ;;  %3265 = vmatpush.msra.mxu2 %v3060_v19  ;;  %v3031_v40 = vld [vmem:[#allocation2 + $0x2b0] sm:$0xff] }
 0x314   : > { %v2896_v12 = vadd.f32 %v2895_v32, %v2894_v55  ;;  %v2938_v28 = vmul.f32 %v6000_v10, %v2879_v24  ;;  %3256 = vmatpush.msra.mxu0 %v2952_v21  ;;  %3217 = vmatpush.msra.mxu1 %v2947_v8  ;;  %v3048_v32 = vld [vmem:[#allocation2 + $0x338] sm:$0xff] }
 0x315   : > { %v2738_v31 = vadd.f32 %v2576_v51, %v5959_v50  ;;  %3223 = vmatpush.msra.mxu3 %v3067_v45  ;;  %v2948_v50 = vld [vmem:[#allocation2 + $0x18] sm:$0xff]  ;;  %v3894_v37 = vpop.eup %3893  ;;  %3266 = vmatpush.msra.mxu2 %v3056_v62  ;;  %v3011_v62 = vld [vmem:[#allocation2 + $0x210] sm:$0xff] }
 0x316   : > { %v2897_v13 = vrot.slane %v2896_v12, 2  ;;  %v2887_v34 = vadd.f32 %v3894_v37, %v3892_v16  ;;  %v6097_v14 = vsel %vm3105_vm9, %v2938_v28, %v6079_v9  ;;  %3257 = vmatpush.msra.mxu0 %v2948_v50  ;;  %v3051_v9 = vld [vmem:[#allocation2 + $0x350] sm:$0xff]  ;;  %v3028_v21 = vld [vmem:[#allocation2 + $0x298] sm:$0xff] }
 0x317   : > { %v2776_v17 = vadd.f32 %v5972_v3, %v2738_v31  ;;  %v2733_v3 = vadd.f32 %v2697_v27, %v5962_v60  ;;  %3224 = vmatpush.msra.mxu3 %v3063_v35  ;;  %v3896_v60 = vpop.eup %3895  ;;  %3267 = vmatpush.msra.mxu2 %v3052_v20  ;;  %v3032_v31 = vld [vmem:[#allocation2 + $0x2b8] sm:$0xff] }
 0x318   : > { %v2898_v6 = vadd.f32 %v2897_v13, %v2896_v12  ;;  %v2888_v56 = vrot.slane %v2887_v34, 4  ;;  %v2699_v29 = vpop.f32.mrf.mxu2  ;;  %v3035_v12 = vld [vmem:[#allocation2 + $0x2d0] sm:$0xff]  ;;  %v3024_v50 = vld [vmem:[#allocation2 + $0x278] sm:$0xff] }
 0x319   : > { %3897 = vtanh.f32 %v2776_v17  ;;  %3225 = vmatpush.msra.mxu3 %v3059_v11  ;;  %v2700_v15 = vadd.f32 %v2699_v29, %v2634_v18  ;;  %v2771_v4 = vadd.f32 %v5990_v54, %v2733_v3  ;;  %3268 = vmatpush.msra.mxu2 %v3048_v32  ;;  %v3027_v18 = vld [vmem:[#allocation2 + $0x290] sm:$0xff]  ;;  %v3020_v3 = vld [vmem:[#allocation2 + $0x258] sm:$0xff] }
 0x31a   : > { %v2899_v22 = vrot.slane %v2898_v6, 1  ;;  %v2889_v48 = vadd.f32 %v2888_v56, %v2887_v34  ;;  %v3019_v34 = vld [vmem:[#allocation2 + $0x250] sm:$0xff]  ;;  %v3016_v56 = vld [vmem:[#allocation2 + $0x238] sm:$0xff] }
 0x31b   : > { %3226 = vmatpush.msra.mxu3 %v3055_v25  ;;  %v2735_v49 = vadd.f32 %v2700_v15, %v5970_v38  ;;  %v2637_v41 = vpop.f32.mrf.mxu0  ;;  %3899 = vtanh.f32 %v2771_v4  ;;  %v3039_v38 = vld [vmem:[#allocation2 + $0x2f0] sm:$0xff]  ;;  %3269 = vmatpush.msra.mxu2 %v3044_v2  ;;  %v3012_v15 = vld [vmem:[#allocation2 + $0x218] sm:$0xff] }
 0x31c   : > { %v2900_v63 = vadd.f32 %v2899_v22, %v2898_v6  ;;  %v2890_v36 = vrot.slane %v2889_v48, 2  ;;  %v3023_v6 = vld [vmem:[#allocation2 + $0x270] sm:$0xff] }
 0x31d   : > { %3227 = vmatpush.msra.mxu3 %v3051_v9  ;;  %v2773_v47 = vadd.f32 %v5990_v54, %v2735_v49  ;;  %3270 = vmatpush.msra.mxu2 %v3040_v0  ;;  %v3316_v2 = vld [vmem:[%s6332_s5 + $0xf0] sm:$0xff]  ;;  %v3314_v0 = vld [vmem:[%s6332_s5 + $0xe0] sm:$0xff] }
 0x31e   : > { %v2941_v55 = vmul.f32 %v6000_v10, %v2900_v63  ;;  %v2891_v51 = vadd.f32 %v2890_v36, %v2889_v48 }
 0x31f   : > { %v3898_v1 = vpop.eup %3897  ;;  %3228 = vmatpush.msra.mxu3 %v3047_v33  ;;  %3901 = vtanh.f32 %v2773_v47  ;;  %3271 = vmatpush.msra.mxu2 %v3036_v5  ;;  %v3301_v47 = vld [vmem:[%s6332_s5 + $0x78] sm:$0xff]  ;;  %v3332_v5 = vld [vmem:[%s6332_s5 + $0x170] sm:$0xff] }
 0x320   : > { %v2908_v61 = vadd.f32 %v3898_v1, %v3896_v60  ;;  %v6104_v7 = vsel %vm3109_vm11, %v2941_v55, %v6087_v44  ;;  %v2892_v59 = vrot.slane %v2891_v51, 1  ;;  %v2702_v44 = vpop.f32.mrf.mxu2 }
 0x321   : > { %3229 = vmatpush.msra.mxu3 %v3043_v26  ;;  %v2703_v58 = vadd.f32 %v2702_v44, %v2637_v41  ;;  %v3900_v42 = vpop.eup %3899  ;;  %3272 = vmatpush.msra.mxu2 %v3032_v31  ;;  %v3317_v26 = vld [vmem:[%s6332_s5 + $0xf8] sm:$0xff]  ;;  %v3347_v31 = vld [vmem:[%s6332_s5 + $0x1e8] sm:$0xff] }
 0x322   : > { %v2909_v46 = vrot.slane %v2908_v61, 4  ;;  %v2893_v52 = vadd.f32 %v2892_v59, %v2891_v51  ;;  %v3299_v51 = vld [vmem:[%s6332_s5 + $0x68] sm:$0xff]  ;;  %v3297_v59 = vld [vmem:[%s6332_s5 + $0x58] sm:$0xff] }
 0x323   : > { %3230 = vmatpush.msra.mxu3 %v3039_v38  ;;  %v2737_v43 = vadd.f32 %v2703_v58, %v5979_v53  ;;  %v2640_v17 = vpop.f32.mrf.mxu0  ;;  %3273 = vmatpush.msra.mxu2 %v3028_v21  ;;  %v3298_v38 = vld [vmem:[%s6332_s5 + $0x60] sm:$0xff]  ;;  %v3349_v44 = vld [vmem:[%s6332_s5 + $0x1f8] sm:$0xff]  ;;  %v3331_v58 = vld [vmem:[%s6332_s5 + $0x168] sm:$0xff] }
 0x324   : > { %v2910_v30 = vadd.f32 %v2909_v46, %v2908_v61  ;;  %v2940_v13 = vmul.f32 %v6000_v10, %v2893_v52  ;;  %v3315_v46 = vld [vmem:[%s6332_s5 + $0xe8] sm:$0xff]  ;;  %v3296_v52 = vld [vmem:[%s6332_s5 + $0x50] sm:$0xff]  ;;  %v3345_v21 = vld [vmem:[%s6332_s5 + $0x1d8] sm:$0xff] }
 0x325   : > { %3231 = vmatpush.msra.mxu3 %v3035_v12  ;;  %v3902_v27 = vpop.eup %3901  ;;  %v2775_v53 = vadd.f32 %v5990_v54, %v2737_v43  ;;  %3274 = vmatpush.msra.mxu2 %v3024_v50  ;;  %v3313_v12 = vld [vmem:[%s6332_s5 + $0xd8] sm:$0xff]  ;;  %v3310_v43 = vld [vmem:[%s6332_s5 + $0xc0] sm:$0xff]  ;;  %v3327_v50 = vld [vmem:[%s6332_s5 + $0x148] sm:$0xff] }
 0x326   : > { %v2911_v23 = vrot.slane %v2910_v30, 2  ;;  %v2901_v45 = vadd.f32 %v3902_v27, %v3900_v42  ;;  %v3117_v16 = vsel %vm3107_vm10, %v2940_v13, %v6097_v14  ;;  %v3015_v14 = vld [vmem:[#allocation2 + $0x230] sm:$0xff]  ;;  %v3330_v42 = vld [vmem:[%s6332_s5 + $0x160] sm:$0xff]  ;;  %v3295_v13 = vld [vmem:[%s6332_s5 + $0x48] sm:$0xff] }
 0x327   : > { %3232 = vmatpush.msra.mxu3 %v3031_v40  ;;  %3275 = vmatpush.msra.mxu2 %v3020_v3  ;;  %3903 = vtanh.f32 %v2775_v53  ;;  %v3312_v40 = vld [vmem:[%s6332_s5 + $0xd0] sm:$0xff]  ;;  %v3311_v27 = vld [vmem:[%s6332_s5 + $0xc8] sm:$0xff]  ;;  %v3325_v53 = vld [vmem:[%s6332_s5 + $0x138] sm:$0xff] }
 0x328   : > { %v2912_v24 = vadd.f32 %v2911_v23, %v2910_v30  ;;  %v2902_v35 = vrot.slane %v2901_v45, 4  ;;  %v2705_v39 = vpop.f32.mrf.mxu2  ;;  %v3333_v30 = vld [vmem:[%s6332_s5 + $0x178] sm:$0xff]  ;;  %v3348_v23 = vld [vmem:[%s6332_s5 + $0x1f0] sm:$0xff]  ;;  %v3291_v3 = vld [vmem:[%s6332_s5 + $0x28] sm:$0xff] }
 0x329   : > { %3233 = vmatpush.msra.mxu3 %v3027_v18  ;;  %v2706_v37 = vadd.f32 %v2705_v39, %v2640_v17  ;;  %3276 = vmatpush.msra.mxu2 %v3016_v56  ;;  %v3329_v18 = vld [vmem:[%s6332_s5 + $0x158] sm:$0xff]  ;;  %v3328_v17 = vld [vmem:[%s6332_s5 + $0x150] sm:$0xff] }
 0x32a   : > { %v2913_v8 = vrot.slane %v2912_v24, 1  ;;  %v2903_v22 = vadd.f32 %v2902_v35, %v2901_v45  ;;  %v3294_v45 = vld [vmem:[%s6332_s5 + $0x40] sm:$0xff]  ;;  %v3343_v35 = vld [vmem:[%s6332_s5 + $0x1c8] sm:$0xff]  ;;  %v3292_v39 = vld [vmem:[%s6332_s5 + $0x30] sm:$0xff] }
 0x32b   : > { %3234 = vmatpush.msra.mxu3 %v3023_v6  ;;  %v2739_v19 = vadd.f32 %v2706_v37, %v5984_v57  ;;  %3277 = vmatpush.msra.mxu2 %v3012_v15  ;;  %v3309_v6 = vld [vmem:[%s6332_s5 + $0xb8] sm:$0xff]  ;;  %v3326_v37 = vld [vmem:[%s6332_s5 + $0x140] sm:$0xff]  ;;  %v3340_v15 = vld [vmem:[%s6332_s5 + $0x1b0] sm:$0xff] }
 0x32c   : > { %v2914_v28 = vadd.f32 %v2913_v8, %v2912_v24  ;;  %v2904_v29 = vrot.slane %v2903_v22, 2  ;;  %v3346_v24 = vld [vmem:[%s6332_s5 + $0x1e0] sm:$0xff]  ;;  %v3344_v8 = vld [vmem:[%s6332_s5 + $0x1d0] sm:$0xff]  ;;  %v3289_v56 = vld [vmem:[%s6332_s5 + $0x18] sm:$0xff] }
 0x32d   : > { %3235 = vmatpush.msra.mxu3 %v3019_v34  ;;  %v2777_v25 = vadd.f32 %v5990_v54, %v2739_v19  ;;  %v3904_v4 = vpop.eup %3903  ;;  %v3342_v34 = vld [vmem:[%s6332_s5 + $0x1c0] sm:$0xff] }
 0x32e   : > { %v2943_v11 = vmul.f32 %v6000_v10, %v2914_v28  ;;  %v2905_v60 = vadd.f32 %v2904_v29, %v2903_v22  ;;  %v3308_v28 = vld [vmem:[%s6332_s5 + $0xb0] sm:$0xff]  ;;  %v3307_v22 = vld [vmem:[%s6332_s5 + $0xa8] sm:$0xff]  ;;  %v3290_v19 = vld [vmem:[%s6332_s5 + $0x20] sm:$0xff] }
 0x32f   : > { %3236 = vmatpush.msra.mxu3 %v3015_v14  ;;  %3905 = vtanh.f32 %v2777_v25  ;;  %v3306_v14 = vld [vmem:[%s6332_s5 + $0xa0] sm:$0xff]  ;;  %v3305_v29 = vld [vmem:[%s6332_s5 + $0x98] sm:$0xff]  ;;  %v3304_v25 = vld [vmem:[%s6332_s5 + $0x90] sm:$0xff] }
 0x330   : > { %v3112_v63 = vsel %vm3111_vm12, %v2943_v11, %v6104_v7  ;;  %v2906_v57 = vrot.slane %v2905_v60, 1  ;;  %v3341_v11 = vld [vmem:[%s6332_s5 + $0x1b8] sm:$0xff] }
 0x331   : > { %3138 = vmatmul.f32.vlgmr.msrb.gmra.mxu1 %v3112_v63  ;;  %3178 = vmatmul.f32.vlgmr.msrb.gmra.mxu0 %v3112_v63 }
 0x332   : > { %3237 = vmatpush.msra.mxu3 %v3011_v62  ;;  %v2907_v48 = vadd.f32 %v2906_v57, %v2905_v60  ;;  %3354 = vmatpush.msrb.mxu1 %v3301_v47  ;;  %v3324_v62 = vld [vmem:[%s6332_s5 + $0x130] sm:$0xff]  ;;  %v3287_v60 = vld [vmem:[%s6332_s5 + $0x8] sm:$0xff]  ;;  %v3073_v47 = vld [vmem:[%s6331_s4] sm:$0xf] }
 0x333   : > { %3394 = vmatpush.msrb.mxu0 %v3333_v30  ;;  %v3303_v57 = vld [vmem:[%s6332_s5 + $0x88] sm:$0xff] }
 0x334   : > { %v2942_v55 = vmul.f32 %v6000_v10, %v2907_v48  ;;  %v3323_v48 = vld [vmem:[%s6332_s5 + $0x128] sm:$0xff] }
 0x335   : > { %v3906_v9 = vpop.eup %3905  ;;  %3395 = vmatpush.msrb.mxu0 %v3332_v5  ;;  %v3078_v5 = vperm.slane %v3073_v47, 3 }
 0x336   : > { %v2915_v54 = vadd.f32 %v3906_v9, %v3904_v4  ;;  %v3118_v20 = vsel %vm3109_vm11, %v2942_v55, %v3117_v16  ;;  %v3293_v16 = vld [vmem:[%s6332_s5 + $0x38] sm:$0xff]  ;;  %v3339_v4 = vld [vmem:[%s6332_s5 + $0x1a8] sm:$0xff]  ;;  %v3286_v55 = vld [vmem:[%s6332_s5] sm:$0xff] }
 0x337   : > { %3396 = vmatpush.msrb.mxu0 %v3331_v58  ;;  %v3302_v9 = vld [vmem:[%s6332_s5 + $0x80] sm:$0xff] }
 0x338   : > { %v2916_v1 = vrot.slane %v2915_v54, 4 }
 0x339   : > { %3218 = vmatmul.f32.vlgmr.msra.gmra.mxu1 %v3112_v63  ;;  %3258 = vmatmul.f32.vlgmr.msra.gmra.mxu0 %v3112_v63  ;;  %v3288_v63 = vld [vmem:[%s6332_s5 + $0x10] sm:$0xff] }
 0x33a   : > { %v2917_v49 = vadd.f32 %v2916_v1, %v2915_v54  ;;  %3397 = vmatpush.msrb.mxu0 %v3330_v42  ;;  %v3322_v54 = vld [vmem:[%s6332_s5 + $0x120] sm:$0xff]  ;;  %v3321_v1 = vld [vmem:[%s6332_s5 + $0x118] sm:$0xff] }
 0x33c   : > { %v2918_v36 = vrot.slane %v2917_v49, 2  ;;  %3398 = vmatpush.msrb.mxu0 %v3329_v18 }
 0x33e   : > { %v2919_v61 = vadd.f32 %v2918_v36, %v2917_v49  ;;  %3399 = vmatpush.msrb.mxu0 %v3328_v17  ;;  %v3337_v49 = vld [vmem:[%s6332_s5 + $0x198] sm:$0xff]  ;;  %v3320_v36 = vld [vmem:[%s6332_s5 + $0x110] sm:$0xff] }
 0x340   : > { %v2920_v41 = vrot.slane %v2919_v61, 1  ;;  %3400 = vmatpush.msrb.mxu0 %v3327_v50 }
 0x342   : > { %v2921_v7 = vadd.f32 %v2920_v41, %v2919_v61  ;;  %3401 = vmatpush.msrb.mxu0 %v3326_v37  ;;  %v3336_v61 = vld [vmem:[%s6332_s5 + $0x190] sm:$0xff]  ;;  %v3319_v41 = vld [vmem:[%s6332_s5 + $0x108] sm:$0xff] }
 0x344   : > { %v2944_v33 = vmul.f32 %v6000_v10, %v2921_v7  ;;  %v3300_v10 = vld [vmem:[%s6332_s5 + $0x70] sm:$0xff]  ;;  %3402 = vmatpush.msrb.mxu0 %v3325_v53  ;;  %v3335_v7 = vld [vmem:[%s6332_s5 + $0x188] sm:$0xff] }
 0x345   : > { %3355 = vmatpush.msrb.mxu1 %v3300_v10 }
 0x346   : > { %v3119_v32 = vsel %vm3111_vm12, %v2944_v33, %v3118_v20  ;;  %3403 = vmatpush.msrb.mxu0 %v3324_v62  ;;  %v3338_v20 = vld [vmem:[%s6332_s5 + $0x1a0] sm:$0xff] }
 0x347   : > { %3158 = vmatmul.f32.vlgmr.msrb.gmra.mxu3 %v3119_v32  ;;  %3198 = vmatmul.f32.vlgmr.msrb.gmra.mxu2 %v3119_v32  ;;  %v3318_v33 = vld [vmem:[%s6332_s5 + $0x100] sm:$0xff] }
 0x348   : > { %3374 = vmatpush.msrb.mxu3 %v3317_v26  ;;  %3356 = vmatpush.msrb.mxu1 %v3299_v51  ;;  %v3076_v51 = vperm.slane %v3073_v47, 1 }
 0x349   : > { %3414 = vmatpush.msrb.mxu2 %v3349_v44  ;;  %3404 = vmatpush.msrb.mxu0 %v3323_v48 }
 0x34a   : > { %3375 = vmatpush.msrb.mxu3 %v3316_v2  ;;  %3357 = vmatpush.msrb.mxu1 %v3298_v38  ;;  %v3075_v2 = vperm.slane %v3073_v47, 0 }
 0x34b   : > { %3415 = vmatpush.msrb.mxu2 %v3348_v23  ;;  %3405 = vmatpush.msrb.mxu0 %v3322_v54 }
 0x34c   : > { %3376 = vmatpush.msrb.mxu3 %v3315_v46  ;;  %3358 = vmatpush.msrb.mxu1 %v3297_v59 }
 0x34d   : > { %3416 = vmatpush.msrb.mxu2 %v3347_v31  ;;  %3406 = vmatpush.msrb.mxu0 %v3321_v1 }
 0x34e   : > { %3377 = vmatpush.msrb.mxu3 %v3314_v0  ;;  %3359 = vmatpush.msrb.mxu1 %v3296_v52 }
 0x34f   : > { %3238 = vmatmul.f32.vlgmr.msra.gmra.mxu3 %v3119_v32  ;;  %3278 = vmatmul.f32.vlgmr.msra.gmra.mxu2 %v3119_v32  ;;  %v3334_v32 = vld [vmem:[%s6332_s5 + $0x180] sm:$0xff] }
 0x350   : > { %3378 = vmatpush.msrb.mxu3 %v3313_v12  ;;  %3417 = vmatpush.msrb.mxu2 %v3346_v24  ;;  %v3077_v12 = vperm.slane %v3073_v47, 2 }
 0x351   : > { %3360 = vmatpush.msrb.mxu1 %v3295_v13  ;;  %3407 = vmatpush.msrb.mxu0 %v3320_v36 }
 0x352   : > { %3379 = vmatpush.msrb.mxu3 %v3312_v40  ;;  %3418 = vmatpush.msrb.mxu2 %v3345_v21 }
 0x353   : > { %3361 = vmatpush.msrb.mxu1 %v3294_v45  ;;  %3408 = vmatpush.msrb.mxu0 %v3319_v41 }
 0x354   : > { %3380 = vmatpush.msrb.mxu3 %v3311_v27  ;;  %3419 = vmatpush.msrb.mxu2 %v3344_v8 }
 0x355   : > { %3362 = vmatpush.msrb.mxu1 %v3293_v16  ;;  %3409 = vmatpush.msrb.mxu0 %v3318_v33 }
 0x356   : > { %3381 = vmatpush.msrb.mxu3 %v3310_v43  ;;  %3420 = vmatpush.msrb.mxu2 %v3343_v35  ;;  %v3840_v43 = vld [vmem:[%s6333_s6] ss:$0 sm:$0xff] }
 0x357   : > { %3363 = vmatpush.msrb.mxu1 %v3292_v39 }
 0x358   : > { %3382 = vmatpush.msrb.mxu3 %v3309_v6  ;;  %3421 = vmatpush.msrb.mxu2 %v3342_v34 }
 0x359   : > { %3364 = vmatpush.msrb.mxu1 %v3291_v3 }
 0x35a   : > { %3383 = vmatpush.msrb.mxu3 %v3308_v28  ;;  %3422 = vmatpush.msrb.mxu2 %v3341_v11 }
 0x35b   : > { %3365 = vmatpush.msrb.mxu1 %v3290_v19 }
 0x35c   : > { %3384 = vmatpush.msrb.mxu3 %v3307_v22  ;;  %3423 = vmatpush.msrb.mxu2 %v3340_v15 }
 0x35d   : > { %3366 = vmatpush.msrb.mxu1 %v3289_v56 }
 0x35e   : > { %3385 = vmatpush.msrb.mxu3 %v3306_v14  ;;  %3424 = vmatpush.msrb.mxu2 %v3339_v4 }
 0x35f   : > { %3367 = vmatpush.msrb.mxu1 %v3288_v63 }
 0x360   : > { %3386 = vmatpush.msrb.mxu3 %v3305_v29  ;;  %3425 = vmatpush.msrb.mxu2 %v3338_v20 }
 0x361   : > { %3368 = vmatpush.msrb.mxu1 %v3287_v60 }
 0x362   : > { %3387 = vmatpush.msrb.mxu3 %v3304_v25  ;;  %3426 = vmatpush.msrb.mxu2 %v3337_v49 }
 0x363   : > { %3369 = vmatpush.msrb.mxu1 %v3286_v55 }
 0x364   : > { %3388 = vmatpush.msrb.mxu3 %v3303_v57  ;;  %3427 = vmatpush.msrb.mxu2 %v3336_v61 }
 0x366   : > { %3389 = vmatpush.msrb.mxu3 %v3302_v9  ;;  %3428 = vmatpush.msrb.mxu2 %v3335_v7 }
 0x368   : > { %3429 = vmatpush.msrb.mxu2 %v3334_v32 }
 0x3ae   : > { %v3139_v26 = vpop.f32.mrf.mxu1  ;;  %v3179_v10 = vpop.f32.mrf.mxu0 }
 0x3af   : > { %v3140_v46 = vadd.f32 %v3139_v26, %v3075_v2  ;;  %v3180_v38 = vadd.f32 %v3179_v10, %v3076_v51 }
 0x3b6   : > { %v3219_v52 = vpop.f32.mrf.mxu1  ;;  %v3259_v40 = vpop.f32.mrf.mxu0 }
 0x3b7   : > { %v3220_v31 = vadd.f32 %v3219_v52, %v3077_v12  ;;  %v3260_v42 = vadd.f32 %v3259_v40, %v3078_v5 }
 0x3ca   : > { %v3159_v0 = vpop.f32.mrf.mxu3  ;;  %v3199_v59 = vpop.f32.mrf.mxu2 }
 0x3cb   : > { %v3160_v30 = vadd.f32 %v3159_v0, %v3140_v46  ;;  %v3200_v44 = vadd.f32 %v3199_v59, %v3180_v38 }
 0x3cd   : > { %v3282_v23 = vmax.f32 %v3160_v30, 0.0  ;;  %v3283_v58 = vmax.f32 %v3200_v44, 0.0 }
 0x3cf   : > { %3370 = vmatmul.f32.vlgmr.msrb.gmra.mxu1 %v3282_v23  ;;  %3390 = vmatmul.f32.vlgmr.msrb.gmra.mxu3 %v3283_v58 }
 0x3d2   : > { %v3239_v24 = vpop.f32.mrf.mxu3  ;;  %v3279_v13 = vpop.f32.mrf.mxu2 }
 0x3d3   : > { %v3240_v27 = vadd.f32 %v3239_v24, %v3220_v31  ;;  %v3280_v18 = vadd.f32 %v3279_v13, %v3260_v42 }
 0x3d5   : > { %v3284_v21 = vmax.f32 %v3240_v27, 0.0  ;;  %v3285_v45 = vmax.f32 %v3280_v18, 0.0 }
 0x3d7   : > { %3410 = vmatmul.f32.vlgmr.msrb.gmra.mxu0 %v3284_v21  ;;  %3430 = vmatmul.f32.vlgmr.msrb.gmra.mxu2 %v3285_v45 }
 0x44c   : > { %v3371_v17 = vpop.f32.mrf.mxu1 }
 0x44d   : > { %v3372_v16 = vadd.f32 %v3840_v43, %v3371_v17 }
 0x452   : > { %v3391_v8 = vpop.f32.mrf.mxu3 }
 0x453   : > { %v3392_v6 = vadd.f32 %v3391_v8, %v3372_v16 }
 0x454   : > { %v3411_v50 = vpop.f32.mrf.mxu0 }
 0x455   : > { %v3412_v35 = vadd.f32 %v3411_v50, %v3392_v6 }
 0x45a   : > { %v3431_v39 = vpop.f32.mrf.mxu2 }
 0x45b   : > { %v3432_v28 = vadd.f32 %v3431_v39, %v3412_v35 }
 0x45d   : > { %3435 = vst.msk [vmem:[%s298_s26] sm:$0xff] %vm3434_vm13, %v3432_v28 }
 0x45e PF: > { %s18_s24 = sadd.s32 1, %s3974_s24  }
 0x45f   : > { %p15_p8 = scmp.ge.s32.totalorder %s18_s24, 4  }
 0x461   :  { %17 = sbr.rel (!%p15_p8) target bundleno = 1 (0x1), region = 87 }
 0x466   :  { %3455 = vsyncpa [#allocation3], 1 }
 0x467   :  { %3457 = vsyncpa [#allocation3 + $0x1], 1 }

</bundles_post_ra>
